<compile_context>
chip_gen: v6e
topology: v6e:2x2x1
jax: 0.10.0
libtpu: 0.0.40
codegen_flags: <defaults>
</compile_context>

<pallas_src>
import functools

import jax
import jax.numpy as jnp
from jax.experimental import pallas as pl
from jax.experimental.pallas import tpu as pltpu

LN_EPS = 1e-5


# ----------------------------- in-kernel helpers -----------------------------

def _layer_norm(x, g, b):
    mu = jnp.mean(x, axis=-1, keepdims=True)
    var = jnp.mean((x - mu) ** 2, axis=-1, keepdims=True)
    return (x - mu) * jax.lax.rsqrt(var + LN_EPS) * g + b


def _gelu(x):
    # TODO(synk): PyTorch F.gelu defaults to the exact erf GELU; tanh
    # approximation is used since erf is not guaranteed to lower in Mosaic
    # (max deviation ~1e-3).
    c = 0.7978845608028654  # sqrt(2/pi)
    return 0.5 * x * (1.0 + jnp.tanh(c * (x + 0.044715 * x * x * x)))


# --------------------------- fully fused SAINT kernel -------------------------

def _saint_fused_kernel(x_ref,
                        ln1g_ref, ln1b_ref, wq_ref, wk_ref, wv_ref, wo_ref, bo_ref,
                        ln2g_ref, ln2b_ref,
                        w1v_ref, b1v_ref, w1g_ref, b1g_ref, w2_ref, b2_ref,
                        mw1_ref, mb1_ref, mw2_ref, mb2_ref,
                        out_ref, *, depth, heads, dim_head, matmul_dtype):
    Bb, n, d = x_ref.shape
    rows = Bb * n
    scale = dim_head ** -0.5

    def mm(a, b):
        # bf16 (or f32) MXU matmul with f32 accumulation.
        return jnp.dot(a.astype(matmul_dtype), b.astype(matmul_dtype),
                       preferred_element_type=jnp.float32)

    # flatten batch x features into the sublane axis; attention is handled
    # block-diagonally per batch element below.
    x = x_ref[...].reshape(rows, d)

    for l in range(depth):                       # static unroll over depth
        # ---------- attention block: x = Attn(LN1(x)) + LN1(x) ----------
        xn = _layer_norm(x, ln1g_ref[l], ln1b_ref[l])            # (rows, d) f32
        attn_acc = jnp.zeros((rows, d), jnp.float32)
        for h in range(heads):                                   # static unroll
            q = mm(xn, wq_ref[l, h])                             # (rows, dh)
            k = mm(xn, wk_ref[l, h])
            v = mm(xn, wv_ref[l, h])
            av_rows = []
            for b in range(Bb):   # attention is block-diagonal per batch element
                qb = q[b * n:(b + 1) * n]
                kb = k[b * n:(b + 1) * n]
                vb = v[b * n:(b + 1) * n]
                sim = mm(qb, kb.T) * scale                       # (n, n) f32
                sim = sim - jnp.max(sim, axis=-1, keepdims=True)
                e = jnp.exp(sim)
                p = e * pl.reciprocal(jnp.sum(e, axis=-1, keepdims=True),
                                      approx=True)
                av_rows.append(mm(p, vb))                        # (n, dh)
            av = av_rows[0] if Bb == 1 else jnp.concatenate(av_rows, axis=0)
            # accumulate this head's slice of the output projection
            attn_acc = attn_acc + mm(av, wo_ref[l, h])           # (rows, d)
        x = attn_acc + bo_ref[l] + xn

        # ---------- feed-forward block: x = GEGLU_FF(LN2(x)) + LN2(x) ----------
        xn2 = _layer_norm(x, ln2g_ref[l], ln2b_ref[l])
        val = mm(xn2, w1v_ref[l]) + b1v_ref[l]                   # (rows, 4d)
        gate = mm(xn2, w1g_ref[l]) + b1g_ref[l]                  # (rows, 4d)
        hidden = val * _gelu(gate)
        x = mm(hidden, w2_ref[l]) + b2_ref[l] + xn2

    # ---------- fused sep_MLP heads (categorical + continuous) ----------
    x3 = x.reshape(Bb, n, d)
    outs = []
    for i in range(n):                                           # static unroll
        xi = x3[:, i, :]                                         # (Bb, d)
        hi = jnp.maximum(mm(xi, mw1_ref[i]) + mb1_ref[i], 0.0)   # (Bb, 5d)
        outs.append(mm(hi, mw2_ref[i]) + mb2_ref[i])             # (Bb, c_pad)
    out_ref[...] = jnp.stack(outs, axis=1)                       # single lane-dense store


# ------------------------------- grid selection -------------------------------

def _grid_batch_blocks(batch):
    """2 'parallel' grid steps over batch on dual-TensorCore chips (v7x), else 1."""
    n_tc = 1
    try:
        kind = jax.devices()[0].device_kind.lower()
        if ("v7" in kind) or ("7x" in kind):
            n_tc = 2
    except Exception:
        pass
    return n_tc if (batch >= n_tc and batch % n_tc == 0) else 1


# ------------------------------ parameter init --------------------------------

def _uniform(key, shape, fan_in):
    bound = 1.0 / (fan_in ** 0.5)
    return jax.random.uniform(key, shape, jnp.float32, -bound, bound)


def init_saint_params(key, *, categories, num_continuous, dim, depth, heads,
                      dim_head, matmul_dtype=jnp.bfloat16):
    inner = heads * dim_head
    nc = len(categories)
    nfeats = nc + num_continuous
    out_dims = [int(c) for c in categories] + [1] * num_continuous
    c_pad = max(128, ((max(out_dims) + 127) // 128) * 128)   # lane-dense output slab

    keys = jax.random.split(key, depth + 1)
    L = {k: [] for k in ('ln1_g', 'ln1_b', 'wq', 'wk', 'wv', 'wo', 'bo',
                         'ln2_g', 'ln2_b', 'w1v', 'b1v', 'w1g', 'b1g', 'w2', 'b2')}

    def head_major(w):   # (dim, inner) -> (heads, dim, dim_head), head-major chunks
        return jnp.transpose(w.reshape(dim, heads, dim_head), (1, 0, 2))

    for l in range(depth):
        k_qkv, k_out, k_ff1, k_ff2 = jax.random.split(keys[l], 4)
        w_qkv = _uniform(k_qkv, (dim, 3 * inner), dim)            # to_qkv (no bias)
        kw, kb = jax.random.split(k_out)
        w_out = _uniform(kw, (inner, dim), inner)
        b_out = _uniform(kb, (1, dim), inner)
        kw, kb = jax.random.split(k_ff1)
        w_ff1 = _uniform(kw, (dim, 8 * dim), dim)
        b_ff1 = _uniform(kb, (1, 8 * dim), dim)
        kw, kb = jax.random.split(k_ff2)
        w_ff2 = _uniform(kw, (4 * dim, dim), 4 * dim)
        b_ff2 = _uniform(kb, (1, dim), 4 * dim)

        L['ln1_g'].append(jnp.ones((1, dim), jnp.float32))
        L['ln1_b'].append(jnp.zeros((1, dim), jnp.float32))
        L['wq'].append(head_major(w_qkv[:, :inner]))
        L['wk'].append(head_major(w_qkv[:, inner:2 * inner]))
        L['wv'].append(head_major(w_qkv[:, 2 * inner:]))
        L['wo'].append(w_out.reshape(heads, dim_head, dim))
        L['bo'].append(b_out)
        L['ln2_g'].append(jnp.ones((1, dim), jnp.float32))
        L['ln2_b'].append(jnp.zeros((1, dim), jnp.float32))
        L['w1v'].append(w_ff1[:, :4 * dim]); L['b1v'].append(b_ff1[:, :4 * dim])
        L['w1g'].append(w_ff1[:, 4 * dim:]); L['b1g'].append(b_ff1[:, 4 * dim:])
        L['w2'].append(w_ff2); L['b2'].append(b_ff2)

    matmul_keys = ('wq', 'wk', 'wv', 'wo', 'w1v', 'w1g', 'w2')
    transformer = {}
    for k, v in L.items():
        arr = jnp.stack(v, axis=0)
        transformer[k] = arr.astype(matmul_dtype) if k in matmul_keys else arr

    # fused sep_MLP heads: stack per-feature weights, zero-pad outputs to c_pad
    mlp_keys = jax.random.split(keys[depth], nfeats)
    mw1, mb1, mw2, mb2 = [], [], [], []
    for i, c in enumerate(out_dims):          # simple_MLP([dim, 5*dim, c])
        k1, k2 = jax.random.split(mlp_keys[i])
        kw, kb = jax.random.split(k1)
        w1 = _uniform(kw, (dim, 5 * dim), dim)
        b1 = _uniform(kb, (1, 5 * dim), dim)
        kw, kb = jax.random.split(k2)
        w2 = _uniform(kw, (5 * dim, c), 5 * dim)
        b2 = _uniform(kb, (1, c), 5 * dim)
        mw1.append(w1); mb1.append(b1)
        mw2.append(jnp.pad(w2, ((0, 0), (0, c_pad - c))))
        mb2.append(jnp.pad(b2, ((0, 0), (0, c_pad - c))))
    sep_mlp = dict(w1=jnp.stack(mw1).astype(matmul_dtype), b1=jnp.stack(mb1),
                   w2=jnp.stack(mw2).astype(matmul_dtype), b2=jnp.stack(mb2))

    return {'transformer': transformer, 'sep_mlp': sep_mlp}


# -------------------------------- SAINT forward --------------------------------

def saint_forward(params, x_categ_enc, x_cont_enc, *, categories, num_continuous,
                  heads, dim_head):
    x = jnp.concatenate([x_categ_enc, x_cont_enc], axis=1).astype(jnp.float32)
    B, n, d = x.shape
    t, m = params['transformer'], params['sep_mlp']
    depth = t['wq'].shape[0]
    c_pad = m['w2'].shape[-1]
    matmul_dtype = t['wq'].dtype

    weight_args = (t['ln1_g'], t['ln1_b'], t['wq'], t['wk'], t['wv'], t['wo'], t['bo'],
                   t['ln2_g'], t['ln2_b'],
                   t['w1v'], t['b1v'], t['w1g'], t['b1g'], t['w2'], t['b2'],
                   m['w1'], m['b1'], m['w2'], m['b2'])

    g = _grid_batch_blocks(B)
    Bb = B // g

    def resident(a):                      # weights fully VMEM-resident across grid
        zeros = (0,) * a.ndim
        return pl.BlockSpec(a.shape, lambda i: zeros)

    kernel = functools.partial(_saint_fused_kernel, depth=depth, heads=heads,
                               dim_head=dim_head, matmul_dtype=matmul_dtype)
    out = pl.pallas_call(
        kernel,
        out_shape=jax.ShapeDtypeStruct((B, n, c_pad), jnp.float32),
        grid=(g,),
        in_specs=[pl.BlockSpec((Bb, n, d), lambda i: (i, 0, 0))]
                 + [resident(a) for a in weight_args],
        out_specs=pl.BlockSpec((Bb, n, c_pad), lambda i: (i, 0, 0)),
        compiler_params=pltpu.CompilerParams(dimension_semantics=("parallel",)),
    )(x, *weight_args)

    nc = len(categories)
    cat_outs = [out[:, i, :int(categories[i])] for i in range(nc)]
    con_outs = [out[:, nc + j, :1] for j in range(num_continuous)]
    return cat_outs, con_outs


# -------------------------------------- main ------------------------------------

if __name__ == "__main__":
    categories = (3, 4, 5, 6, 7)    # num_categories = 5
    num_continuous = 3              # nfeats = 8 (sublane-aligned feature count)
    dim, depth, heads, dim_head = 32, 2, 4, 16
    B = 2

    key = jax.random.PRNGKey(0)
    k_par, k_cat, k_cont = jax.random.split(key, 3)
    params = init_saint_params(k_par, categories=categories,
                               num_continuous=num_continuous,
                               dim=dim, depth=depth, heads=heads, dim_head=dim_head)

    # SAINT.forward receives already-embedded categorical / continuous features.
    x_categ_enc = jax.random.normal(k_cat, (B, len(categories), dim), jnp.float32)
    x_cont_enc = jax.random.normal(k_cont, (B, num_continuous, dim), jnp.float32)

    cat_outs, con_outs = saint_forward(params, x_categ_enc, x_cont_enc,
                                       categories=categories,
                                       num_continuous=num_continuous,
                                       heads=heads, dim_head=dim_head)
    jax.block_until_ready(cat_outs)
    jax.block_until_ready(con_outs)

    assert len(cat_outs) == len(categories) and len(con_outs) == num_continuous
    for i, c in enumerate(categories):
        assert cat_outs[i].shape == (B, c)
        assert bool(jnp.all(jnp.isfinite(cat_outs[i])))
    for co in con_outs:
        assert co.shape == (B, 1)
        assert bool(jnp.all(jnp.isfinite(co)))

    print("KERNEL_OK")
</pallas_src>

<mosaic_0001>
module attributes {stable_mosaic.version = 11 : i64} {
  func.func @_saint_fused_kernel(%arg0: i32, %arg1: memref<2x8x32xf32, #tpu.memory_space<vmem>>, %arg2: memref<2x1x32xf32, #tpu.memory_space<vmem>>, %arg3: memref<2x1x32xf32, #tpu.memory_space<vmem>>, %arg4: memref<2x4x32x16xbf16, #tpu.memory_space<vmem>>, %arg5: memref<2x4x32x16xbf16, #tpu.memory_space<vmem>>, %arg6: memref<2x4x32x16xbf16, #tpu.memory_space<vmem>>, %arg7: memref<2x4x16x32xbf16, #tpu.memory_space<vmem>>, %arg8: memref<2x1x32xf32, #tpu.memory_space<vmem>>, %arg9: memref<2x1x32xf32, #tpu.memory_space<vmem>>, %arg10: memref<2x1x32xf32, #tpu.memory_space<vmem>>, %arg11: memref<2x32x128xbf16, #tpu.memory_space<vmem>>, %arg12: memref<2x1x128xf32, #tpu.memory_space<vmem>>, %arg13: memref<2x32x128xbf16, #tpu.memory_space<vmem>>, %arg14: memref<2x1x128xf32, #tpu.memory_space<vmem>>, %arg15: memref<2x128x32xbf16, #tpu.memory_space<vmem>>, %arg16: memref<2x1x32xf32, #tpu.memory_space<vmem>>, %arg17: memref<8x32x160xbf16, #tpu.memory_space<vmem>>, %arg18: memref<8x1x160xf32, #tpu.memory_space<vmem>>, %arg19: memref<8x160x128xbf16, #tpu.memory_space<vmem>>, %arg20: memref<8x1x128xf32, #tpu.memory_space<vmem>>, %arg21: memref<2x8x128xf32, #tpu.memory_space<vmem>>) attributes {dimension_semantics = [#tpu.dimension_semantics<parallel>], iteration_bounds = array<i64: 1>, scalar_prefetch = 0 : i64, scratch_operands = 0 : i64, tpu.core_type = #tpu.core_type<tc>, window_params = [{transform_indices = @transform_0, window_bounds = array<i64: 2, 8, 32>}, {pipeline_mode = #tpu.pipeline_mode<synchronous>, transform_indices = @transform_1, window_bounds = array<i64: 2, 1, 32>}, {pipeline_mode = #tpu.pipeline_mode<synchronous>, transform_indices = @transform_2, window_bounds = array<i64: 2, 1, 32>}, {pipeline_mode = #tpu.pipeline_mode<synchronous>, transform_indices = @transform_3, window_bounds = array<i64: 2, 4, 32, 16>}, {pipeline_mode = #tpu.pipeline_mode<synchronous>, transform_indices = @transform_4, window_bounds = array<i64: 2, 4, 32, 16>}, {pipeline_mode = #tpu.pipeline_mode<synchronous>, transform_indices = @transform_5, window_bounds = array<i64: 2, 4, 32, 16>}, {pipeline_mode = #tpu.pipeline_mode<synchronous>, transform_indices = @transform_6, window_bounds = array<i64: 2, 4, 16, 32>}, {pipeline_mode = #tpu.pipeline_mode<synchronous>, transform_indices = @transform_7, window_bounds = array<i64: 2, 1, 32>}, {pipeline_mode = #tpu.pipeline_mode<synchronous>, transform_indices = @transform_8, window_bounds = array<i64: 2, 1, 32>}, {pipeline_mode = #tpu.pipeline_mode<synchronous>, transform_indices = @transform_9, window_bounds = array<i64: 2, 1, 32>}, {pipeline_mode = #tpu.pipeline_mode<synchronous>, transform_indices = @transform_10, window_bounds = array<i64: 2, 32, 128>}, {pipeline_mode = #tpu.pipeline_mode<synchronous>, transform_indices = @transform_11, window_bounds = array<i64: 2, 1, 128>}, {pipeline_mode = #tpu.pipeline_mode<synchronous>, transform_indices = @transform_12, window_bounds = array<i64: 2, 32, 128>}, {pipeline_mode = #tpu.pipeline_mode<synchronous>, transform_indices = @transform_13, window_bounds = array<i64: 2, 1, 128>}, {pipeline_mode = #tpu.pipeline_mode<synchronous>, transform_indices = @transform_14, window_bounds = array<i64: 2, 128, 32>}, {pipeline_mode = #tpu.pipeline_mode<synchronous>, transform_indices = @transform_15, window_bounds = array<i64: 2, 1, 32>}, {pipeline_mode = #tpu.pipeline_mode<synchronous>, transform_indices = @transform_16, window_bounds = array<i64: 8, 32, 160>}, {pipeline_mode = #tpu.pipeline_mode<synchronous>, transform_indices = @transform_17, window_bounds = array<i64: 8, 1, 160>}, {pipeline_mode = #tpu.pipeline_mode<synchronous>, transform_indices = @transform_18, window_bounds = array<i64: 8, 160, 128>}, {pipeline_mode = #tpu.pipeline_mode<synchronous>, transform_indices = @transform_19, window_bounds = array<i64: 8, 1, 128>}, {transform_indices = @transform_20, window_bounds = array<i64: 2, 8, 128>}]} {
    %c0 = arith.constant 0 : index
    %c0_0 = arith.constant 0 : index
    %c0_1 = arith.constant 0 : index
    %0 = vector.load %arg1[%c0, %c0_0, %c0_1] : memref<2x8x32xf32, #tpu.memory_space<vmem>>, vector<2x8x32xf32>
    %1 = vector.shape_cast %0 : vector<2x8x32xf32> to vector<16x32xf32>
    %c0_2 = arith.constant 0 : index
    %c0_3 = arith.constant 0 : index
    %c0_4 = arith.constant 0 : index
    %2 = vector.load %arg2[%c0_2, %c0_3, %c0_4] : memref<2x1x32xf32, #tpu.memory_space<vmem>>, vector<1x1x32xf32>
    %3 = vector.shape_cast %2 : vector<1x1x32xf32> to vector<1x32xf32>
    %c0_5 = arith.constant 0 : index
    %c0_6 = arith.constant 0 : index
    %c0_7 = arith.constant 0 : index
    %4 = vector.load %arg3[%c0_5, %c0_6, %c0_7] : memref<2x1x32xf32, #tpu.memory_space<vmem>>, vector<1x1x32xf32>
    %5 = vector.shape_cast %4 : vector<1x1x32xf32> to vector<1x32xf32>
    %cst = arith.constant dense<0.000000e+00> : vector<16xf32>
    %6 = vector.multi_reduction <add>, %1, %cst [1] : vector<16x32xf32> to vector<16xf32>
    %7 = vector.shape_cast %6 : vector<16xf32> to vector<16x1xf32>
    %cst_8 = arith.constant 3.200000e+01 : f32
    %8 = vector.broadcast %cst_8 : f32 to vector<16x1xf32>
    %9 = arith.divf %7, %8 : vector<16x1xf32>
    %10 = vector.broadcast %9 : vector<16x1xf32> to vector<16x32xf32>
    %11 = arith.subf %1, %10 : vector<16x32xf32>
    %12 = arith.mulf %11, %11 : vector<16x32xf32>
    %cst_9 = arith.constant dense<0.000000e+00> : vector<16xf32>
    %13 = vector.multi_reduction <add>, %12, %cst_9 [1] : vector<16x32xf32> to vector<16xf32>
    %14 = vector.shape_cast %13 : vector<16xf32> to vector<16x1xf32>
    %cst_10 = arith.constant 3.200000e+01 : f32
    %15 = vector.broadcast %cst_10 : f32 to vector<16x1xf32>
    %16 = arith.divf %14, %15 : vector<16x1xf32>
    %17 = vector.broadcast %9 : vector<16x1xf32> to vector<16x32xf32>
    %18 = arith.subf %1, %17 : vector<16x32xf32>
    %cst_11 = arith.constant 9.99999974E-6 : f32
    %19 = vector.broadcast %cst_11 : f32 to vector<16x1xf32>
    %20 = arith.addf %16, %19 : vector<16x1xf32>
    %21 = math.rsqrt %20 : vector<16x1xf32>
    %22 = vector.broadcast %21 : vector<16x1xf32> to vector<16x32xf32>
    %23 = arith.mulf %18, %22 : vector<16x32xf32>
    %24 = vector.broadcast %3 : vector<1x32xf32> to vector<16x32xf32>
    %25 = arith.mulf %23, %24 : vector<16x32xf32>
    %26 = vector.broadcast %5 : vector<1x32xf32> to vector<16x32xf32>
    %27 = arith.addf %25, %26 : vector<16x32xf32>
    %cst_12 = arith.constant 0.000000e+00 : f32
    %28 = vector.broadcast %cst_12 : f32 to vector<16x32xf32>
    %c0_13 = arith.constant 0 : index
    %c0_14 = arith.constant 0 : index
    %c0_15 = arith.constant 0 : index
    %c0_16 = arith.constant 0 : index
    %29 = vector.load %arg4[%c0_13, %c0_14, %c0_15, %c0_16] : memref<2x4x32x16xbf16, #tpu.memory_space<vmem>>, vector<1x1x32x16xbf16>
    %30 = vector.shape_cast %29 : vector<1x1x32x16xbf16> to vector<32x16xbf16>
    %31 = arith.truncf %27 : vector<16x32xf32> to vector<16x32xbf16>
    %cst_17 = arith.constant dense<0.000000e+00> : vector<16x16xf32>
    %32 = tpu.matmul %31, %30, %cst_17 {dimension_numbers = #tpu.dot_dimension_numbers<[1], [0], [0], [1], [0, 0, 1, 1], [], []>} : vector<16x32xbf16>, vector<32x16xbf16>, vector<16x16xf32> -> vector<16x16xf32>
    %c0_18 = arith.constant 0 : index
    %c0_19 = arith.constant 0 : index
    %c0_20 = arith.constant 0 : index
    %c0_21 = arith.constant 0 : index
    %33 = vector.load %arg5[%c0_18, %c0_19, %c0_20, %c0_21] : memref<2x4x32x16xbf16, #tpu.memory_space<vmem>>, vector<1x1x32x16xbf16>
    %34 = vector.shape_cast %33 : vector<1x1x32x16xbf16> to vector<32x16xbf16>
    %35 = arith.truncf %27 : vector<16x32xf32> to vector<16x32xbf16>
    %cst_22 = arith.constant dense<0.000000e+00> : vector<16x16xf32>
    %36 = tpu.matmul %35, %34, %cst_22 {dimension_numbers = #tpu.dot_dimension_numbers<[1], [0], [0], [1], [0, 0, 1, 1], [], []>} : vector<16x32xbf16>, vector<32x16xbf16>, vector<16x16xf32> -> vector<16x16xf32>
    %c0_23 = arith.constant 0 : index
    %c0_24 = arith.constant 0 : index
    %c0_25 = arith.constant 0 : index
    %c0_26 = arith.constant 0 : index
    %37 = vector.load %arg6[%c0_23, %c0_24, %c0_25, %c0_26] : memref<2x4x32x16xbf16, #tpu.memory_space<vmem>>, vector<1x1x32x16xbf16>
    %38 = vector.shape_cast %37 : vector<1x1x32x16xbf16> to vector<32x16xbf16>
    %39 = arith.truncf %27 : vector<16x32xf32> to vector<16x32xbf16>
    %cst_27 = arith.constant dense<0.000000e+00> : vector<16x16xf32>
    %40 = tpu.matmul %39, %38, %cst_27 {dimension_numbers = #tpu.dot_dimension_numbers<[1], [0], [0], [1], [0, 0, 1, 1], [], []>} : vector<16x32xbf16>, vector<32x16xbf16>, vector<16x16xf32> -> vector<16x16xf32>
    %41 = vector.extract_strided_slice %32 {offsets = [0, 0], sizes = [8, 16], strides = [1, 1]} : vector<16x16xf32> to vector<8x16xf32>
    %42 = vector.extract_strided_slice %36 {offsets = [0, 0], sizes = [8, 16], strides = [1, 1]} : vector<16x16xf32> to vector<8x16xf32>
    %43 = vector.extract_strided_slice %40 {offsets = [0, 0], sizes = [8, 16], strides = [1, 1]} : vector<16x16xf32> to vector<8x16xf32>
    %44 = tpu.transpose %42, [1, 0] : vector<8x16xf32> -> vector<16x8xf32>
    %45 = arith.truncf %41 : vector<8x16xf32> to vector<8x16xbf16>
    %46 = arith.truncf %44 : vector<16x8xf32> to vector<16x8xbf16>
    %cst_28 = arith.constant dense<0.000000e+00> : vector<8x8xf32>
    %47 = tpu.matmul %45, %46, %cst_28 {dimension_numbers = #tpu.dot_dimension_numbers<[1], [0], [0], [1], [0, 0, 1, 1], [], []>} : vector<8x16xbf16>, vector<16x8xbf16>, vector<8x8xf32> -> vector<8x8xf32>
    %cst_29 = arith.constant 2.500000e-01 : f32
    %48 = vector.broadcast %cst_29 : f32 to vector<8x8xf32>
    %49 = arith.mulf %47, %48 : vector<8x8xf32>
    %cst_30 = arith.constant dense<0xFF800000> : vector<8xf32>
    %50 = vector.multi_reduction <maximumf>, %49, %cst_30 [1] : vector<8x8xf32> to vector<8xf32>
    %51 = vector.shape_cast %50 : vector<8xf32> to vector<8x1xf32>
    %52 = vector.broadcast %51 : vector<8x1xf32> to vector<8x8xf32>
    %53 = arith.subf %49, %52 : vector<8x8xf32>
    %54 = math.exp %53 : vector<8x8xf32>
    %cst_31 = arith.constant dense<0.000000e+00> : vector<8xf32>
    %55 = vector.multi_reduction <add>, %54, %cst_31 [1] : vector<8x8xf32> to vector<8xf32>
    %56 = vector.shape_cast %55 : vector<8xf32> to vector<8x1xf32>
    %57 = tpu.reciprocal %56 {approx = true} : vector<8x1xf32> -> vector<8x1xf32>
    %58 = vector.broadcast %57 : vector<8x1xf32> to vector<8x8xf32>
    %59 = arith.mulf %54, %58 : vector<8x8xf32>
    %60 = arith.truncf %59 : vector<8x8xf32> to vector<8x8xbf16>
    %61 = arith.truncf %43 : vector<8x16xf32> to vector<8x16xbf16>
    %cst_32 = arith.constant dense<0.000000e+00> : vector<8x16xf32>
    %62 = tpu.matmul %60, %61, %cst_32 {dimension_numbers = #tpu.dot_dimension_numbers<[1], [0], [0], [1], [0, 0, 1, 1], [], []>} : vector<8x8xbf16>, vector<8x16xbf16>, vector<8x16xf32> -> vector<8x16xf32>
    %63 = vector.extract_strided_slice %32 {offsets = [8, 0], sizes = [8, 16], strides = [1, 1]} : vector<16x16xf32> to vector<8x16xf32>
    %64 = vector.extract_strided_slice %36 {offsets = [8, 0], sizes = [8, 16], strides = [1, 1]} : vector<16x16xf32> to vector<8x16xf32>
    %65 = vector.extract_strided_slice %40 {offsets = [8, 0], sizes = [8, 16], strides = [1, 1]} : vector<16x16xf32> to vector<8x16xf32>
    %66 = tpu.transpose %64, [1, 0] : vector<8x16xf32> -> vector<16x8xf32>
    %67 = arith.truncf %63 : vector<8x16xf32> to vector<8x16xbf16>
    %68 = arith.truncf %66 : vector<16x8xf32> to vector<16x8xbf16>
    %cst_33 = arith.constant dense<0.000000e+00> : vector<8x8xf32>
    %69 = tpu.matmul %67, %68, %cst_33 {dimension_numbers = #tpu.dot_dimension_numbers<[1], [0], [0], [1], [0, 0, 1, 1], [], []>} : vector<8x16xbf16>, vector<16x8xbf16>, vector<8x8xf32> -> vector<8x8xf32>
    %cst_34 = arith.constant 2.500000e-01 : f32
    %70 = vector.broadcast %cst_34 : f32 to vector<8x8xf32>
    %71 = arith.mulf %69, %70 : vector<8x8xf32>
    %cst_35 = arith.constant dense<0xFF800000> : vector<8xf32>
    %72 = vector.multi_reduction <maximumf>, %71, %cst_35 [1] : vector<8x8xf32> to vector<8xf32>
    %73 = vector.shape_cast %72 : vector<8xf32> to vector<8x1xf32>
    %74 = vector.broadcast %73 : vector<8x1xf32> to vector<8x8xf32>
    %75 = arith.subf %71, %74 : vector<8x8xf32>
    %76 = math.exp %75 : vector<8x8xf32>
    %cst_36 = arith.constant dense<0.000000e+00> : vector<8xf32>
    %77 = vector.multi_reduction <add>, %76, %cst_36 [1] : vector<8x8xf32> to vector<8xf32>
    %78 = vector.shape_cast %77 : vector<8xf32> to vector<8x1xf32>
    %79 = tpu.reciprocal %78 {approx = true} : vector<8x1xf32> -> vector<8x1xf32>
    %80 = vector.broadcast %79 : vector<8x1xf32> to vector<8x8xf32>
    %81 = arith.mulf %76, %80 : vector<8x8xf32>
    %82 = arith.truncf %81 : vector<8x8xf32> to vector<8x8xbf16>
    %83 = arith.truncf %65 : vector<8x16xf32> to vector<8x16xbf16>
    %cst_37 = arith.constant dense<0.000000e+00> : vector<8x16xf32>
    %84 = tpu.matmul %82, %83, %cst_37 {dimension_numbers = #tpu.dot_dimension_numbers<[1], [0], [0], [1], [0, 0, 1, 1], [], []>} : vector<8x8xbf16>, vector<8x16xbf16>, vector<8x16xf32> -> vector<8x16xf32>
    %85 = tpu.concatenate %62, %84 in 0 : vector<8x16xf32>, vector<8x16xf32> -> vector<16x16xf32>
    %c0_38 = arith.constant 0 : index
    %c0_39 = arith.constant 0 : index
    %c0_40 = arith.constant 0 : index
    %c0_41 = arith.constant 0 : index
    %86 = vector.load %arg7[%c0_38, %c0_39, %c0_40, %c0_41] : memref<2x4x16x32xbf16, #tpu.memory_space<vmem>>, vector<1x1x16x32xbf16>
    %87 = vector.shape_cast %86 : vector<1x1x16x32xbf16> to vector<16x32xbf16>
    %88 = arith.truncf %85 : vector<16x16xf32> to vector<16x16xbf16>
    %cst_42 = arith.constant dense<0.000000e+00> : vector<16x32xf32>
    %89 = tpu.matmul %88, %87, %cst_42 {dimension_numbers = #tpu.dot_dimension_numbers<[1], [0], [0], [1], [0, 0, 1, 1], [], []>} : vector<16x16xbf16>, vector<16x32xbf16>, vector<16x32xf32> -> vector<16x32xf32>
    %90 = arith.addf %28, %89 : vector<16x32xf32>
    %c0_43 = arith.constant 0 : index
    %c1 = arith.constant 1 : index
    %c0_44 = arith.constant 0 : index
    %c0_45 = arith.constant 0 : index
    %91 = vector.load %arg4[%c0_43, %c1, %c0_44, %c0_45] : memref<2x4x32x16xbf16, #tpu.memory_space<vmem>>, vector<1x1x32x16xbf16>
    %92 = vector.shape_cast %91 : vector<1x1x32x16xbf16> to vector<32x16xbf16>
    %93 = arith.truncf %27 : vector<16x32xf32> to vector<16x32xbf16>
    %cst_46 = arith.constant dense<0.000000e+00> : vector<16x16xf32>
    %94 = tpu.matmul %93, %92, %cst_46 {dimension_numbers = #tpu.dot_dimension_numbers<[1], [0], [0], [1], [0, 0, 1, 1], [], []>} : vector<16x32xbf16>, vector<32x16xbf16>, vector<16x16xf32> -> vector<16x16xf32>
    %c0_47 = arith.constant 0 : index
    %c1_48 = arith.constant 1 : index
    %c0_49 = arith.constant 0 : index
    %c0_50 = arith.constant 0 : index
    %95 = vector.load %arg5[%c0_47, %c1_48, %c0_49, %c0_50] : memref<2x4x32x16xbf16, #tpu.memory_space<vmem>>, vector<1x1x32x16xbf16>
    %96 = vector.shape_cast %95 : vector<1x1x32x16xbf16> to vector<32x16xbf16>
    %97 = arith.truncf %27 : vector<16x32xf32> to vector<16x32xbf16>
    %cst_51 = arith.constant dense<0.000000e+00> : vector<16x16xf32>
    %98 = tpu.matmul %97, %96, %cst_51 {dimension_numbers = #tpu.dot_dimension_numbers<[1], [0], [0], [1], [0, 0, 1, 1], [], []>} : vector<16x32xbf16>, vector<32x16xbf16>, vector<16x16xf32> -> vector<16x16xf32>
    %c0_52 = arith.constant 0 : index
    %c1_53 = arith.constant 1 : index
    %c0_54 = arith.constant 0 : index
    %c0_55 = arith.constant 0 : index
    %99 = vector.load %arg6[%c0_52, %c1_53, %c0_54, %c0_55] : memref<2x4x32x16xbf16, #tpu.memory_space<vmem>>, vector<1x1x32x16xbf16>
    %100 = vector.shape_cast %99 : vector<1x1x32x16xbf16> to vector<32x16xbf16>
    %101 = arith.truncf %27 : vector<16x32xf32> to vector<16x32xbf16>
    %cst_56 = arith.constant dense<0.000000e+00> : vector<16x16xf32>
    %102 = tpu.matmul %101, %100, %cst_56 {dimension_numbers = #tpu.dot_dimension_numbers<[1], [0], [0], [1], [0, 0, 1, 1], [], []>} : vector<16x32xbf16>, vector<32x16xbf16>, vector<16x16xf32> -> vector<16x16xf32>
    %103 = vector.extract_strided_slice %94 {offsets = [0, 0], sizes = [8, 16], strides = [1, 1]} : vector<16x16xf32> to vector<8x16xf32>
    %104 = vector.extract_strided_slice %98 {offsets = [0, 0], sizes = [8, 16], strides = [1, 1]} : vector<16x16xf32> to vector<8x16xf32>
    %105 = vector.extract_strided_slice %102 {offsets = [0, 0], sizes = [8, 16], strides = [1, 1]} : vector<16x16xf32> to vector<8x16xf32>
    %106 = tpu.transpose %104, [1, 0] : vector<8x16xf32> -> vector<16x8xf32>
    %107 = arith.truncf %103 : vector<8x16xf32> to vector<8x16xbf16>
    %108 = arith.truncf %106 : vector<16x8xf32> to vector<16x8xbf16>
    %cst_57 = arith.constant dense<0.000000e+00> : vector<8x8xf32>
    %109 = tpu.matmul %107, %108, %cst_57 {dimension_numbers = #tpu.dot_dimension_numbers<[1], [0], [0], [1], [0, 0, 1, 1], [], []>} : vector<8x16xbf16>, vector<16x8xbf16>, vector<8x8xf32> -> vector<8x8xf32>
    %cst_58 = arith.constant 2.500000e-01 : f32
    %110 = vector.broadcast %cst_58 : f32 to vector<8x8xf32>
    %111 = arith.mulf %109, %110 : vector<8x8xf32>
    %cst_59 = arith.constant dense<0xFF800000> : vector<8xf32>
    %112 = vector.multi_reduction <maximumf>, %111, %cst_59 [1] : vector<8x8xf32> to vector<8xf32>
    %113 = vector.shape_cast %112 : vector<8xf32> to vector<8x1xf32>
    %114 = vector.broadcast %113 : vector<8x1xf32> to vector<8x8xf32>
    %115 = arith.subf %111, %114 : vector<8x8xf32>
    %116 = math.exp %115 : vector<8x8xf32>
    %cst_60 = arith.constant dense<0.000000e+00> : vector<8xf32>
    %117 = vector.multi_reduction <add>, %116, %cst_60 [1] : vector<8x8xf32> to vector<8xf32>
    %118 = vector.shape_cast %117 : vector<8xf32> to vector<8x1xf32>
    %119 = tpu.reciprocal %118 {approx = true} : vector<8x1xf32> -> vector<8x1xf32>
    %120 = vector.broadcast %119 : vector<8x1xf32> to vector<8x8xf32>
    %121 = arith.mulf %116, %120 : vector<8x8xf32>
    %122 = arith.truncf %121 : vector<8x8xf32> to vector<8x8xbf16>
    %123 = arith.truncf %105 : vector<8x16xf32> to vector<8x16xbf16>
    %cst_61 = arith.constant dense<0.000000e+00> : vector<8x16xf32>
    %124 = tpu.matmul %122, %123, %cst_61 {dimension_numbers = #tpu.dot_dimension_numbers<[1], [0], [0], [1], [0, 0, 1, 1], [], []>} : vector<8x8xbf16>, vector<8x16xbf16>, vector<8x16xf32> -> vector<8x16xf32>
    %125 = vector.extract_strided_slice %94 {offsets = [8, 0], sizes = [8, 16], strides = [1, 1]} : vector<16x16xf32> to vector<8x16xf32>
    %126 = vector.extract_strided_slice %98 {offsets = [8, 0], sizes = [8, 16], strides = [1, 1]} : vector<16x16xf32> to vector<8x16xf32>
    %127 = vector.extract_strided_slice %102 {offsets = [8, 0], sizes = [8, 16], strides = [1, 1]} : vector<16x16xf32> to vector<8x16xf32>
    %128 = tpu.transpose %126, [1, 0] : vector<8x16xf32> -> vector<16x8xf32>
    %129 = arith.truncf %125 : vector<8x16xf32> to vector<8x16xbf16>
    %130 = arith.truncf %128 : vector<16x8xf32> to vector<16x8xbf16>
    %cst_62 = arith.constant dense<0.000000e+00> : vector<8x8xf32>
    %131 = tpu.matmul %129, %130, %cst_62 {dimension_numbers = #tpu.dot_dimension_numbers<[1], [0], [0], [1], [0, 0, 1, 1], [], []>} : vector<8x16xbf16>, vector<16x8xbf16>, vector<8x8xf32> -> vector<8x8xf32>
    %cst_63 = arith.constant 2.500000e-01 : f32
    %132 = vector.broadcast %cst_63 : f32 to vector<8x8xf32>
    %133 = arith.mulf %131, %132 : vector<8x8xf32>
    %cst_64 = arith.constant dense<0xFF800000> : vector<8xf32>
    %134 = vector.multi_reduction <maximumf>, %133, %cst_64 [1] : vector<8x8xf32> to vector<8xf32>
    %135 = vector.shape_cast %134 : vector<8xf32> to vector<8x1xf32>
    %136 = vector.broadcast %135 : vector<8x1xf32> to vector<8x8xf32>
    %137 = arith.subf %133, %136 : vector<8x8xf32>
    %138 = math.exp %137 : vector<8x8xf32>
    %cst_65 = arith.constant dense<0.000000e+00> : vector<8xf32>
    %139 = vector.multi_reduction <add>, %138, %cst_65 [1] : vector<8x8xf32> to vector<8xf32>
    %140 = vector.shape_cast %139 : vector<8xf32> to vector<8x1xf32>
    %141 = tpu.reciprocal %140 {approx = true} : vector<8x1xf32> -> vector<8x1xf32>
    %142 = vector.broadcast %141 : vector<8x1xf32> to vector<8x8xf32>
    %143 = arith.mulf %138, %142 : vector<8x8xf32>
    %144 = arith.truncf %143 : vector<8x8xf32> to vector<8x8xbf16>
    %145 = arith.truncf %127 : vector<8x16xf32> to vector<8x16xbf16>
    %cst_66 = arith.constant dense<0.000000e+00> : vector<8x16xf32>
    %146 = tpu.matmul %144, %145, %cst_66 {dimension_numbers = #tpu.dot_dimension_numbers<[1], [0], [0], [1], [0, 0, 1, 1], [], []>} : vector<8x8xbf16>, vector<8x16xbf16>, vector<8x16xf32> -> vector<8x16xf32>
    %147 = tpu.concatenate %124, %146 in 0 : vector<8x16xf32>, vector<8x16xf32> -> vector<16x16xf32>
    %c0_67 = arith.constant 0 : index
    %c1_68 = arith.constant 1 : index
    %c0_69 = arith.constant 0 : index
    %c0_70 = arith.constant 0 : index
    %148 = vector.load %arg7[%c0_67, %c1_68, %c0_69, %c0_70] : memref<2x4x16x32xbf16, #tpu.memory_space<vmem>>, vector<1x1x16x32xbf16>
    %149 = vector.shape_cast %148 : vector<1x1x16x32xbf16> to vector<16x32xbf16>
    %150 = arith.truncf %147 : vector<16x16xf32> to vector<16x16xbf16>
    %cst_71 = arith.constant dense<0.000000e+00> : vector<16x32xf32>
    %151 = tpu.matmul %150, %149, %cst_71 {dimension_numbers = #tpu.dot_dimension_numbers<[1], [0], [0], [1], [0, 0, 1, 1], [], []>} : vector<16x16xbf16>, vector<16x32xbf16>, vector<16x32xf32> -> vector<16x32xf32>
    %152 = arith.addf %90, %151 : vector<16x32xf32>
    %c0_72 = arith.constant 0 : index
    %c2 = arith.constant 2 : index
    %c0_73 = arith.constant 0 : index
    %c0_74 = arith.constant 0 : index
    %153 = vector.load %arg4[%c0_72, %c2, %c0_73, %c0_74] : memref<2x4x32x16xbf16, #tpu.memory_space<vmem>>, vector<1x1x32x16xbf16>
    %154 = vector.shape_cast %153 : vector<1x1x32x16xbf16> to vector<32x16xbf16>
    %155 = arith.truncf %27 : vector<16x32xf32> to vector<16x32xbf16>
    %cst_75 = arith.constant dense<0.000000e+00> : vector<16x16xf32>
    %156 = tpu.matmul %155, %154, %cst_75 {dimension_numbers = #tpu.dot_dimension_numbers<[1], [0], [0], [1], [0, 0, 1, 1], [], []>} : vector<16x32xbf16>, vector<32x16xbf16>, vector<16x16xf32> -> vector<16x16xf32>
    %c0_76 = arith.constant 0 : index
    %c2_77 = arith.constant 2 : index
    %c0_78 = arith.constant 0 : index
    %c0_79 = arith.constant 0 : index
    %157 = vector.load %arg5[%c0_76, %c2_77, %c0_78, %c0_79] : memref<2x4x32x16xbf16, #tpu.memory_space<vmem>>, vector<1x1x32x16xbf16>
    %158 = vector.shape_cast %157 : vector<1x1x32x16xbf16> to vector<32x16xbf16>
    %159 = arith.truncf %27 : vector<16x32xf32> to vector<16x32xbf16>
    %cst_80 = arith.constant dense<0.000000e+00> : vector<16x16xf32>
    %160 = tpu.matmul %159, %158, %cst_80 {dimension_numbers = #tpu.dot_dimension_numbers<[1], [0], [0], [1], [0, 0, 1, 1], [], []>} : vector<16x32xbf16>, vector<32x16xbf16>, vector<16x16xf32> -> vector<16x16xf32>
    %c0_81 = arith.constant 0 : index
    %c2_82 = arith.constant 2 : index
    %c0_83 = arith.constant 0 : index
    %c0_84 = arith.constant 0 : index
    %161 = vector.load %arg6[%c0_81, %c2_82, %c0_83, %c0_84] : memref<2x4x32x16xbf16, #tpu.memory_space<vmem>>, vector<1x1x32x16xbf16>
    %162 = vector.shape_cast %161 : vector<1x1x32x16xbf16> to vector<32x16xbf16>
    %163 = arith.truncf %27 : vector<16x32xf32> to vector<16x32xbf16>
    %cst_85 = arith.constant dense<0.000000e+00> : vector<16x16xf32>
    %164 = tpu.matmul %163, %162, %cst_85 {dimension_numbers = #tpu.dot_dimension_numbers<[1], [0], [0], [1], [0, 0, 1, 1], [], []>} : vector<16x32xbf16>, vector<32x16xbf16>, vector<16x16xf32> -> vector<16x16xf32>
    %165 = vector.extract_strided_slice %156 {offsets = [0, 0], sizes = [8, 16], strides = [1, 1]} : vector<16x16xf32> to vector<8x16xf32>
    %166 = vector.extract_strided_slice %160 {offsets = [0, 0], sizes = [8, 16], strides = [1, 1]} : vector<16x16xf32> to vector<8x16xf32>
    %167 = vector.extract_strided_slice %164 {offsets = [0, 0], sizes = [8, 16], strides = [1, 1]} : vector<16x16xf32> to vector<8x16xf32>
    %168 = tpu.transpose %166, [1, 0] : vector<8x16xf32> -> vector<16x8xf32>
    %169 = arith.truncf %165 : vector<8x16xf32> to vector<8x16xbf16>
    %170 = arith.truncf %168 : vector<16x8xf32> to vector<16x8xbf16>
    %cst_86 = arith.constant dense<0.000000e+00> : vector<8x8xf32>
    %171 = tpu.matmul %169, %170, %cst_86 {dimension_numbers = #tpu.dot_dimension_numbers<[1], [0], [0], [1], [0, 0, 1, 1], [], []>} : vector<8x16xbf16>, vector<16x8xbf16>, vector<8x8xf32> -> vector<8x8xf32>
    %cst_87 = arith.constant 2.500000e-01 : f32
    %172 = vector.broadcast %cst_87 : f32 to vector<8x8xf32>
    %173 = arith.mulf %171, %172 : vector<8x8xf32>
    %cst_88 = arith.constant dense<0xFF800000> : vector<8xf32>
    %174 = vector.multi_reduction <maximumf>, %173, %cst_88 [1] : vector<8x8xf32> to vector<8xf32>
    %175 = vector.shape_cast %174 : vector<8xf32> to vector<8x1xf32>
    %176 = vector.broadcast %175 : vector<8x1xf32> to vector<8x8xf32>
    %177 = arith.subf %173, %176 : vector<8x8xf32>
    %178 = math.exp %177 : vector<8x8xf32>
    %cst_89 = arith.constant dense<0.000000e+00> : vector<8xf32>
    %179 = vector.multi_reduction <add>, %178, %cst_89 [1] : vector<8x8xf32> to vector<8xf32>
    %180 = vector.shape_cast %179 : vector<8xf32> to vector<8x1xf32>
    %181 = tpu.reciprocal %180 {approx = true} : vector<8x1xf32> -> vector<8x1xf32>
    %182 = vector.broadcast %181 : vector<8x1xf32> to vector<8x8xf32>
    %183 = arith.mulf %178, %182 : vector<8x8xf32>
    %184 = arith.truncf %183 : vector<8x8xf32> to vector<8x8xbf16>
    %185 = arith.truncf %167 : vector<8x16xf32> to vector<8x16xbf16>
    %cst_90 = arith.constant dense<0.000000e+00> : vector<8x16xf32>
    %186 = tpu.matmul %184, %185, %cst_90 {dimension_numbers = #tpu.dot_dimension_numbers<[1], [0], [0], [1], [0, 0, 1, 1], [], []>} : vector<8x8xbf16>, vector<8x16xbf16>, vector<8x16xf32> -> vector<8x16xf32>
    %187 = vector.extract_strided_slice %156 {offsets = [8, 0], sizes = [8, 16], strides = [1, 1]} : vector<16x16xf32> to vector<8x16xf32>
    %188 = vector.extract_strided_slice %160 {offsets = [8, 0], sizes = [8, 16], strides = [1, 1]} : vector<16x16xf32> to vector<8x16xf32>
    %189 = vector.extract_strided_slice %164 {offsets = [8, 0], sizes = [8, 16], strides = [1, 1]} : vector<16x16xf32> to vector<8x16xf32>
    %190 = tpu.transpose %188, [1, 0] : vector<8x16xf32> -> vector<16x8xf32>
    %191 = arith.truncf %187 : vector<8x16xf32> to vector<8x16xbf16>
    %192 = arith.truncf %190 : vector<16x8xf32> to vector<16x8xbf16>
    %cst_91 = arith.constant dense<0.000000e+00> : vector<8x8xf32>
    %193 = tpu.matmul %191, %192, %cst_91 {dimension_numbers = #tpu.dot_dimension_numbers<[1], [0], [0], [1], [0, 0, 1, 1], [], []>} : vector<8x16xbf16>, vector<16x8xbf16>, vector<8x8xf32> -> vector<8x8xf32>
    %cst_92 = arith.constant 2.500000e-01 : f32
    %194 = vector.broadcast %cst_92 : f32 to vector<8x8xf32>
    %195 = arith.mulf %193, %194 : vector<8x8xf32>
    %cst_93 = arith.constant dense<0xFF800000> : vector<8xf32>
    %196 = vector.multi_reduction <maximumf>, %195, %cst_93 [1] : vector<8x8xf32> to vector<8xf32>
    %197 = vector.shape_cast %196 : vector<8xf32> to vector<8x1xf32>
    %198 = vector.broadcast %197 : vector<8x1xf32> to vector<8x8xf32>
    %199 = arith.subf %195, %198 : vector<8x8xf32>
    %200 = math.exp %199 : vector<8x8xf32>
    %cst_94 = arith.constant dense<0.000000e+00> : vector<8xf32>
    %201 = vector.multi_reduction <add>, %200, %cst_94 [1] : vector<8x8xf32> to vector<8xf32>
    %202 = vector.shape_cast %201 : vector<8xf32> to vector<8x1xf32>
    %203 = tpu.reciprocal %202 {approx = true} : vector<8x1xf32> -> vector<8x1xf32>
    %204 = vector.broadcast %203 : vector<8x1xf32> to vector<8x8xf32>
    %205 = arith.mulf %200, %204 : vector<8x8xf32>
    %206 = arith.truncf %205 : vector<8x8xf32> to vector<8x8xbf16>
    %207 = arith.truncf %189 : vector<8x16xf32> to vector<8x16xbf16>
    %cst_95 = arith.constant dense<0.000000e+00> : vector<8x16xf32>
    %208 = tpu.matmul %206, %207, %cst_95 {dimension_numbers = #tpu.dot_dimension_numbers<[1], [0], [0], [1], [0, 0, 1, 1], [], []>} : vector<8x8xbf16>, vector<8x16xbf16>, vector<8x16xf32> -> vector<8x16xf32>
    %209 = tpu.concatenate %186, %208 in 0 : vector<8x16xf32>, vector<8x16xf32> -> vector<16x16xf32>
    %c0_96 = arith.constant 0 : index
    %c2_97 = arith.constant 2 : index
    %c0_98 = arith.constant 0 : index
    %c0_99 = arith.constant 0 : index
    %210 = vector.load %arg7[%c0_96, %c2_97, %c0_98, %c0_99] : memref<2x4x16x32xbf16, #tpu.memory_space<vmem>>, vector<1x1x16x32xbf16>
    %211 = vector.shape_cast %210 : vector<1x1x16x32xbf16> to vector<16x32xbf16>
    %212 = arith.truncf %209 : vector<16x16xf32> to vector<16x16xbf16>
    %cst_100 = arith.constant dense<0.000000e+00> : vector<16x32xf32>
    %213 = tpu.matmul %212, %211, %cst_100 {dimension_numbers = #tpu.dot_dimension_numbers<[1], [0], [0], [1], [0, 0, 1, 1], [], []>} : vector<16x16xbf16>, vector<16x32xbf16>, vector<16x32xf32> -> vector<16x32xf32>
    %214 = arith.addf %152, %213 : vector<16x32xf32>
    %c0_101 = arith.constant 0 : index
    %c3 = arith.constant 3 : index
    %c0_102 = arith.constant 0 : index
    %c0_103 = arith.constant 0 : index
    %215 = vector.load %arg4[%c0_101, %c3, %c0_102, %c0_103] : memref<2x4x32x16xbf16, #tpu.memory_space<vmem>>, vector<1x1x32x16xbf16>
    %216 = vector.shape_cast %215 : vector<1x1x32x16xbf16> to vector<32x16xbf16>
    %217 = arith.truncf %27 : vector<16x32xf32> to vector<16x32xbf16>
    %cst_104 = arith.constant dense<0.000000e+00> : vector<16x16xf32>
    %218 = tpu.matmul %217, %216, %cst_104 {dimension_numbers = #tpu.dot_dimension_numbers<[1], [0], [0], [1], [0, 0, 1, 1], [], []>} : vector<16x32xbf16>, vector<32x16xbf16>, vector<16x16xf32> -> vector<16x16xf32>
    %c0_105 = arith.constant 0 : index
    %c3_106 = arith.constant 3 : index
    %c0_107 = arith.constant 0 : index
    %c0_108 = arith.constant 0 : index
    %219 = vector.load %arg5[%c0_105, %c3_106, %c0_107, %c0_108] : memref<2x4x32x16xbf16, #tpu.memory_space<vmem>>, vector<1x1x32x16xbf16>
    %220 = vector.shape_cast %219 : vector<1x1x32x16xbf16> to vector<32x16xbf16>
    %221 = arith.truncf %27 : vector<16x32xf32> to vector<16x32xbf16>
    %cst_109 = arith.constant dense<0.000000e+00> : vector<16x16xf32>
    %222 = tpu.matmul %221, %220, %cst_109 {dimension_numbers = #tpu.dot_dimension_numbers<[1], [0], [0], [1], [0, 0, 1, 1], [], []>} : vector<16x32xbf16>, vector<32x16xbf16>, vector<16x16xf32> -> vector<16x16xf32>
    %c0_110 = arith.constant 0 : index
    %c3_111 = arith.constant 3 : index
    %c0_112 = arith.constant 0 : index
    %c0_113 = arith.constant 0 : index
    %223 = vector.load %arg6[%c0_110, %c3_111, %c0_112, %c0_113] : memref<2x4x32x16xbf16, #tpu.memory_space<vmem>>, vector<1x1x32x16xbf16>
    %224 = vector.shape_cast %223 : vector<1x1x32x16xbf16> to vector<32x16xbf16>
    %225 = arith.truncf %27 : vector<16x32xf32> to vector<16x32xbf16>
    %cst_114 = arith.constant dense<0.000000e+00> : vector<16x16xf32>
    %226 = tpu.matmul %225, %224, %cst_114 {dimension_numbers = #tpu.dot_dimension_numbers<[1], [0], [0], [1], [0, 0, 1, 1], [], []>} : vector<16x32xbf16>, vector<32x16xbf16>, vector<16x16xf32> -> vector<16x16xf32>
    %227 = vector.extract_strided_slice %218 {offsets = [0, 0], sizes = [8, 16], strides = [1, 1]} : vector<16x16xf32> to vector<8x16xf32>
    %228 = vector.extract_strided_slice %222 {offsets = [0, 0], sizes = [8, 16], strides = [1, 1]} : vector<16x16xf32> to vector<8x16xf32>
    %229 = vector.extract_strided_slice %226 {offsets = [0, 0], sizes = [8, 16], strides = [1, 1]} : vector<16x16xf32> to vector<8x16xf32>
    %230 = tpu.transpose %228, [1, 0] : vector<8x16xf32> -> vector<16x8xf32>
    %231 = arith.truncf %227 : vector<8x16xf32> to vector<8x16xbf16>
    %232 = arith.truncf %230 : vector<16x8xf32> to vector<16x8xbf16>
    %cst_115 = arith.constant dense<0.000000e+00> : vector<8x8xf32>
    %233 = tpu.matmul %231, %232, %cst_115 {dimension_numbers = #tpu.dot_dimension_numbers<[1], [0], [0], [1], [0, 0, 1, 1], [], []>} : vector<8x16xbf16>, vector<16x8xbf16>, vector<8x8xf32> -> vector<8x8xf32>
    %cst_116 = arith.constant 2.500000e-01 : f32
    %234 = vector.broadcast %cst_116 : f32 to vector<8x8xf32>
    %235 = arith.mulf %233, %234 : vector<8x8xf32>
    %cst_117 = arith.constant dense<0xFF800000> : vector<8xf32>
    %236 = vector.multi_reduction <maximumf>, %235, %cst_117 [1] : vector<8x8xf32> to vector<8xf32>
    %237 = vector.shape_cast %236 : vector<8xf32> to vector<8x1xf32>
    %238 = vector.broadcast %237 : vector<8x1xf32> to vector<8x8xf32>
    %239 = arith.subf %235, %238 : vector<8x8xf32>
    %240 = math.exp %239 : vector<8x8xf32>
    %cst_118 = arith.constant dense<0.000000e+00> : vector<8xf32>
    %241 = vector.multi_reduction <add>, %240, %cst_118 [1] : vector<8x8xf32> to vector<8xf32>
    %242 = vector.shape_cast %241 : vector<8xf32> to vector<8x1xf32>
    %243 = tpu.reciprocal %242 {approx = true} : vector<8x1xf32> -> vector<8x1xf32>
    %244 = vector.broadcast %243 : vector<8x1xf32> to vector<8x8xf32>
    %245 = arith.mulf %240, %244 : vector<8x8xf32>
    %246 = arith.truncf %245 : vector<8x8xf32> to vector<8x8xbf16>
    %247 = arith.truncf %229 : vector<8x16xf32> to vector<8x16xbf16>
    %cst_119 = arith.constant dense<0.000000e+00> : vector<8x16xf32>
    %248 = tpu.matmul %246, %247, %cst_119 {dimension_numbers = #tpu.dot_dimension_numbers<[1], [0], [0], [1], [0, 0, 1, 1], [], []>} : vector<8x8xbf16>, vector<8x16xbf16>, vector<8x16xf32> -> vector<8x16xf32>
    %249 = vector.extract_strided_slice %218 {offsets = [8, 0], sizes = [8, 16], strides = [1, 1]} : vector<16x16xf32> to vector<8x16xf32>
    %250 = vector.extract_strided_slice %222 {offsets = [8, 0], sizes = [8, 16], strides = [1, 1]} : vector<16x16xf32> to vector<8x16xf32>
    %251 = vector.extract_strided_slice %226 {offsets = [8, 0], sizes = [8, 16], strides = [1, 1]} : vector<16x16xf32> to vector<8x16xf32>
    %252 = tpu.transpose %250, [1, 0] : vector<8x16xf32> -> vector<16x8xf32>
    %253 = arith.truncf %249 : vector<8x16xf32> to vector<8x16xbf16>
    %254 = arith.truncf %252 : vector<16x8xf32> to vector<16x8xbf16>
    %cst_120 = arith.constant dense<0.000000e+00> : vector<8x8xf32>
    %255 = tpu.matmul %253, %254, %cst_120 {dimension_numbers = #tpu.dot_dimension_numbers<[1], [0], [0], [1], [0, 0, 1, 1], [], []>} : vector<8x16xbf16>, vector<16x8xbf16>, vector<8x8xf32> -> vector<8x8xf32>
    %cst_121 = arith.constant 2.500000e-01 : f32
    %256 = vector.broadcast %cst_121 : f32 to vector<8x8xf32>
    %257 = arith.mulf %255, %256 : vector<8x8xf32>
    %cst_122 = arith.constant dense<0xFF800000> : vector<8xf32>
    %258 = vector.multi_reduction <maximumf>, %257, %cst_122 [1] : vector<8x8xf32> to vector<8xf32>
    %259 = vector.shape_cast %258 : vector<8xf32> to vector<8x1xf32>
    %260 = vector.broadcast %259 : vector<8x1xf32> to vector<8x8xf32>
    %261 = arith.subf %257, %260 : vector<8x8xf32>
    %262 = math.exp %261 : vector<8x8xf32>
    %cst_123 = arith.constant dense<0.000000e+00> : vector<8xf32>
    %263 = vector.multi_reduction <add>, %262, %cst_123 [1] : vector<8x8xf32> to vector<8xf32>
    %264 = vector.shape_cast %263 : vector<8xf32> to vector<8x1xf32>
    %265 = tpu.reciprocal %264 {approx = true} : vector<8x1xf32> -> vector<8x1xf32>
    %266 = vector.broadcast %265 : vector<8x1xf32> to vector<8x8xf32>
    %267 = arith.mulf %262, %266 : vector<8x8xf32>
    %268 = arith.truncf %267 : vector<8x8xf32> to vector<8x8xbf16>
    %269 = arith.truncf %251 : vector<8x16xf32> to vector<8x16xbf16>
    %cst_124 = arith.constant dense<0.000000e+00> : vector<8x16xf32>
    %270 = tpu.matmul %268, %269, %cst_124 {dimension_numbers = #tpu.dot_dimension_numbers<[1], [0], [0], [1], [0, 0, 1, 1], [], []>} : vector<8x8xbf16>, vector<8x16xbf16>, vector<8x16xf32> -> vector<8x16xf32>
    %271 = tpu.concatenate %248, %270 in 0 : vector<8x16xf32>, vector<8x16xf32> -> vector<16x16xf32>
    %c0_125 = arith.constant 0 : index
    %c3_126 = arith.constant 3 : index
    %c0_127 = arith.constant 0 : index
    %c0_128 = arith.constant 0 : index
    %272 = vector.load %arg7[%c0_125, %c3_126, %c0_127, %c0_128] : memref<2x4x16x32xbf16, #tpu.memory_space<vmem>>, vector<1x1x16x32xbf16>
    %273 = vector.shape_cast %272 : vector<1x1x16x32xbf16> to vector<16x32xbf16>
    %274 = arith.truncf %271 : vector<16x16xf32> to vector<16x16xbf16>
    %cst_129 = arith.constant dense<0.000000e+00> : vector<16x32xf32>
    %275 = tpu.matmul %274, %273, %cst_129 {dimension_numbers = #tpu.dot_dimension_numbers<[1], [0], [0], [1], [0, 0, 1, 1], [], []>} : vector<16x16xbf16>, vector<16x32xbf16>, vector<16x32xf32> -> vector<16x32xf32>
    %276 = arith.addf %214, %275 : vector<16x32xf32>
    %c0_130 = arith.constant 0 : index
    %c0_131 = arith.constant 0 : index
    %c0_132 = arith.constant 0 : index
    %277 = vector.load %arg8[%c0_130, %c0_131, %c0_132] : memref<2x1x32xf32, #tpu.memory_space<vmem>>, vector<1x1x32xf32>
    %278 = vector.shape_cast %277 : vector<1x1x32xf32> to vector<1x32xf32>
    %279 = vector.broadcast %278 : vector<1x32xf32> to vector<16x32xf32>
    %280 = arith.addf %276, %279 : vector<16x32xf32>
    %281 = arith.addf %280, %27 : vector<16x32xf32>
    %c0_133 = arith.constant 0 : index
    %c0_134 = arith.constant 0 : index
    %c0_135 = arith.constant 0 : index
    %282 = vector.load %arg9[%c0_133, %c0_134, %c0_135] : memref<2x1x32xf32, #tpu.memory_space<vmem>>, vector<1x1x32xf32>
    %283 = vector.shape_cast %282 : vector<1x1x32xf32> to vector<1x32xf32>
    %c0_136 = arith.constant 0 : index
    %c0_137 = arith.constant 0 : index
    %c0_138 = arith.constant 0 : index
    %284 = vector.load %arg10[%c0_136, %c0_137, %c0_138] : memref<2x1x32xf32, #tpu.memory_space<vmem>>, vector<1x1x32xf32>
    %285 = vector.shape_cast %284 : vector<1x1x32xf32> to vector<1x32xf32>
    %cst_139 = arith.constant dense<0.000000e+00> : vector<16xf32>
    %286 = vector.multi_reduction <add>, %281, %cst_139 [1] : vector<16x32xf32> to vector<16xf32>
    %287 = vector.shape_cast %286 : vector<16xf32> to vector<16x1xf32>
    %cst_140 = arith.constant 3.200000e+01 : f32
    %288 = vector.broadcast %cst_140 : f32 to vector<16x1xf32>
    %289 = arith.divf %287, %288 : vector<16x1xf32>
    %290 = vector.broadcast %289 : vector<16x1xf32> to vector<16x32xf32>
    %291 = arith.subf %281, %290 : vector<16x32xf32>
    %292 = arith.mulf %291, %291 : vector<16x32xf32>
    %cst_141 = arith.constant dense<0.000000e+00> : vector<16xf32>
    %293 = vector.multi_reduction <add>, %292, %cst_141 [1] : vector<16x32xf32> to vector<16xf32>
    %294 = vector.shape_cast %293 : vector<16xf32> to vector<16x1xf32>
    %cst_142 = arith.constant 3.200000e+01 : f32
    %295 = vector.broadcast %cst_142 : f32 to vector<16x1xf32>
    %296 = arith.divf %294, %295 : vector<16x1xf32>
    %297 = vector.broadcast %289 : vector<16x1xf32> to vector<16x32xf32>
    %298 = arith.subf %281, %297 : vector<16x32xf32>
    %cst_143 = arith.constant 9.99999974E-6 : f32
    %299 = vector.broadcast %cst_143 : f32 to vector<16x1xf32>
    %300 = arith.addf %296, %299 : vector<16x1xf32>
    %301 = math.rsqrt %300 : vector<16x1xf32>
    %302 = vector.broadcast %301 : vector<16x1xf32> to vector<16x32xf32>
    %303 = arith.mulf %298, %302 : vector<16x32xf32>
    %304 = vector.broadcast %283 : vector<1x32xf32> to vector<16x32xf32>
    %305 = arith.mulf %303, %304 : vector<16x32xf32>
    %306 = vector.broadcast %285 : vector<1x32xf32> to vector<16x32xf32>
    %307 = arith.addf %305, %306 : vector<16x32xf32>
    %c0_144 = arith.constant 0 : index
    %c0_145 = arith.constant 0 : index
    %c0_146 = arith.constant 0 : index
    %308 = vector.load %arg11[%c0_144, %c0_145, %c0_146] : memref<2x32x128xbf16, #tpu.memory_space<vmem>>, vector<1x32x128xbf16>
    %309 = vector.shape_cast %308 : vector<1x32x128xbf16> to vector<32x128xbf16>
    %310 = arith.truncf %307 : vector<16x32xf32> to vector<16x32xbf16>
    %cst_147 = arith.constant dense<0.000000e+00> : vector<16x128xf32>
    %311 = tpu.matmul %310, %309, %cst_147 {dimension_numbers = #tpu.dot_dimension_numbers<[1], [0], [0], [1], [0, 0, 1, 1], [], []>} : vector<16x32xbf16>, vector<32x128xbf16>, vector<16x128xf32> -> vector<16x128xf32>
    %c0_148 = arith.constant 0 : index
    %c0_149 = arith.constant 0 : index
    %c0_150 = arith.constant 0 : index
    %312 = vector.load %arg12[%c0_148, %c0_149, %c0_150] : memref<2x1x128xf32, #tpu.memory_space<vmem>>, vector<1x1x128xf32>
    %313 = vector.shape_cast %312 : vector<1x1x128xf32> to vector<1x128xf32>
    %314 = vector.broadcast %313 : vector<1x128xf32> to vector<16x128xf32>
    %315 = arith.addf %311, %314 : vector<16x128xf32>
    %c0_151 = arith.constant 0 : index
    %c0_152 = arith.constant 0 : index
    %c0_153 = arith.constant 0 : index
    %316 = vector.load %arg13[%c0_151, %c0_152, %c0_153] : memref<2x32x128xbf16, #tpu.memory_space<vmem>>, vector<1x32x128xbf16>
    %317 = vector.shape_cast %316 : vector<1x32x128xbf16> to vector<32x128xbf16>
    %318 = arith.truncf %307 : vector<16x32xf32> to vector<16x32xbf16>
    %cst_154 = arith.constant dense<0.000000e+00> : vector<16x128xf32>
    %319 = tpu.matmul %318, %317, %cst_154 {dimension_numbers = #tpu.dot_dimension_numbers<[1], [0], [0], [1], [0, 0, 1, 1], [], []>} : vector<16x32xbf16>, vector<32x128xbf16>, vector<16x128xf32> -> vector<16x128xf32>
    %c0_155 = arith.constant 0 : index
    %c0_156 = arith.constant 0 : index
    %c0_157 = arith.constant 0 : index
    %320 = vector.load %arg14[%c0_155, %c0_156, %c0_157] : memref<2x1x128xf32, #tpu.memory_space<vmem>>, vector<1x1x128xf32>
    %321 = vector.shape_cast %320 : vector<1x1x128xf32> to vector<1x128xf32>
    %322 = vector.broadcast %321 : vector<1x128xf32> to vector<16x128xf32>
    %323 = arith.addf %319, %322 : vector<16x128xf32>
    %cst_158 = arith.constant 5.000000e-01 : f32
    %324 = vector.broadcast %cst_158 : f32 to vector<16x128xf32>
    %325 = arith.mulf %324, %323 : vector<16x128xf32>
    %cst_159 = arith.constant 4.471500e-02 : f32
    %326 = vector.broadcast %cst_159 : f32 to vector<16x128xf32>
    %327 = arith.mulf %326, %323 : vector<16x128xf32>
    %328 = arith.mulf %327, %323 : vector<16x128xf32>
    %329 = arith.mulf %328, %323 : vector<16x128xf32>
    %330 = arith.addf %323, %329 : vector<16x128xf32>
    %cst_160 = arith.constant 0.797884583 : f32
    %331 = vector.broadcast %cst_160 : f32 to vector<16x128xf32>
    %332 = arith.mulf %331, %330 : vector<16x128xf32>
    %333 = math.tanh %332 : vector<16x128xf32>
    %cst_161 = arith.constant 1.000000e+00 : f32
    %334 = vector.broadcast %cst_161 : f32 to vector<16x128xf32>
    %335 = arith.addf %334, %333 : vector<16x128xf32>
    %336 = arith.mulf %325, %335 : vector<16x128xf32>
    %337 = arith.mulf %315, %336 : vector<16x128xf32>
    %c0_162 = arith.constant 0 : index
    %c0_163 = arith.constant 0 : index
    %c0_164 = arith.constant 0 : index
    %338 = vector.load %arg15[%c0_162, %c0_163, %c0_164] : memref<2x128x32xbf16, #tpu.memory_space<vmem>>, vector<1x128x32xbf16>
    %339 = vector.shape_cast %338 : vector<1x128x32xbf16> to vector<128x32xbf16>
    %340 = arith.truncf %337 : vector<16x128xf32> to vector<16x128xbf16>
    %cst_165 = arith.constant dense<0.000000e+00> : vector<16x32xf32>
    %341 = tpu.matmul %340, %339, %cst_165 {dimension_numbers = #tpu.dot_dimension_numbers<[1], [0], [0], [1], [0, 0, 1, 1], [], []>} : vector<16x128xbf16>, vector<128x32xbf16>, vector<16x32xf32> -> vector<16x32xf32>
    %c0_166 = arith.constant 0 : index
    %c0_167 = arith.constant 0 : index
    %c0_168 = arith.constant 0 : index
    %342 = vector.load %arg16[%c0_166, %c0_167, %c0_168] : memref<2x1x32xf32, #tpu.memory_space<vmem>>, vector<1x1x32xf32>
    %343 = vector.shape_cast %342 : vector<1x1x32xf32> to vector<1x32xf32>
    %344 = vector.broadcast %343 : vector<1x32xf32> to vector<16x32xf32>
    %345 = arith.addf %341, %344 : vector<16x32xf32>
    %346 = arith.addf %345, %307 : vector<16x32xf32>
    %c1_169 = arith.constant 1 : index
    %c0_170 = arith.constant 0 : index
    %c0_171 = arith.constant 0 : index
    %347 = vector.load %arg2[%c1_169, %c0_170, %c0_171] : memref<2x1x32xf32, #tpu.memory_space<vmem>>, vector<1x1x32xf32>
    %348 = vector.shape_cast %347 : vector<1x1x32xf32> to vector<1x32xf32>
    %c1_172 = arith.constant 1 : index
    %c0_173 = arith.constant 0 : index
    %c0_174 = arith.constant 0 : index
    %349 = vector.load %arg3[%c1_172, %c0_173, %c0_174] : memref<2x1x32xf32, #tpu.memory_space<vmem>>, vector<1x1x32xf32>
    %350 = vector.shape_cast %349 : vector<1x1x32xf32> to vector<1x32xf32>
    %cst_175 = arith.constant dense<0.000000e+00> : vector<16xf32>
    %351 = vector.multi_reduction <add>, %346, %cst_175 [1] : vector<16x32xf32> to vector<16xf32>
    %352 = vector.shape_cast %351 : vector<16xf32> to vector<16x1xf32>
    %cst_176 = arith.constant 3.200000e+01 : f32
    %353 = vector.broadcast %cst_176 : f32 to vector<16x1xf32>
    %354 = arith.divf %352, %353 : vector<16x1xf32>
    %355 = vector.broadcast %354 : vector<16x1xf32> to vector<16x32xf32>
    %356 = arith.subf %346, %355 : vector<16x32xf32>
    %357 = arith.mulf %356, %356 : vector<16x32xf32>
    %cst_177 = arith.constant dense<0.000000e+00> : vector<16xf32>
    %358 = vector.multi_reduction <add>, %357, %cst_177 [1] : vector<16x32xf32> to vector<16xf32>
    %359 = vector.shape_cast %358 : vector<16xf32> to vector<16x1xf32>
    %cst_178 = arith.constant 3.200000e+01 : f32
    %360 = vector.broadcast %cst_178 : f32 to vector<16x1xf32>
    %361 = arith.divf %359, %360 : vector<16x1xf32>
    %362 = vector.broadcast %354 : vector<16x1xf32> to vector<16x32xf32>
    %363 = arith.subf %346, %362 : vector<16x32xf32>
    %cst_179 = arith.constant 9.99999974E-6 : f32
    %364 = vector.broadcast %cst_179 : f32 to vector<16x1xf32>
    %365 = arith.addf %361, %364 : vector<16x1xf32>
    %366 = math.rsqrt %365 : vector<16x1xf32>
    %367 = vector.broadcast %366 : vector<16x1xf32> to vector<16x32xf32>
    %368 = arith.mulf %363, %367 : vector<16x32xf32>
    %369 = vector.broadcast %348 : vector<1x32xf32> to vector<16x32xf32>
    %370 = arith.mulf %368, %369 : vector<16x32xf32>
    %371 = vector.broadcast %350 : vector<1x32xf32> to vector<16x32xf32>
    %372 = arith.addf %370, %371 : vector<16x32xf32>
    %cst_180 = arith.constant 0.000000e+00 : f32
    %373 = vector.broadcast %cst_180 : f32 to vector<16x32xf32>
    %c1_181 = arith.constant 1 : index
    %c0_182 = arith.constant 0 : index
    %c0_183 = arith.constant 0 : index
    %c0_184 = arith.constant 0 : index
    %374 = vector.load %arg4[%c1_181, %c0_182, %c0_183, %c0_184] : memref<2x4x32x16xbf16, #tpu.memory_space<vmem>>, vector<1x1x32x16xbf16>
    %375 = vector.shape_cast %374 : vector<1x1x32x16xbf16> to vector<32x16xbf16>
    %376 = arith.truncf %372 : vector<16x32xf32> to vector<16x32xbf16>
    %cst_185 = arith.constant dense<0.000000e+00> : vector<16x16xf32>
    %377 = tpu.matmul %376, %375, %cst_185 {dimension_numbers = #tpu.dot_dimension_numbers<[1], [0], [0], [1], [0, 0, 1, 1], [], []>} : vector<16x32xbf16>, vector<32x16xbf16>, vector<16x16xf32> -> vector<16x16xf32>
    %c1_186 = arith.constant 1 : index
    %c0_187 = arith.constant 0 : index
    %c0_188 = arith.constant 0 : index
    %c0_189 = arith.constant 0 : index
    %378 = vector.load %arg5[%c1_186, %c0_187, %c0_188, %c0_189] : memref<2x4x32x16xbf16, #tpu.memory_space<vmem>>, vector<1x1x32x16xbf16>
    %379 = vector.shape_cast %378 : vector<1x1x32x16xbf16> to vector<32x16xbf16>
    %380 = arith.truncf %372 : vector<16x32xf32> to vector<16x32xbf16>
    %cst_190 = arith.constant dense<0.000000e+00> : vector<16x16xf32>
    %381 = tpu.matmul %380, %379, %cst_190 {dimension_numbers = #tpu.dot_dimension_numbers<[1], [0], [0], [1], [0, 0, 1, 1], [], []>} : vector<16x32xbf16>, vector<32x16xbf16>, vector<16x16xf32> -> vector<16x16xf32>
    %c1_191 = arith.constant 1 : index
    %c0_192 = arith.constant 0 : index
    %c0_193 = arith.constant 0 : index
    %c0_194 = arith.constant 0 : index
    %382 = vector.load %arg6[%c1_191, %c0_192, %c0_193, %c0_194] : memref<2x4x32x16xbf16, #tpu.memory_space<vmem>>, vector<1x1x32x16xbf16>
    %383 = vector.shape_cast %382 : vector<1x1x32x16xbf16> to vector<32x16xbf16>
    %384 = arith.truncf %372 : vector<16x32xf32> to vector<16x32xbf16>
    %cst_195 = arith.constant dense<0.000000e+00> : vector<16x16xf32>
    %385 = tpu.matmul %384, %383, %cst_195 {dimension_numbers = #tpu.dot_dimension_numbers<[1], [0], [0], [1], [0, 0, 1, 1], [], []>} : vector<16x32xbf16>, vector<32x16xbf16>, vector<16x16xf32> -> vector<16x16xf32>
    %386 = vector.extract_strided_slice %377 {offsets = [0, 0], sizes = [8, 16], strides = [1, 1]} : vector<16x16xf32> to vector<8x16xf32>
    %387 = vector.extract_strided_slice %381 {offsets = [0, 0], sizes = [8, 16], strides = [1, 1]} : vector<16x16xf32> to vector<8x16xf32>
    %388 = vector.extract_strided_slice %385 {offsets = [0, 0], sizes = [8, 16], strides = [1, 1]} : vector<16x16xf32> to vector<8x16xf32>
    %389 = tpu.transpose %387, [1, 0] : vector<8x16xf32> -> vector<16x8xf32>
    %390 = arith.truncf %386 : vector<8x16xf32> to vector<8x16xbf16>
    %391 = arith.truncf %389 : vector<16x8xf32> to vector<16x8xbf16>
    %cst_196 = arith.constant dense<0.000000e+00> : vector<8x8xf32>
    %392 = tpu.matmul %390, %391, %cst_196 {dimension_numbers = #tpu.dot_dimension_numbers<[1], [0], [0], [1], [0, 0, 1, 1], [], []>} : vector<8x16xbf16>, vector<16x8xbf16>, vector<8x8xf32> -> vector<8x8xf32>
    %cst_197 = arith.constant 2.500000e-01 : f32
    %393 = vector.broadcast %cst_197 : f32 to vector<8x8xf32>
    %394 = arith.mulf %392, %393 : vector<8x8xf32>
    %cst_198 = arith.constant dense<0xFF800000> : vector<8xf32>
    %395 = vector.multi_reduction <maximumf>, %394, %cst_198 [1] : vector<8x8xf32> to vector<8xf32>
    %396 = vector.shape_cast %395 : vector<8xf32> to vector<8x1xf32>
    %397 = vector.broadcast %396 : vector<8x1xf32> to vector<8x8xf32>
    %398 = arith.subf %394, %397 : vector<8x8xf32>
    %399 = math.exp %398 : vector<8x8xf32>
    %cst_199 = arith.constant dense<0.000000e+00> : vector<8xf32>
    %400 = vector.multi_reduction <add>, %399, %cst_199 [1] : vector<8x8xf32> to vector<8xf32>
    %401 = vector.shape_cast %400 : vector<8xf32> to vector<8x1xf32>
    %402 = tpu.reciprocal %401 {approx = true} : vector<8x1xf32> -> vector<8x1xf32>
    %403 = vector.broadcast %402 : vector<8x1xf32> to vector<8x8xf32>
    %404 = arith.mulf %399, %403 : vector<8x8xf32>
    %405 = arith.truncf %404 : vector<8x8xf32> to vector<8x8xbf16>
    %406 = arith.truncf %388 : vector<8x16xf32> to vector<8x16xbf16>
    %cst_200 = arith.constant dense<0.000000e+00> : vector<8x16xf32>
    %407 = tpu.matmul %405, %406, %cst_200 {dimension_numbers = #tpu.dot_dimension_numbers<[1], [0], [0], [1], [0, 0, 1, 1], [], []>} : vector<8x8xbf16>, vector<8x16xbf16>, vector<8x16xf32> -> vector<8x16xf32>
    %408 = vector.extract_strided_slice %377 {offsets = [8, 0], sizes = [8, 16], strides = [1, 1]} : vector<16x16xf32> to vector<8x16xf32>
    %409 = vector.extract_strided_slice %381 {offsets = [8, 0], sizes = [8, 16], strides = [1, 1]} : vector<16x16xf32> to vector<8x16xf32>
    %410 = vector.extract_strided_slice %385 {offsets = [8, 0], sizes = [8, 16], strides = [1, 1]} : vector<16x16xf32> to vector<8x16xf32>
    %411 = tpu.transpose %409, [1, 0] : vector<8x16xf32> -> vector<16x8xf32>
    %412 = arith.truncf %408 : vector<8x16xf32> to vector<8x16xbf16>
    %413 = arith.truncf %411 : vector<16x8xf32> to vector<16x8xbf16>
    %cst_201 = arith.constant dense<0.000000e+00> : vector<8x8xf32>
    %414 = tpu.matmul %412, %413, %cst_201 {dimension_numbers = #tpu.dot_dimension_numbers<[1], [0], [0], [1], [0, 0, 1, 1], [], []>} : vector<8x16xbf16>, vector<16x8xbf16>, vector<8x8xf32> -> vector<8x8xf32>
    %cst_202 = arith.constant 2.500000e-01 : f32
    %415 = vector.broadcast %cst_202 : f32 to vector<8x8xf32>
    %416 = arith.mulf %414, %415 : vector<8x8xf32>
    %cst_203 = arith.constant dense<0xFF800000> : vector<8xf32>
    %417 = vector.multi_reduction <maximumf>, %416, %cst_203 [1] : vector<8x8xf32> to vector<8xf32>
    %418 = vector.shape_cast %417 : vector<8xf32> to vector<8x1xf32>
    %419 = vector.broadcast %418 : vector<8x1xf32> to vector<8x8xf32>
    %420 = arith.subf %416, %419 : vector<8x8xf32>
    %421 = math.exp %420 : vector<8x8xf32>
    %cst_204 = arith.constant dense<0.000000e+00> : vector<8xf32>
    %422 = vector.multi_reduction <add>, %421, %cst_204 [1] : vector<8x8xf32> to vector<8xf32>
    %423 = vector.shape_cast %422 : vector<8xf32> to vector<8x1xf32>
    %424 = tpu.reciprocal %423 {approx = true} : vector<8x1xf32> -> vector<8x1xf32>
    %425 = vector.broadcast %424 : vector<8x1xf32> to vector<8x8xf32>
    %426 = arith.mulf %421, %425 : vector<8x8xf32>
    %427 = arith.truncf %426 : vector<8x8xf32> to vector<8x8xbf16>
    %428 = arith.truncf %410 : vector<8x16xf32> to vector<8x16xbf16>
    %cst_205 = arith.constant dense<0.000000e+00> : vector<8x16xf32>
    %429 = tpu.matmul %427, %428, %cst_205 {dimension_numbers = #tpu.dot_dimension_numbers<[1], [0], [0], [1], [0, 0, 1, 1], [], []>} : vector<8x8xbf16>, vector<8x16xbf16>, vector<8x16xf32> -> vector<8x16xf32>
    %430 = tpu.concatenate %407, %429 in 0 : vector<8x16xf32>, vector<8x16xf32> -> vector<16x16xf32>
    %c1_206 = arith.constant 1 : index
    %c0_207 = arith.constant 0 : index
    %c0_208 = arith.constant 0 : index
    %c0_209 = arith.constant 0 : index
    %431 = vector.load %arg7[%c1_206, %c0_207, %c0_208, %c0_209] : memref<2x4x16x32xbf16, #tpu.memory_space<vmem>>, vector<1x1x16x32xbf16>
    %432 = vector.shape_cast %431 : vector<1x1x16x32xbf16> to vector<16x32xbf16>
    %433 = arith.truncf %430 : vector<16x16xf32> to vector<16x16xbf16>
    %cst_210 = arith.constant dense<0.000000e+00> : vector<16x32xf32>
    %434 = tpu.matmul %433, %432, %cst_210 {dimension_numbers = #tpu.dot_dimension_numbers<[1], [0], [0], [1], [0, 0, 1, 1], [], []>} : vector<16x16xbf16>, vector<16x32xbf16>, vector<16x32xf32> -> vector<16x32xf32>
    %435 = arith.addf %373, %434 : vector<16x32xf32>
    %c1_211 = arith.constant 1 : index
    %c1_212 = arith.constant 1 : index
    %c0_213 = arith.constant 0 : index
    %c0_214 = arith.constant 0 : index
    %436 = vector.load %arg4[%c1_211, %c1_212, %c0_213, %c0_214] : memref<2x4x32x16xbf16, #tpu.memory_space<vmem>>, vector<1x1x32x16xbf16>
    %437 = vector.shape_cast %436 : vector<1x1x32x16xbf16> to vector<32x16xbf16>
    %438 = arith.truncf %372 : vector<16x32xf32> to vector<16x32xbf16>
    %cst_215 = arith.constant dense<0.000000e+00> : vector<16x16xf32>
    %439 = tpu.matmul %438, %437, %cst_215 {dimension_numbers = #tpu.dot_dimension_numbers<[1], [0], [0], [1], [0, 0, 1, 1], [], []>} : vector<16x32xbf16>, vector<32x16xbf16>, vector<16x16xf32> -> vector<16x16xf32>
    %c1_216 = arith.constant 1 : index
    %c1_217 = arith.constant 1 : index
    %c0_218 = arith.constant 0 : index
    %c0_219 = arith.constant 0 : index
    %440 = vector.load %arg5[%c1_216, %c1_217, %c0_218, %c0_219] : memref<2x4x32x16xbf16, #tpu.memory_space<vmem>>, vector<1x1x32x16xbf16>
    %441 = vector.shape_cast %440 : vector<1x1x32x16xbf16> to vector<32x16xbf16>
    %442 = arith.truncf %372 : vector<16x32xf32> to vector<16x32xbf16>
    %cst_220 = arith.constant dense<0.000000e+00> : vector<16x16xf32>
    %443 = tpu.matmul %442, %441, %cst_220 {dimension_numbers = #tpu.dot_dimension_numbers<[1], [0], [0], [1], [0, 0, 1, 1], [], []>} : vector<16x32xbf16>, vector<32x16xbf16>, vector<16x16xf32> -> vector<16x16xf32>
    %c1_221 = arith.constant 1 : index
    %c1_222 = arith.constant 1 : index
    %c0_223 = arith.constant 0 : index
    %c0_224 = arith.constant 0 : index
    %444 = vector.load %arg6[%c1_221, %c1_222, %c0_223, %c0_224] : memref<2x4x32x16xbf16, #tpu.memory_space<vmem>>, vector<1x1x32x16xbf16>
    %445 = vector.shape_cast %444 : vector<1x1x32x16xbf16> to vector<32x16xbf16>
    %446 = arith.truncf %372 : vector<16x32xf32> to vector<16x32xbf16>
    %cst_225 = arith.constant dense<0.000000e+00> : vector<16x16xf32>
    %447 = tpu.matmul %446, %445, %cst_225 {dimension_numbers = #tpu.dot_dimension_numbers<[1], [0], [0], [1], [0, 0, 1, 1], [], []>} : vector<16x32xbf16>, vector<32x16xbf16>, vector<16x16xf32> -> vector<16x16xf32>
    %448 = vector.extract_strided_slice %439 {offsets = [0, 0], sizes = [8, 16], strides = [1, 1]} : vector<16x16xf32> to vector<8x16xf32>
    %449 = vector.extract_strided_slice %443 {offsets = [0, 0], sizes = [8, 16], strides = [1, 1]} : vector<16x16xf32> to vector<8x16xf32>
    %450 = vector.extract_strided_slice %447 {offsets = [0, 0], sizes = [8, 16], strides = [1, 1]} : vector<16x16xf32> to vector<8x16xf32>
    %451 = tpu.transpose %449, [1, 0] : vector<8x16xf32> -> vector<16x8xf32>
    %452 = arith.truncf %448 : vector<8x16xf32> to vector<8x16xbf16>
    %453 = arith.truncf %451 : vector<16x8xf32> to vector<16x8xbf16>
    %cst_226 = arith.constant dense<0.000000e+00> : vector<8x8xf32>
    %454 = tpu.matmul %452, %453, %cst_226 {dimension_numbers = #tpu.dot_dimension_numbers<[1], [0], [0], [1], [0, 0, 1, 1], [], []>} : vector<8x16xbf16>, vector<16x8xbf16>, vector<8x8xf32> -> vector<8x8xf32>
    %cst_227 = arith.constant 2.500000e-01 : f32
    %455 = vector.broadcast %cst_227 : f32 to vector<8x8xf32>
    %456 = arith.mulf %454, %455 : vector<8x8xf32>
    %cst_228 = arith.constant dense<0xFF800000> : vector<8xf32>
    %457 = vector.multi_reduction <maximumf>, %456, %cst_228 [1] : vector<8x8xf32> to vector<8xf32>
    %458 = vector.shape_cast %457 : vector<8xf32> to vector<8x1xf32>
    %459 = vector.broadcast %458 : vector<8x1xf32> to vector<8x8xf32>
    %460 = arith.subf %456, %459 : vector<8x8xf32>
    %461 = math.exp %460 : vector<8x8xf32>
    %cst_229 = arith.constant dense<0.000000e+00> : vector<8xf32>
    %462 = vector.multi_reduction <add>, %461, %cst_229 [1] : vector<8x8xf32> to vector<8xf32>
    %463 = vector.shape_cast %462 : vector<8xf32> to vector<8x1xf32>
    %464 = tpu.reciprocal %463 {approx = true} : vector<8x1xf32> -> vector<8x1xf32>
    %465 = vector.broadcast %464 : vector<8x1xf32> to vector<8x8xf32>
    %466 = arith.mulf %461, %465 : vector<8x8xf32>
    %467 = arith.truncf %466 : vector<8x8xf32> to vector<8x8xbf16>
    %468 = arith.truncf %450 : vector<8x16xf32> to vector<8x16xbf16>
    %cst_230 = arith.constant dense<0.000000e+00> : vector<8x16xf32>
    %469 = tpu.matmul %467, %468, %cst_230 {dimension_numbers = #tpu.dot_dimension_numbers<[1], [0], [0], [1], [0, 0, 1, 1], [], []>} : vector<8x8xbf16>, vector<8x16xbf16>, vector<8x16xf32> -> vector<8x16xf32>
    %470 = vector.extract_strided_slice %439 {offsets = [8, 0], sizes = [8, 16], strides = [1, 1]} : vector<16x16xf32> to vector<8x16xf32>
    %471 = vector.extract_strided_slice %443 {offsets = [8, 0], sizes = [8, 16], strides = [1, 1]} : vector<16x16xf32> to vector<8x16xf32>
    %472 = vector.extract_strided_slice %447 {offsets = [8, 0], sizes = [8, 16], strides = [1, 1]} : vector<16x16xf32> to vector<8x16xf32>
    %473 = tpu.transpose %471, [1, 0] : vector<8x16xf32> -> vector<16x8xf32>
    %474 = arith.truncf %470 : vector<8x16xf32> to vector<8x16xbf16>
    %475 = arith.truncf %473 : vector<16x8xf32> to vector<16x8xbf16>
    %cst_231 = arith.constant dense<0.000000e+00> : vector<8x8xf32>
    %476 = tpu.matmul %474, %475, %cst_231 {dimension_numbers = #tpu.dot_dimension_numbers<[1], [0], [0], [1], [0, 0, 1, 1], [], []>} : vector<8x16xbf16>, vector<16x8xbf16>, vector<8x8xf32> -> vector<8x8xf32>
    %cst_232 = arith.constant 2.500000e-01 : f32
    %477 = vector.broadcast %cst_232 : f32 to vector<8x8xf32>
    %478 = arith.mulf %476, %477 : vector<8x8xf32>
    %cst_233 = arith.constant dense<0xFF800000> : vector<8xf32>
    %479 = vector.multi_reduction <maximumf>, %478, %cst_233 [1] : vector<8x8xf32> to vector<8xf32>
    %480 = vector.shape_cast %479 : vector<8xf32> to vector<8x1xf32>
    %481 = vector.broadcast %480 : vector<8x1xf32> to vector<8x8xf32>
    %482 = arith.subf %478, %481 : vector<8x8xf32>
    %483 = math.exp %482 : vector<8x8xf32>
    %cst_234 = arith.constant dense<0.000000e+00> : vector<8xf32>
    %484 = vector.multi_reduction <add>, %483, %cst_234 [1] : vector<8x8xf32> to vector<8xf32>
    %485 = vector.shape_cast %484 : vector<8xf32> to vector<8x1xf32>
    %486 = tpu.reciprocal %485 {approx = true} : vector<8x1xf32> -> vector<8x1xf32>
    %487 = vector.broadcast %486 : vector<8x1xf32> to vector<8x8xf32>
    %488 = arith.mulf %483, %487 : vector<8x8xf32>
    %489 = arith.truncf %488 : vector<8x8xf32> to vector<8x8xbf16>
    %490 = arith.truncf %472 : vector<8x16xf32> to vector<8x16xbf16>
    %cst_235 = arith.constant dense<0.000000e+00> : vector<8x16xf32>
    %491 = tpu.matmul %489, %490, %cst_235 {dimension_numbers = #tpu.dot_dimension_numbers<[1], [0], [0], [1], [0, 0, 1, 1], [], []>} : vector<8x8xbf16>, vector<8x16xbf16>, vector<8x16xf32> -> vector<8x16xf32>
    %492 = tpu.concatenate %469, %491 in 0 : vector<8x16xf32>, vector<8x16xf32> -> vector<16x16xf32>
    %c1_236 = arith.constant 1 : index
    %c1_237 = arith.constant 1 : index
    %c0_238 = arith.constant 0 : index
    %c0_239 = arith.constant 0 : index
    %493 = vector.load %arg7[%c1_236, %c1_237, %c0_238, %c0_239] : memref<2x4x16x32xbf16, #tpu.memory_space<vmem>>, vector<1x1x16x32xbf16>
    %494 = vector.shape_cast %493 : vector<1x1x16x32xbf16> to vector<16x32xbf16>
    %495 = arith.truncf %492 : vector<16x16xf32> to vector<16x16xbf16>
    %cst_240 = arith.constant dense<0.000000e+00> : vector<16x32xf32>
    %496 = tpu.matmul %495, %494, %cst_240 {dimension_numbers = #tpu.dot_dimension_numbers<[1], [0], [0], [1], [0, 0, 1, 1], [], []>} : vector<16x16xbf16>, vector<16x32xbf16>, vector<16x32xf32> -> vector<16x32xf32>
    %497 = arith.addf %435, %496 : vector<16x32xf32>
    %c1_241 = arith.constant 1 : index
    %c2_242 = arith.constant 2 : index
    %c0_243 = arith.constant 0 : index
    %c0_244 = arith.constant 0 : index
    %498 = vector.load %arg4[%c1_241, %c2_242, %c0_243, %c0_244] : memref<2x4x32x16xbf16, #tpu.memory_space<vmem>>, vector<1x1x32x16xbf16>
    %499 = vector.shape_cast %498 : vector<1x1x32x16xbf16> to vector<32x16xbf16>
    %500 = arith.truncf %372 : vector<16x32xf32> to vector<16x32xbf16>
    %cst_245 = arith.constant dense<0.000000e+00> : vector<16x16xf32>
    %501 = tpu.matmul %500, %499, %cst_245 {dimension_numbers = #tpu.dot_dimension_numbers<[1], [0], [0], [1], [0, 0, 1, 1], [], []>} : vector<16x32xbf16>, vector<32x16xbf16>, vector<16x16xf32> -> vector<16x16xf32>
    %c1_246 = arith.constant 1 : index
    %c2_247 = arith.constant 2 : index
    %c0_248 = arith.constant 0 : index
    %c0_249 = arith.constant 0 : index
    %502 = vector.load %arg5[%c1_246, %c2_247, %c0_248, %c0_249] : memref<2x4x32x16xbf16, #tpu.memory_space<vmem>>, vector<1x1x32x16xbf16>
    %503 = vector.shape_cast %502 : vector<1x1x32x16xbf16> to vector<32x16xbf16>
    %504 = arith.truncf %372 : vector<16x32xf32> to vector<16x32xbf16>
    %cst_250 = arith.constant dense<0.000000e+00> : vector<16x16xf32>
    %505 = tpu.matmul %504, %503, %cst_250 {dimension_numbers = #tpu.dot_dimension_numbers<[1], [0], [0], [1], [0, 0, 1, 1], [], []>} : vector<16x32xbf16>, vector<32x16xbf16>, vector<16x16xf32> -> vector<16x16xf32>
    %c1_251 = arith.constant 1 : index
    %c2_252 = arith.constant 2 : index
    %c0_253 = arith.constant 0 : index
    %c0_254 = arith.constant 0 : index
    %506 = vector.load %arg6[%c1_251, %c2_252, %c0_253, %c0_254] : memref<2x4x32x16xbf16, #tpu.memory_space<vmem>>, vector<1x1x32x16xbf16>
    %507 = vector.shape_cast %506 : vector<1x1x32x16xbf16> to vector<32x16xbf16>
    %508 = arith.truncf %372 : vector<16x32xf32> to vector<16x32xbf16>
    %cst_255 = arith.constant dense<0.000000e+00> : vector<16x16xf32>
    %509 = tpu.matmul %508, %507, %cst_255 {dimension_numbers = #tpu.dot_dimension_numbers<[1], [0], [0], [1], [0, 0, 1, 1], [], []>} : vector<16x32xbf16>, vector<32x16xbf16>, vector<16x16xf32> -> vector<16x16xf32>
    %510 = vector.extract_strided_slice %501 {offsets = [0, 0], sizes = [8, 16], strides = [1, 1]} : vector<16x16xf32> to vector<8x16xf32>
    %511 = vector.extract_strided_slice %505 {offsets = [0, 0], sizes = [8, 16], strides = [1, 1]} : vector<16x16xf32> to vector<8x16xf32>
    %512 = vector.extract_strided_slice %509 {offsets = [0, 0], sizes = [8, 16], strides = [1, 1]} : vector<16x16xf32> to vector<8x16xf32>
    %513 = tpu.transpose %511, [1, 0] : vector<8x16xf32> -> vector<16x8xf32>
    %514 = arith.truncf %510 : vector<8x16xf32> to vector<8x16xbf16>
    %515 = arith.truncf %513 : vector<16x8xf32> to vector<16x8xbf16>
    %cst_256 = arith.constant dense<0.000000e+00> : vector<8x8xf32>
    %516 = tpu.matmul %514, %515, %cst_256 {dimension_numbers = #tpu.dot_dimension_numbers<[1], [0], [0], [1], [0, 0, 1, 1], [], []>} : vector<8x16xbf16>, vector<16x8xbf16>, vector<8x8xf32> -> vector<8x8xf32>
    %cst_257 = arith.constant 2.500000e-01 : f32
    %517 = vector.broadcast %cst_257 : f32 to vector<8x8xf32>
    %518 = arith.mulf %516, %517 : vector<8x8xf32>
    %cst_258 = arith.constant dense<0xFF800000> : vector<8xf32>
    %519 = vector.multi_reduction <maximumf>, %518, %cst_258 [1] : vector<8x8xf32> to vector<8xf32>
    %520 = vector.shape_cast %519 : vector<8xf32> to vector<8x1xf32>
    %521 = vector.broadcast %520 : vector<8x1xf32> to vector<8x8xf32>
    %522 = arith.subf %518, %521 : vector<8x8xf32>
    %523 = math.exp %522 : vector<8x8xf32>
    %cst_259 = arith.constant dense<0.000000e+00> : vector<8xf32>
    %524 = vector.multi_reduction <add>, %523, %cst_259 [1] : vector<8x8xf32> to vector<8xf32>
    %525 = vector.shape_cast %524 : vector<8xf32> to vector<8x1xf32>
    %526 = tpu.reciprocal %525 {approx = true} : vector<8x1xf32> -> vector<8x1xf32>
    %527 = vector.broadcast %526 : vector<8x1xf32> to vector<8x8xf32>
    %528 = arith.mulf %523, %527 : vector<8x8xf32>
    %529 = arith.truncf %528 : vector<8x8xf32> to vector<8x8xbf16>
    %530 = arith.truncf %512 : vector<8x16xf32> to vector<8x16xbf16>
    %cst_260 = arith.constant dense<0.000000e+00> : vector<8x16xf32>
    %531 = tpu.matmul %529, %530, %cst_260 {dimension_numbers = #tpu.dot_dimension_numbers<[1], [0], [0], [1], [0, 0, 1, 1], [], []>} : vector<8x8xbf16>, vector<8x16xbf16>, vector<8x16xf32> -> vector<8x16xf32>
    %532 = vector.extract_strided_slice %501 {offsets = [8, 0], sizes = [8, 16], strides = [1, 1]} : vector<16x16xf32> to vector<8x16xf32>
    %533 = vector.extract_strided_slice %505 {offsets = [8, 0], sizes = [8, 16], strides = [1, 1]} : vector<16x16xf32> to vector<8x16xf32>
    %534 = vector.extract_strided_slice %509 {offsets = [8, 0], sizes = [8, 16], strides = [1, 1]} : vector<16x16xf32> to vector<8x16xf32>
    %535 = tpu.transpose %533, [1, 0] : vector<8x16xf32> -> vector<16x8xf32>
    %536 = arith.truncf %532 : vector<8x16xf32> to vector<8x16xbf16>
    %537 = arith.truncf %535 : vector<16x8xf32> to vector<16x8xbf16>
    %cst_261 = arith.constant dense<0.000000e+00> : vector<8x8xf32>
    %538 = tpu.matmul %536, %537, %cst_261 {dimension_numbers = #tpu.dot_dimension_numbers<[1], [0], [0], [1], [0, 0, 1, 1], [], []>} : vector<8x16xbf16>, vector<16x8xbf16>, vector<8x8xf32> -> vector<8x8xf32>
    %cst_262 = arith.constant 2.500000e-01 : f32
    %539 = vector.broadcast %cst_262 : f32 to vector<8x8xf32>
    %540 = arith.mulf %538, %539 : vector<8x8xf32>
    %cst_263 = arith.constant dense<0xFF800000> : vector<8xf32>
    %541 = vector.multi_reduction <maximumf>, %540, %cst_263 [1] : vector<8x8xf32> to vector<8xf32>
    %542 = vector.shape_cast %541 : vector<8xf32> to vector<8x1xf32>
    %543 = vector.broadcast %542 : vector<8x1xf32> to vector<8x8xf32>
    %544 = arith.subf %540, %543 : vector<8x8xf32>
    %545 = math.exp %544 : vector<8x8xf32>
    %cst_264 = arith.constant dense<0.000000e+00> : vector<8xf32>
    %546 = vector.multi_reduction <add>, %545, %cst_264 [1] : vector<8x8xf32> to vector<8xf32>
    %547 = vector.shape_cast %546 : vector<8xf32> to vector<8x1xf32>
    %548 = tpu.reciprocal %547 {approx = true} : vector<8x1xf32> -> vector<8x1xf32>
    %549 = vector.broadcast %548 : vector<8x1xf32> to vector<8x8xf32>
    %550 = arith.mulf %545, %549 : vector<8x8xf32>
    %551 = arith.truncf %550 : vector<8x8xf32> to vector<8x8xbf16>
    %552 = arith.truncf %534 : vector<8x16xf32> to vector<8x16xbf16>
    %cst_265 = arith.constant dense<0.000000e+00> : vector<8x16xf32>
    %553 = tpu.matmul %551, %552, %cst_265 {dimension_numbers = #tpu.dot_dimension_numbers<[1], [0], [0], [1], [0, 0, 1, 1], [], []>} : vector<8x8xbf16>, vector<8x16xbf16>, vector<8x16xf32> -> vector<8x16xf32>
    %554 = tpu.concatenate %531, %553 in 0 : vector<8x16xf32>, vector<8x16xf32> -> vector<16x16xf32>
    %c1_266 = arith.constant 1 : index
    %c2_267 = arith.constant 2 : index
    %c0_268 = arith.constant 0 : index
    %c0_269 = arith.constant 0 : index
    %555 = vector.load %arg7[%c1_266, %c2_267, %c0_268, %c0_269] : memref<2x4x16x32xbf16, #tpu.memory_space<vmem>>, vector<1x1x16x32xbf16>
    %556 = vector.shape_cast %555 : vector<1x1x16x32xbf16> to vector<16x32xbf16>
    %557 = arith.truncf %554 : vector<16x16xf32> to vector<16x16xbf16>
    %cst_270 = arith.constant dense<0.000000e+00> : vector<16x32xf32>
    %558 = tpu.matmul %557, %556, %cst_270 {dimension_numbers = #tpu.dot_dimension_numbers<[1], [0], [0], [1], [0, 0, 1, 1], [], []>} : vector<16x16xbf16>, vector<16x32xbf16>, vector<16x32xf32> -> vector<16x32xf32>
    %559 = arith.addf %497, %558 : vector<16x32xf32>
    %c1_271 = arith.constant 1 : index
    %c3_272 = arith.constant 3 : index
    %c0_273 = arith.constant 0 : index
    %c0_274 = arith.constant 0 : index
    %560 = vector.load %arg4[%c1_271, %c3_272, %c0_273, %c0_274] : memref<2x4x32x16xbf16, #tpu.memory_space<vmem>>, vector<1x1x32x16xbf16>
    %561 = vector.shape_cast %560 : vector<1x1x32x16xbf16> to vector<32x16xbf16>
    %562 = arith.truncf %372 : vector<16x32xf32> to vector<16x32xbf16>
    %cst_275 = arith.constant dense<0.000000e+00> : vector<16x16xf32>
    %563 = tpu.matmul %562, %561, %cst_275 {dimension_numbers = #tpu.dot_dimension_numbers<[1], [0], [0], [1], [0, 0, 1, 1], [], []>} : vector<16x32xbf16>, vector<32x16xbf16>, vector<16x16xf32> -> vector<16x16xf32>
    %c1_276 = arith.constant 1 : index
    %c3_277 = arith.constant 3 : index
    %c0_278 = arith.constant 0 : index
    %c0_279 = arith.constant 0 : index
    %564 = vector.load %arg5[%c1_276, %c3_277, %c0_278, %c0_279] : memref<2x4x32x16xbf16, #tpu.memory_space<vmem>>, vector<1x1x32x16xbf16>
    %565 = vector.shape_cast %564 : vector<1x1x32x16xbf16> to vector<32x16xbf16>
    %566 = arith.truncf %372 : vector<16x32xf32> to vector<16x32xbf16>
    %cst_280 = arith.constant dense<0.000000e+00> : vector<16x16xf32>
    %567 = tpu.matmul %566, %565, %cst_280 {dimension_numbers = #tpu.dot_dimension_numbers<[1], [0], [0], [1], [0, 0, 1, 1], [], []>} : vector<16x32xbf16>, vector<32x16xbf16>, vector<16x16xf32> -> vector<16x16xf32>
    %c1_281 = arith.constant 1 : index
    %c3_282 = arith.constant 3 : index
    %c0_283 = arith.constant 0 : index
    %c0_284 = arith.constant 0 : index
    %568 = vector.load %arg6[%c1_281, %c3_282, %c0_283, %c0_284] : memref<2x4x32x16xbf16, #tpu.memory_space<vmem>>, vector<1x1x32x16xbf16>
    %569 = vector.shape_cast %568 : vector<1x1x32x16xbf16> to vector<32x16xbf16>
    %570 = arith.truncf %372 : vector<16x32xf32> to vector<16x32xbf16>
    %cst_285 = arith.constant dense<0.000000e+00> : vector<16x16xf32>
    %571 = tpu.matmul %570, %569, %cst_285 {dimension_numbers = #tpu.dot_dimension_numbers<[1], [0], [0], [1], [0, 0, 1, 1], [], []>} : vector<16x32xbf16>, vector<32x16xbf16>, vector<16x16xf32> -> vector<16x16xf32>
    %572 = vector.extract_strided_slice %563 {offsets = [0, 0], sizes = [8, 16], strides = [1, 1]} : vector<16x16xf32> to vector<8x16xf32>
    %573 = vector.extract_strided_slice %567 {offsets = [0, 0], sizes = [8, 16], strides = [1, 1]} : vector<16x16xf32> to vector<8x16xf32>
    %574 = vector.extract_strided_slice %571 {offsets = [0, 0], sizes = [8, 16], strides = [1, 1]} : vector<16x16xf32> to vector<8x16xf32>
    %575 = tpu.transpose %573, [1, 0] : vector<8x16xf32> -> vector<16x8xf32>
    %576 = arith.truncf %572 : vector<8x16xf32> to vector<8x16xbf16>
    %577 = arith.truncf %575 : vector<16x8xf32> to vector<16x8xbf16>
    %cst_286 = arith.constant dense<0.000000e+00> : vector<8x8xf32>
    %578 = tpu.matmul %576, %577, %cst_286 {dimension_numbers = #tpu.dot_dimension_numbers<[1], [0], [0], [1], [0, 0, 1, 1], [], []>} : vector<8x16xbf16>, vector<16x8xbf16>, vector<8x8xf32> -> vector<8x8xf32>
    %cst_287 = arith.constant 2.500000e-01 : f32
    %579 = vector.broadcast %cst_287 : f32 to vector<8x8xf32>
    %580 = arith.mulf %578, %579 : vector<8x8xf32>
    %cst_288 = arith.constant dense<0xFF800000> : vector<8xf32>
    %581 = vector.multi_reduction <maximumf>, %580, %cst_288 [1] : vector<8x8xf32> to vector<8xf32>
    %582 = vector.shape_cast %581 : vector<8xf32> to vector<8x1xf32>
    %583 = vector.broadcast %582 : vector<8x1xf32> to vector<8x8xf32>
    %584 = arith.subf %580, %583 : vector<8x8xf32>
    %585 = math.exp %584 : vector<8x8xf32>
    %cst_289 = arith.constant dense<0.000000e+00> : vector<8xf32>
    %586 = vector.multi_reduction <add>, %585, %cst_289 [1] : vector<8x8xf32> to vector<8xf32>
    %587 = vector.shape_cast %586 : vector<8xf32> to vector<8x1xf32>
    %588 = tpu.reciprocal %587 {approx = true} : vector<8x1xf32> -> vector<8x1xf32>
    %589 = vector.broadcast %588 : vector<8x1xf32> to vector<8x8xf32>
    %590 = arith.mulf %585, %589 : vector<8x8xf32>
    %591 = arith.truncf %590 : vector<8x8xf32> to vector<8x8xbf16>
    %592 = arith.truncf %574 : vector<8x16xf32> to vector<8x16xbf16>
    %cst_290 = arith.constant dense<0.000000e+00> : vector<8x16xf32>
    %593 = tpu.matmul %591, %592, %cst_290 {dimension_numbers = #tpu.dot_dimension_numbers<[1], [0], [0], [1], [0, 0, 1, 1], [], []>} : vector<8x8xbf16>, vector<8x16xbf16>, vector<8x16xf32> -> vector<8x16xf32>
    %594 = vector.extract_strided_slice %563 {offsets = [8, 0], sizes = [8, 16], strides = [1, 1]} : vector<16x16xf32> to vector<8x16xf32>
    %595 = vector.extract_strided_slice %567 {offsets = [8, 0], sizes = [8, 16], strides = [1, 1]} : vector<16x16xf32> to vector<8x16xf32>
    %596 = vector.extract_strided_slice %571 {offsets = [8, 0], sizes = [8, 16], strides = [1, 1]} : vector<16x16xf32> to vector<8x16xf32>
    %597 = tpu.transpose %595, [1, 0] : vector<8x16xf32> -> vector<16x8xf32>
    %598 = arith.truncf %594 : vector<8x16xf32> to vector<8x16xbf16>
    %599 = arith.truncf %597 : vector<16x8xf32> to vector<16x8xbf16>
    %cst_291 = arith.constant dense<0.000000e+00> : vector<8x8xf32>
    %600 = tpu.matmul %598, %599, %cst_291 {dimension_numbers = #tpu.dot_dimension_numbers<[1], [0], [0], [1], [0, 0, 1, 1], [], []>} : vector<8x16xbf16>, vector<16x8xbf16>, vector<8x8xf32> -> vector<8x8xf32>
    %cst_292 = arith.constant 2.500000e-01 : f32
    %601 = vector.broadcast %cst_292 : f32 to vector<8x8xf32>
    %602 = arith.mulf %600, %601 : vector<8x8xf32>
    %cst_293 = arith.constant dense<0xFF800000> : vector<8xf32>
    %603 = vector.multi_reduction <maximumf>, %602, %cst_293 [1] : vector<8x8xf32> to vector<8xf32>
    %604 = vector.shape_cast %603 : vector<8xf32> to vector<8x1xf32>
    %605 = vector.broadcast %604 : vector<8x1xf32> to vector<8x8xf32>
    %606 = arith.subf %602, %605 : vector<8x8xf32>
    %607 = math.exp %606 : vector<8x8xf32>
    %cst_294 = arith.constant dense<0.000000e+00> : vector<8xf32>
    %608 = vector.multi_reduction <add>, %607, %cst_294 [1] : vector<8x8xf32> to vector<8xf32>
    %609 = vector.shape_cast %608 : vector<8xf32> to vector<8x1xf32>
    %610 = tpu.reciprocal %609 {approx = true} : vector<8x1xf32> -> vector<8x1xf32>
    %611 = vector.broadcast %610 : vector<8x1xf32> to vector<8x8xf32>
    %612 = arith.mulf %607, %611 : vector<8x8xf32>
    %613 = arith.truncf %612 : vector<8x8xf32> to vector<8x8xbf16>
    %614 = arith.truncf %596 : vector<8x16xf32> to vector<8x16xbf16>
    %cst_295 = arith.constant dense<0.000000e+00> : vector<8x16xf32>
    %615 = tpu.matmul %613, %614, %cst_295 {dimension_numbers = #tpu.dot_dimension_numbers<[1], [0], [0], [1], [0, 0, 1, 1], [], []>} : vector<8x8xbf16>, vector<8x16xbf16>, vector<8x16xf32> -> vector<8x16xf32>
    %616 = tpu.concatenate %593, %615 in 0 : vector<8x16xf32>, vector<8x16xf32> -> vector<16x16xf32>
    %c1_296 = arith.constant 1 : index
    %c3_297 = arith.constant 3 : index
    %c0_298 = arith.constant 0 : index
    %c0_299 = arith.constant 0 : index
    %617 = vector.load %arg7[%c1_296, %c3_297, %c0_298, %c0_299] : memref<2x4x16x32xbf16, #tpu.memory_space<vmem>>, vector<1x1x16x32xbf16>
    %618 = vector.shape_cast %617 : vector<1x1x16x32xbf16> to vector<16x32xbf16>
    %619 = arith.truncf %616 : vector<16x16xf32> to vector<16x16xbf16>
    %cst_300 = arith.constant dense<0.000000e+00> : vector<16x32xf32>
    %620 = tpu.matmul %619, %618, %cst_300 {dimension_numbers = #tpu.dot_dimension_numbers<[1], [0], [0], [1], [0, 0, 1, 1], [], []>} : vector<16x16xbf16>, vector<16x32xbf16>, vector<16x32xf32> -> vector<16x32xf32>
    %621 = arith.addf %559, %620 : vector<16x32xf32>
    %c1_301 = arith.constant 1 : index
    %c0_302 = arith.constant 0 : index
    %c0_303 = arith.constant 0 : index
    %622 = vector.load %arg8[%c1_301, %c0_302, %c0_303] : memref<2x1x32xf32, #tpu.memory_space<vmem>>, vector<1x1x32xf32>
    %623 = vector.shape_cast %622 : vector<1x1x32xf32> to vector<1x32xf32>
    %624 = vector.broadcast %623 : vector<1x32xf32> to vector<16x32xf32>
    %625 = arith.addf %621, %624 : vector<16x32xf32>
    %626 = arith.addf %625, %372 : vector<16x32xf32>
    %c1_304 = arith.constant 1 : index
    %c0_305 = arith.constant 0 : index
    %c0_306 = arith.constant 0 : index
    %627 = vector.load %arg9[%c1_304, %c0_305, %c0_306] : memref<2x1x32xf32, #tpu.memory_space<vmem>>, vector<1x1x32xf32>
    %628 = vector.shape_cast %627 : vector<1x1x32xf32> to vector<1x32xf32>
    %c1_307 = arith.constant 1 : index
    %c0_308 = arith.constant 0 : index
    %c0_309 = arith.constant 0 : index
    %629 = vector.load %arg10[%c1_307, %c0_308, %c0_309] : memref<2x1x32xf32, #tpu.memory_space<vmem>>, vector<1x1x32xf32>
    %630 = vector.shape_cast %629 : vector<1x1x32xf32> to vector<1x32xf32>
    %cst_310 = arith.constant dense<0.000000e+00> : vector<16xf32>
    %631 = vector.multi_reduction <add>, %626, %cst_310 [1] : vector<16x32xf32> to vector<16xf32>
    %632 = vector.shape_cast %631 : vector<16xf32> to vector<16x1xf32>
    %cst_311 = arith.constant 3.200000e+01 : f32
    %633 = vector.broadcast %cst_311 : f32 to vector<16x1xf32>
    %634 = arith.divf %632, %633 : vector<16x1xf32>
    %635 = vector.broadcast %634 : vector<16x1xf32> to vector<16x32xf32>
    %636 = arith.subf %626, %635 : vector<16x32xf32>
    %637 = arith.mulf %636, %636 : vector<16x32xf32>
    %cst_312 = arith.constant dense<0.000000e+00> : vector<16xf32>
    %638 = vector.multi_reduction <add>, %637, %cst_312 [1] : vector<16x32xf32> to vector<16xf32>
    %639 = vector.shape_cast %638 : vector<16xf32> to vector<16x1xf32>
    %cst_313 = arith.constant 3.200000e+01 : f32
    %640 = vector.broadcast %cst_313 : f32 to vector<16x1xf32>
    %641 = arith.divf %639, %640 : vector<16x1xf32>
    %642 = vector.broadcast %634 : vector<16x1xf32> to vector<16x32xf32>
    %643 = arith.subf %626, %642 : vector<16x32xf32>
    %cst_314 = arith.constant 9.99999974E-6 : f32
    %644 = vector.broadcast %cst_314 : f32 to vector<16x1xf32>
    %645 = arith.addf %641, %644 : vector<16x1xf32>
    %646 = math.rsqrt %645 : vector<16x1xf32>
    %647 = vector.broadcast %646 : vector<16x1xf32> to vector<16x32xf32>
    %648 = arith.mulf %643, %647 : vector<16x32xf32>
    %649 = vector.broadcast %628 : vector<1x32xf32> to vector<16x32xf32>
    %650 = arith.mulf %648, %649 : vector<16x32xf32>
    %651 = vector.broadcast %630 : vector<1x32xf32> to vector<16x32xf32>
    %652 = arith.addf %650, %651 : vector<16x32xf32>
    %c1_315 = arith.constant 1 : index
    %c0_316 = arith.constant 0 : index
    %c0_317 = arith.constant 0 : index
    %653 = vector.load %arg11[%c1_315, %c0_316, %c0_317] : memref<2x32x128xbf16, #tpu.memory_space<vmem>>, vector<1x32x128xbf16>
    %654 = vector.shape_cast %653 : vector<1x32x128xbf16> to vector<32x128xbf16>
    %655 = arith.truncf %652 : vector<16x32xf32> to vector<16x32xbf16>
    %cst_318 = arith.constant dense<0.000000e+00> : vector<16x128xf32>
    %656 = tpu.matmul %655, %654, %cst_318 {dimension_numbers = #tpu.dot_dimension_numbers<[1], [0], [0], [1], [0, 0, 1, 1], [], []>} : vector<16x32xbf16>, vector<32x128xbf16>, vector<16x128xf32> -> vector<16x128xf32>
    %c1_319 = arith.constant 1 : index
    %c0_320 = arith.constant 0 : index
    %c0_321 = arith.constant 0 : index
    %657 = vector.load %arg12[%c1_319, %c0_320, %c0_321] : memref<2x1x128xf32, #tpu.memory_space<vmem>>, vector<1x1x128xf32>
    %658 = vector.shape_cast %657 : vector<1x1x128xf32> to vector<1x128xf32>
    %659 = vector.broadcast %658 : vector<1x128xf32> to vector<16x128xf32>
    %660 = arith.addf %656, %659 : vector<16x128xf32>
    %c1_322 = arith.constant 1 : index
    %c0_323 = arith.constant 0 : index
    %c0_324 = arith.constant 0 : index
    %661 = vector.load %arg13[%c1_322, %c0_323, %c0_324] : memref<2x32x128xbf16, #tpu.memory_space<vmem>>, vector<1x32x128xbf16>
    %662 = vector.shape_cast %661 : vector<1x32x128xbf16> to vector<32x128xbf16>
    %663 = arith.truncf %652 : vector<16x32xf32> to vector<16x32xbf16>
    %cst_325 = arith.constant dense<0.000000e+00> : vector<16x128xf32>
    %664 = tpu.matmul %663, %662, %cst_325 {dimension_numbers = #tpu.dot_dimension_numbers<[1], [0], [0], [1], [0, 0, 1, 1], [], []>} : vector<16x32xbf16>, vector<32x128xbf16>, vector<16x128xf32> -> vector<16x128xf32>
    %c1_326 = arith.constant 1 : index
    %c0_327 = arith.constant 0 : index
    %c0_328 = arith.constant 0 : index
    %665 = vector.load %arg14[%c1_326, %c0_327, %c0_328] : memref<2x1x128xf32, #tpu.memory_space<vmem>>, vector<1x1x128xf32>
    %666 = vector.shape_cast %665 : vector<1x1x128xf32> to vector<1x128xf32>
    %667 = vector.broadcast %666 : vector<1x128xf32> to vector<16x128xf32>
    %668 = arith.addf %664, %667 : vector<16x128xf32>
    %cst_329 = arith.constant 5.000000e-01 : f32
    %669 = vector.broadcast %cst_329 : f32 to vector<16x128xf32>
    %670 = arith.mulf %669, %668 : vector<16x128xf32>
    %cst_330 = arith.constant 4.471500e-02 : f32
    %671 = vector.broadcast %cst_330 : f32 to vector<16x128xf32>
    %672 = arith.mulf %671, %668 : vector<16x128xf32>
    %673 = arith.mulf %672, %668 : vector<16x128xf32>
    %674 = arith.mulf %673, %668 : vector<16x128xf32>
    %675 = arith.addf %668, %674 : vector<16x128xf32>
    %cst_331 = arith.constant 0.797884583 : f32
    %676 = vector.broadcast %cst_331 : f32 to vector<16x128xf32>
    %677 = arith.mulf %676, %675 : vector<16x128xf32>
    %678 = math.tanh %677 : vector<16x128xf32>
    %cst_332 = arith.constant 1.000000e+00 : f32
    %679 = vector.broadcast %cst_332 : f32 to vector<16x128xf32>
    %680 = arith.addf %679, %678 : vector<16x128xf32>
    %681 = arith.mulf %670, %680 : vector<16x128xf32>
    %682 = arith.mulf %660, %681 : vector<16x128xf32>
    %c1_333 = arith.constant 1 : index
    %c0_334 = arith.constant 0 : index
    %c0_335 = arith.constant 0 : index
    %683 = vector.load %arg15[%c1_333, %c0_334, %c0_335] : memref<2x128x32xbf16, #tpu.memory_space<vmem>>, vector<1x128x32xbf16>
    %684 = vector.shape_cast %683 : vector<1x128x32xbf16> to vector<128x32xbf16>
    %685 = arith.truncf %682 : vector<16x128xf32> to vector<16x128xbf16>
    %cst_336 = arith.constant dense<0.000000e+00> : vector<16x32xf32>
    %686 = tpu.matmul %685, %684, %cst_336 {dimension_numbers = #tpu.dot_dimension_numbers<[1], [0], [0], [1], [0, 0, 1, 1], [], []>} : vector<16x128xbf16>, vector<128x32xbf16>, vector<16x32xf32> -> vector<16x32xf32>
    %c1_337 = arith.constant 1 : index
    %c0_338 = arith.constant 0 : index
    %c0_339 = arith.constant 0 : index
    %687 = vector.load %arg16[%c1_337, %c0_338, %c0_339] : memref<2x1x32xf32, #tpu.memory_space<vmem>>, vector<1x1x32xf32>
    %688 = vector.shape_cast %687 : vector<1x1x32xf32> to vector<1x32xf32>
    %689 = vector.broadcast %688 : vector<1x32xf32> to vector<16x32xf32>
    %690 = arith.addf %686, %689 : vector<16x32xf32>
    %691 = arith.addf %690, %652 : vector<16x32xf32>
    %692 = vector.shape_cast %691 : vector<16x32xf32> to vector<2x8x32xf32>
    %693 = vector.extract_strided_slice %692 {offsets = [0, 0, 0], sizes = [2, 1, 32], strides = [1, 1, 1]} : vector<2x8x32xf32> to vector<2x1x32xf32>
    %694 = vector.shape_cast %693 : vector<2x1x32xf32> to vector<2x32xf32>
    %c0_340 = arith.constant 0 : index
    %c0_341 = arith.constant 0 : index
    %c0_342 = arith.constant 0 : index
    %695 = vector.load %arg17[%c0_340, %c0_341, %c0_342] : memref<8x32x160xbf16, #tpu.memory_space<vmem>>, vector<1x32x160xbf16>
    %696 = vector.shape_cast %695 : vector<1x32x160xbf16> to vector<32x160xbf16>
    %697 = arith.truncf %694 : vector<2x32xf32> to vector<2x32xbf16>
    %cst_343 = arith.constant dense<0.000000e+00> : vector<2x160xf32>
    %698 = tpu.matmul %697, %696, %cst_343 {dimension_numbers = #tpu.dot_dimension_numbers<[1], [0], [0], [1], [0, 0, 1, 1], [], []>} : vector<2x32xbf16>, vector<32x160xbf16>, vector<2x160xf32> -> vector<2x160xf32>
    %c0_344 = arith.constant 0 : index
    %c0_345 = arith.constant 0 : index
    %c0_346 = arith.constant 0 : index
    %699 = vector.load %arg18[%c0_344, %c0_345, %c0_346] : memref<8x1x160xf32, #tpu.memory_space<vmem>>, vector<1x1x160xf32>
    %700 = vector.shape_cast %699 : vector<1x1x160xf32> to vector<1x160xf32>
    %701 = vector.broadcast %700 : vector<1x160xf32> to vector<2x160xf32>
    %702 = arith.addf %698, %701 : vector<2x160xf32>
    %cst_347 = arith.constant 0.000000e+00 : f32
    %703 = vector.broadcast %cst_347 : f32 to vector<2x160xf32>
    %704 = arith.maximumf %702, %703 : vector<2x160xf32>
    %c0_348 = arith.constant 0 : index
    %c0_349 = arith.constant 0 : index
    %c0_350 = arith.constant 0 : index
    %705 = vector.load %arg19[%c0_348, %c0_349, %c0_350] : memref<8x160x128xbf16, #tpu.memory_space<vmem>>, vector<1x160x128xbf16>
    %706 = vector.shape_cast %705 : vector<1x160x128xbf16> to vector<160x128xbf16>
    %707 = arith.truncf %704 : vector<2x160xf32> to vector<2x160xbf16>
    %cst_351 = arith.constant dense<0.000000e+00> : vector<2x128xf32>
    %708 = tpu.matmul %707, %706, %cst_351 {dimension_numbers = #tpu.dot_dimension_numbers<[1], [0], [0], [1], [0, 0, 1, 1], [], []>} : vector<2x160xbf16>, vector<160x128xbf16>, vector<2x128xf32> -> vector<2x128xf32>
    %c0_352 = arith.constant 0 : index
    %c0_353 = arith.constant 0 : index
    %c0_354 = arith.constant 0 : index
    %709 = vector.load %arg20[%c0_352, %c0_353, %c0_354] : memref<8x1x128xf32, #tpu.memory_space<vmem>>, vector<1x1x128xf32>
    %710 = vector.shape_cast %709 : vector<1x1x128xf32> to vector<1x128xf32>
    %711 = vector.broadcast %710 : vector<1x128xf32> to vector<2x128xf32>
    %712 = arith.addf %708, %711 : vector<2x128xf32>
    %713 = vector.extract_strided_slice %692 {offsets = [0, 1, 0], sizes = [2, 1, 32], strides = [1, 1, 1]} : vector<2x8x32xf32> to vector<2x1x32xf32>
    %714 = vector.shape_cast %713 : vector<2x1x32xf32> to vector<2x32xf32>
    %c1_355 = arith.constant 1 : index
    %c0_356 = arith.constant 0 : index
    %c0_357 = arith.constant 0 : index
    %715 = vector.load %arg17[%c1_355, %c0_356, %c0_357] : memref<8x32x160xbf16, #tpu.memory_space<vmem>>, vector<1x32x160xbf16>
    %716 = vector.shape_cast %715 : vector<1x32x160xbf16> to vector<32x160xbf16>
    %717 = arith.truncf %714 : vector<2x32xf32> to vector<2x32xbf16>
    %cst_358 = arith.constant dense<0.000000e+00> : vector<2x160xf32>
    %718 = tpu.matmul %717, %716, %cst_358 {dimension_numbers = #tpu.dot_dimension_numbers<[1], [0], [0], [1], [0, 0, 1, 1], [], []>} : vector<2x32xbf16>, vector<32x160xbf16>, vector<2x160xf32> -> vector<2x160xf32>
    %c1_359 = arith.constant 1 : index
    %c0_360 = arith.constant 0 : index
    %c0_361 = arith.constant 0 : index
    %719 = vector.load %arg18[%c1_359, %c0_360, %c0_361] : memref<8x1x160xf32, #tpu.memory_space<vmem>>, vector<1x1x160xf32>
    %720 = vector.shape_cast %719 : vector<1x1x160xf32> to vector<1x160xf32>
    %721 = vector.broadcast %720 : vector<1x160xf32> to vector<2x160xf32>
    %722 = arith.addf %718, %721 : vector<2x160xf32>
    %cst_362 = arith.constant 0.000000e+00 : f32
    %723 = vector.broadcast %cst_362 : f32 to vector<2x160xf32>
    %724 = arith.maximumf %722, %723 : vector<2x160xf32>
    %c1_363 = arith.constant 1 : index
    %c0_364 = arith.constant 0 : index
    %c0_365 = arith.constant 0 : index
    %725 = vector.load %arg19[%c1_363, %c0_364, %c0_365] : memref<8x160x128xbf16, #tpu.memory_space<vmem>>, vector<1x160x128xbf16>
    %726 = vector.shape_cast %725 : vector<1x160x128xbf16> to vector<160x128xbf16>
    %727 = arith.truncf %724 : vector<2x160xf32> to vector<2x160xbf16>
    %cst_366 = arith.constant dense<0.000000e+00> : vector<2x128xf32>
    %728 = tpu.matmul %727, %726, %cst_366 {dimension_numbers = #tpu.dot_dimension_numbers<[1], [0], [0], [1], [0, 0, 1, 1], [], []>} : vector<2x160xbf16>, vector<160x128xbf16>, vector<2x128xf32> -> vector<2x128xf32>
    %c1_367 = arith.constant 1 : index
    %c0_368 = arith.constant 0 : index
    %c0_369 = arith.constant 0 : index
    %729 = vector.load %arg20[%c1_367, %c0_368, %c0_369] : memref<8x1x128xf32, #tpu.memory_space<vmem>>, vector<1x1x128xf32>
    %730 = vector.shape_cast %729 : vector<1x1x128xf32> to vector<1x128xf32>
    %731 = vector.broadcast %730 : vector<1x128xf32> to vector<2x128xf32>
    %732 = arith.addf %728, %731 : vector<2x128xf32>
    %733 = vector.extract_strided_slice %692 {offsets = [0, 2, 0], sizes = [2, 1, 32], strides = [1, 1, 1]} : vector<2x8x32xf32> to vector<2x1x32xf32>
    %734 = vector.shape_cast %733 : vector<2x1x32xf32> to vector<2x32xf32>
    %c2_370 = arith.constant 2 : index
    %c0_371 = arith.constant 0 : index
    %c0_372 = arith.constant 0 : index
    %735 = vector.load %arg17[%c2_370, %c0_371, %c0_372] : memref<8x32x160xbf16, #tpu.memory_space<vmem>>, vector<1x32x160xbf16>
    %736 = vector.shape_cast %735 : vector<1x32x160xbf16> to vector<32x160xbf16>
    %737 = arith.truncf %734 : vector<2x32xf32> to vector<2x32xbf16>
    %cst_373 = arith.constant dense<0.000000e+00> : vector<2x160xf32>
    %738 = tpu.matmul %737, %736, %cst_373 {dimension_numbers = #tpu.dot_dimension_numbers<[1], [0], [0], [1], [0, 0, 1, 1], [], []>} : vector<2x32xbf16>, vector<32x160xbf16>, vector<2x160xf32> -> vector<2x160xf32>
    %c2_374 = arith.constant 2 : index
    %c0_375 = arith.constant 0 : index
    %c0_376 = arith.constant 0 : index
    %739 = vector.load %arg18[%c2_374, %c0_375, %c0_376] : memref<8x1x160xf32, #tpu.memory_space<vmem>>, vector<1x1x160xf32>
    %740 = vector.shape_cast %739 : vector<1x1x160xf32> to vector<1x160xf32>
    %741 = vector.broadcast %740 : vector<1x160xf32> to vector<2x160xf32>
    %742 = arith.addf %738, %741 : vector<2x160xf32>
    %cst_377 = arith.constant 0.000000e+00 : f32
    %743 = vector.broadcast %cst_377 : f32 to vector<2x160xf32>
    %744 = arith.maximumf %742, %743 : vector<2x160xf32>
    %c2_378 = arith.constant 2 : index
    %c0_379 = arith.constant 0 : index
    %c0_380 = arith.constant 0 : index
    %745 = vector.load %arg19[%c2_378, %c0_379, %c0_380] : memref<8x160x128xbf16, #tpu.memory_space<vmem>>, vector<1x160x128xbf16>
    %746 = vector.shape_cast %745 : vector<1x160x128xbf16> to vector<160x128xbf16>
    %747 = arith.truncf %744 : vector<2x160xf32> to vector<2x160xbf16>
    %cst_381 = arith.constant dense<0.000000e+00> : vector<2x128xf32>
    %748 = tpu.matmul %747, %746, %cst_381 {dimension_numbers = #tpu.dot_dimension_numbers<[1], [0], [0], [1], [0, 0, 1, 1], [], []>} : vector<2x160xbf16>, vector<160x128xbf16>, vector<2x128xf32> -> vector<2x128xf32>
    %c2_382 = arith.constant 2 : index
    %c0_383 = arith.constant 0 : index
    %c0_384 = arith.constant 0 : index
    %749 = vector.load %arg20[%c2_382, %c0_383, %c0_384] : memref<8x1x128xf32, #tpu.memory_space<vmem>>, vector<1x1x128xf32>
    %750 = vector.shape_cast %749 : vector<1x1x128xf32> to vector<1x128xf32>
    %751 = vector.broadcast %750 : vector<1x128xf32> to vector<2x128xf32>
    %752 = arith.addf %748, %751 : vector<2x128xf32>
    %753 = vector.extract_strided_slice %692 {offsets = [0, 3, 0], sizes = [2, 1, 32], strides = [1, 1, 1]} : vector<2x8x32xf32> to vector<2x1x32xf32>
    %754 = vector.shape_cast %753 : vector<2x1x32xf32> to vector<2x32xf32>
    %c3_385 = arith.constant 3 : index
    %c0_386 = arith.constant 0 : index
    %c0_387 = arith.constant 0 : index
    %755 = vector.load %arg17[%c3_385, %c0_386, %c0_387] : memref<8x32x160xbf16, #tpu.memory_space<vmem>>, vector<1x32x160xbf16>
    %756 = vector.shape_cast %755 : vector<1x32x160xbf16> to vector<32x160xbf16>
    %757 = arith.truncf %754 : vector<2x32xf32> to vector<2x32xbf16>
    %cst_388 = arith.constant dense<0.000000e+00> : vector<2x160xf32>
    %758 = tpu.matmul %757, %756, %cst_388 {dimension_numbers = #tpu.dot_dimension_numbers<[1], [0], [0], [1], [0, 0, 1, 1], [], []>} : vector<2x32xbf16>, vector<32x160xbf16>, vector<2x160xf32> -> vector<2x160xf32>
    %c3_389 = arith.constant 3 : index
    %c0_390 = arith.constant 0 : index
    %c0_391 = arith.constant 0 : index
    %759 = vector.load %arg18[%c3_389, %c0_390, %c0_391] : memref<8x1x160xf32, #tpu.memory_space<vmem>>, vector<1x1x160xf32>
    %760 = vector.shape_cast %759 : vector<1x1x160xf32> to vector<1x160xf32>
    %761 = vector.broadcast %760 : vector<1x160xf32> to vector<2x160xf32>
    %762 = arith.addf %758, %761 : vector<2x160xf32>
    %cst_392 = arith.constant 0.000000e+00 : f32
    %763 = vector.broadcast %cst_392 : f32 to vector<2x160xf32>
    %764 = arith.maximumf %762, %763 : vector<2x160xf32>
    %c3_393 = arith.constant 3 : index
    %c0_394 = arith.constant 0 : index
    %c0_395 = arith.constant 0 : index
    %765 = vector.load %arg19[%c3_393, %c0_394, %c0_395] : memref<8x160x128xbf16, #tpu.memory_space<vmem>>, vector<1x160x128xbf16>
    %766 = vector.shape_cast %765 : vector<1x160x128xbf16> to vector<160x128xbf16>
    %767 = arith.truncf %764 : vector<2x160xf32> to vector<2x160xbf16>
    %cst_396 = arith.constant dense<0.000000e+00> : vector<2x128xf32>
    %768 = tpu.matmul %767, %766, %cst_396 {dimension_numbers = #tpu.dot_dimension_numbers<[1], [0], [0], [1], [0, 0, 1, 1], [], []>} : vector<2x160xbf16>, vector<160x128xbf16>, vector<2x128xf32> -> vector<2x128xf32>
    %c3_397 = arith.constant 3 : index
    %c0_398 = arith.constant 0 : index
    %c0_399 = arith.constant 0 : index
    %769 = vector.load %arg20[%c3_397, %c0_398, %c0_399] : memref<8x1x128xf32, #tpu.memory_space<vmem>>, vector<1x1x128xf32>
    %770 = vector.shape_cast %769 : vector<1x1x128xf32> to vector<1x128xf32>
    %771 = vector.broadcast %770 : vector<1x128xf32> to vector<2x128xf32>
    %772 = arith.addf %768, %771 : vector<2x128xf32>
    %773 = vector.extract_strided_slice %692 {offsets = [0, 4, 0], sizes = [2, 1, 32], strides = [1, 1, 1]} : vector<2x8x32xf32> to vector<2x1x32xf32>
    %774 = vector.shape_cast %773 : vector<2x1x32xf32> to vector<2x32xf32>
    %c4 = arith.constant 4 : index
    %c0_400 = arith.constant 0 : index
    %c0_401 = arith.constant 0 : index
    %775 = vector.load %arg17[%c4, %c0_400, %c0_401] : memref<8x32x160xbf16, #tpu.memory_space<vmem>>, vector<1x32x160xbf16>
    %776 = vector.shape_cast %775 : vector<1x32x160xbf16> to vector<32x160xbf16>
    %777 = arith.truncf %774 : vector<2x32xf32> to vector<2x32xbf16>
    %cst_402 = arith.constant dense<0.000000e+00> : vector<2x160xf32>
    %778 = tpu.matmul %777, %776, %cst_402 {dimension_numbers = #tpu.dot_dimension_numbers<[1], [0], [0], [1], [0, 0, 1, 1], [], []>} : vector<2x32xbf16>, vector<32x160xbf16>, vector<2x160xf32> -> vector<2x160xf32>
    %c4_403 = arith.constant 4 : index
    %c0_404 = arith.constant 0 : index
    %c0_405 = arith.constant 0 : index
    %779 = vector.load %arg18[%c4_403, %c0_404, %c0_405] : memref<8x1x160xf32, #tpu.memory_space<vmem>>, vector<1x1x160xf32>
    %780 = vector.shape_cast %779 : vector<1x1x160xf32> to vector<1x160xf32>
    %781 = vector.broadcast %780 : vector<1x160xf32> to vector<2x160xf32>
    %782 = arith.addf %778, %781 : vector<2x160xf32>
    %cst_406 = arith.constant 0.000000e+00 : f32
    %783 = vector.broadcast %cst_406 : f32 to vector<2x160xf32>
    %784 = arith.maximumf %782, %783 : vector<2x160xf32>
    %c4_407 = arith.constant 4 : index
    %c0_408 = arith.constant 0 : index
    %c0_409 = arith.constant 0 : index
    %785 = vector.load %arg19[%c4_407, %c0_408, %c0_409] : memref<8x160x128xbf16, #tpu.memory_space<vmem>>, vector<1x160x128xbf16>
    %786 = vector.shape_cast %785 : vector<1x160x128xbf16> to vector<160x128xbf16>
    %787 = arith.truncf %784 : vector<2x160xf32> to vector<2x160xbf16>
    %cst_410 = arith.constant dense<0.000000e+00> : vector<2x128xf32>
    %788 = tpu.matmul %787, %786, %cst_410 {dimension_numbers = #tpu.dot_dimension_numbers<[1], [0], [0], [1], [0, 0, 1, 1], [], []>} : vector<2x160xbf16>, vector<160x128xbf16>, vector<2x128xf32> -> vector<2x128xf32>
    %c4_411 = arith.constant 4 : index
    %c0_412 = arith.constant 0 : index
    %c0_413 = arith.constant 0 : index
    %789 = vector.load %arg20[%c4_411, %c0_412, %c0_413] : memref<8x1x128xf32, #tpu.memory_space<vmem>>, vector<1x1x128xf32>
    %790 = vector.shape_cast %789 : vector<1x1x128xf32> to vector<1x128xf32>
    %791 = vector.broadcast %790 : vector<1x128xf32> to vector<2x128xf32>
    %792 = arith.addf %788, %791 : vector<2x128xf32>
    %793 = vector.extract_strided_slice %692 {offsets = [0, 5, 0], sizes = [2, 1, 32], strides = [1, 1, 1]} : vector<2x8x32xf32> to vector<2x1x32xf32>
    %794 = vector.shape_cast %793 : vector<2x1x32xf32> to vector<2x32xf32>
    %c5 = arith.constant 5 : index
    %c0_414 = arith.constant 0 : index
    %c0_415 = arith.constant 0 : index
    %795 = vector.load %arg17[%c5, %c0_414, %c0_415] : memref<8x32x160xbf16, #tpu.memory_space<vmem>>, vector<1x32x160xbf16>
    %796 = vector.shape_cast %795 : vector<1x32x160xbf16> to vector<32x160xbf16>
    %797 = arith.truncf %794 : vector<2x32xf32> to vector<2x32xbf16>
    %cst_416 = arith.constant dense<0.000000e+00> : vector<2x160xf32>
    %798 = tpu.matmul %797, %796, %cst_416 {dimension_numbers = #tpu.dot_dimension_numbers<[1], [0], [0], [1], [0, 0, 1, 1], [], []>} : vector<2x32xbf16>, vector<32x160xbf16>, vector<2x160xf32> -> vector<2x160xf32>
    %c5_417 = arith.constant 5 : index
    %c0_418 = arith.constant 0 : index
    %c0_419 = arith.constant 0 : index
    %799 = vector.load %arg18[%c5_417, %c0_418, %c0_419] : memref<8x1x160xf32, #tpu.memory_space<vmem>>, vector<1x1x160xf32>
    %800 = vector.shape_cast %799 : vector<1x1x160xf32> to vector<1x160xf32>
    %801 = vector.broadcast %800 : vector<1x160xf32> to vector<2x160xf32>
    %802 = arith.addf %798, %801 : vector<2x160xf32>
    %cst_420 = arith.constant 0.000000e+00 : f32
    %803 = vector.broadcast %cst_420 : f32 to vector<2x160xf32>
    %804 = arith.maximumf %802, %803 : vector<2x160xf32>
    %c5_421 = arith.constant 5 : index
    %c0_422 = arith.constant 0 : index
    %c0_423 = arith.constant 0 : index
    %805 = vector.load %arg19[%c5_421, %c0_422, %c0_423] : memref<8x160x128xbf16, #tpu.memory_space<vmem>>, vector<1x160x128xbf16>
    %806 = vector.shape_cast %805 : vector<1x160x128xbf16> to vector<160x128xbf16>
    %807 = arith.truncf %804 : vector<2x160xf32> to vector<2x160xbf16>
    %cst_424 = arith.constant dense<0.000000e+00> : vector<2x128xf32>
    %808 = tpu.matmul %807, %806, %cst_424 {dimension_numbers = #tpu.dot_dimension_numbers<[1], [0], [0], [1], [0, 0, 1, 1], [], []>} : vector<2x160xbf16>, vector<160x128xbf16>, vector<2x128xf32> -> vector<2x128xf32>
    %c5_425 = arith.constant 5 : index
    %c0_426 = arith.constant 0 : index
    %c0_427 = arith.constant 0 : index
    %809 = vector.load %arg20[%c5_425, %c0_426, %c0_427] : memref<8x1x128xf32, #tpu.memory_space<vmem>>, vector<1x1x128xf32>
    %810 = vector.shape_cast %809 : vector<1x1x128xf32> to vector<1x128xf32>
    %811 = vector.broadcast %810 : vector<1x128xf32> to vector<2x128xf32>
    %812 = arith.addf %808, %811 : vector<2x128xf32>
    %813 = vector.extract_strided_slice %692 {offsets = [0, 6, 0], sizes = [2, 1, 32], strides = [1, 1, 1]} : vector<2x8x32xf32> to vector<2x1x32xf32>
    %814 = vector.shape_cast %813 : vector<2x1x32xf32> to vector<2x32xf32>
    %c6 = arith.constant 6 : index
    %c0_428 = arith.constant 0 : index
    %c0_429 = arith.constant 0 : index
    %815 = vector.load %arg17[%c6, %c0_428, %c0_429] : memref<8x32x160xbf16, #tpu.memory_space<vmem>>, vector<1x32x160xbf16>
    %816 = vector.shape_cast %815 : vector<1x32x160xbf16> to vector<32x160xbf16>
    %817 = arith.truncf %814 : vector<2x32xf32> to vector<2x32xbf16>
    %cst_430 = arith.constant dense<0.000000e+00> : vector<2x160xf32>
    %818 = tpu.matmul %817, %816, %cst_430 {dimension_numbers = #tpu.dot_dimension_numbers<[1], [0], [0], [1], [0, 0, 1, 1], [], []>} : vector<2x32xbf16>, vector<32x160xbf16>, vector<2x160xf32> -> vector<2x160xf32>
    %c6_431 = arith.constant 6 : index
    %c0_432 = arith.constant 0 : index
    %c0_433 = arith.constant 0 : index
    %819 = vector.load %arg18[%c6_431, %c0_432, %c0_433] : memref<8x1x160xf32, #tpu.memory_space<vmem>>, vector<1x1x160xf32>
    %820 = vector.shape_cast %819 : vector<1x1x160xf32> to vector<1x160xf32>
    %821 = vector.broadcast %820 : vector<1x160xf32> to vector<2x160xf32>
    %822 = arith.addf %818, %821 : vector<2x160xf32>
    %cst_434 = arith.constant 0.000000e+00 : f32
    %823 = vector.broadcast %cst_434 : f32 to vector<2x160xf32>
    %824 = arith.maximumf %822, %823 : vector<2x160xf32>
    %c6_435 = arith.constant 6 : index
    %c0_436 = arith.constant 0 : index
    %c0_437 = arith.constant 0 : index
    %825 = vector.load %arg19[%c6_435, %c0_436, %c0_437] : memref<8x160x128xbf16, #tpu.memory_space<vmem>>, vector<1x160x128xbf16>
    %826 = vector.shape_cast %825 : vector<1x160x128xbf16> to vector<160x128xbf16>
    %827 = arith.truncf %824 : vector<2x160xf32> to vector<2x160xbf16>
    %cst_438 = arith.constant dense<0.000000e+00> : vector<2x128xf32>
    %828 = tpu.matmul %827, %826, %cst_438 {dimension_numbers = #tpu.dot_dimension_numbers<[1], [0], [0], [1], [0, 0, 1, 1], [], []>} : vector<2x160xbf16>, vector<160x128xbf16>, vector<2x128xf32> -> vector<2x128xf32>
    %c6_439 = arith.constant 6 : index
    %c0_440 = arith.constant 0 : index
    %c0_441 = arith.constant 0 : index
    %829 = vector.load %arg20[%c6_439, %c0_440, %c0_441] : memref<8x1x128xf32, #tpu.memory_space<vmem>>, vector<1x1x128xf32>
    %830 = vector.shape_cast %829 : vector<1x1x128xf32> to vector<1x128xf32>
    %831 = vector.broadcast %830 : vector<1x128xf32> to vector<2x128xf32>
    %832 = arith.addf %828, %831 : vector<2x128xf32>
    %833 = vector.extract_strided_slice %692 {offsets = [0, 7, 0], sizes = [2, 1, 32], strides = [1, 1, 1]} : vector<2x8x32xf32> to vector<2x1x32xf32>
    %834 = vector.shape_cast %833 : vector<2x1x32xf32> to vector<2x32xf32>
    %c7 = arith.constant 7 : index
    %c0_442 = arith.constant 0 : index
    %c0_443 = arith.constant 0 : index
    %835 = vector.load %arg17[%c7, %c0_442, %c0_443] : memref<8x32x160xbf16, #tpu.memory_space<vmem>>, vector<1x32x160xbf16>
    %836 = vector.shape_cast %835 : vector<1x32x160xbf16> to vector<32x160xbf16>
    %837 = arith.truncf %834 : vector<2x32xf32> to vector<2x32xbf16>
    %cst_444 = arith.constant dense<0.000000e+00> : vector<2x160xf32>
    %838 = tpu.matmul %837, %836, %cst_444 {dimension_numbers = #tpu.dot_dimension_numbers<[1], [0], [0], [1], [0, 0, 1, 1], [], []>} : vector<2x32xbf16>, vector<32x160xbf16>, vector<2x160xf32> -> vector<2x160xf32>
    %c7_445 = arith.constant 7 : index
    %c0_446 = arith.constant 0 : index
    %c0_447 = arith.constant 0 : index
    %839 = vector.load %arg18[%c7_445, %c0_446, %c0_447] : memref<8x1x160xf32, #tpu.memory_space<vmem>>, vector<1x1x160xf32>
    %840 = vector.shape_cast %839 : vector<1x1x160xf32> to vector<1x160xf32>
    %841 = vector.broadcast %840 : vector<1x160xf32> to vector<2x160xf32>
    %842 = arith.addf %838, %841 : vector<2x160xf32>
    %cst_448 = arith.constant 0.000000e+00 : f32
    %843 = vector.broadcast %cst_448 : f32 to vector<2x160xf32>
    %844 = arith.maximumf %842, %843 : vector<2x160xf32>
    %c7_449 = arith.constant 7 : index
    %c0_450 = arith.constant 0 : index
    %c0_451 = arith.constant 0 : index
    %845 = vector.load %arg19[%c7_449, %c0_450, %c0_451] : memref<8x160x128xbf16, #tpu.memory_space<vmem>>, vector<1x160x128xbf16>
    %846 = vector.shape_cast %845 : vector<1x160x128xbf16> to vector<160x128xbf16>
    %847 = arith.truncf %844 : vector<2x160xf32> to vector<2x160xbf16>
    %cst_452 = arith.constant dense<0.000000e+00> : vector<2x128xf32>
    %848 = tpu.matmul %847, %846, %cst_452 {dimension_numbers = #tpu.dot_dimension_numbers<[1], [0], [0], [1], [0, 0, 1, 1], [], []>} : vector<2x160xbf16>, vector<160x128xbf16>, vector<2x128xf32> -> vector<2x128xf32>
    %c7_453 = arith.constant 7 : index
    %c0_454 = arith.constant 0 : index
    %c0_455 = arith.constant 0 : index
    %849 = vector.load %arg20[%c7_453, %c0_454, %c0_455] : memref<8x1x128xf32, #tpu.memory_space<vmem>>, vector<1x1x128xf32>
    %850 = vector.shape_cast %849 : vector<1x1x128xf32> to vector<1x128xf32>
    %851 = vector.broadcast %850 : vector<1x128xf32> to vector<2x128xf32>
    %852 = arith.addf %848, %851 : vector<2x128xf32>
    %853 = vector.shape_cast %712 : vector<2x128xf32> to vector<2x1x128xf32>
    %854 = vector.shape_cast %732 : vector<2x128xf32> to vector<2x1x128xf32>
    %855 = vector.shape_cast %752 : vector<2x128xf32> to vector<2x1x128xf32>
    %856 = vector.shape_cast %772 : vector<2x128xf32> to vector<2x1x128xf32>
    %857 = vector.shape_cast %792 : vector<2x128xf32> to vector<2x1x128xf32>
    %858 = vector.shape_cast %812 : vector<2x128xf32> to vector<2x1x128xf32>
    %859 = vector.shape_cast %832 : vector<2x128xf32> to vector<2x1x128xf32>
    %860 = vector.shape_cast %852 : vector<2x128xf32> to vector<2x1x128xf32>
    %861 = tpu.concatenate %853, %854, %855, %856, %857, %858, %859, %860 in 1 : vector<2x1x128xf32>, vector<2x1x128xf32>, vector<2x1x128xf32>, vector<2x1x128xf32>, vector<2x1x128xf32>, vector<2x1x128xf32>, vector<2x1x128xf32>, vector<2x1x128xf32> -> vector<2x8x128xf32>
    %c0_456 = arith.constant 0 : index
    %c0_457 = arith.constant 0 : index
    %c0_458 = arith.constant 0 : index
    %862 = vector.load %arg21[%c0_456, %c0_457, %c0_458] : memref<2x8x128xf32, #tpu.memory_space<vmem>>, vector<2x8x128xf32>
    tpu.vector_store %arg21[%c0_456, %c0_457, %c0_458], %861 {strides = array<i32>} : memref<2x8x128xf32, #tpu.memory_space<vmem>>, vector<2x8x128xf32>,
    return
  }
  func.func @transform_0(%arg0: i32) -> (i32, i32, i32) {
    %c0_i32 = arith.constant 0 : i32
    %c0_i32_0 = arith.constant 0 : i32
    %c0_i32_1 = arith.constant 0 : i32
    return %arg0, %c0_i32, %c0_i32_0 : i32, i32, i32
  }
  func.func @transform_1(%arg0: i32) -> (i32, i32, i32) {
    %c0_i32 = arith.constant 0 : i32
    %c0_i32_0 = arith.constant 0 : i32
    %c0_i32_1 = arith.constant 0 : i32
    %c0_i32_2 = arith.constant 0 : i32
    return %c0_i32, %c0_i32_0, %c0_i32_1 : i32, i32, i32
  }
  func.func @transform_2(%arg0: i32) -> (i32, i32, i32) {
    %c0_i32 = arith.constant 0 : i32
    %c0_i32_0 = arith.constant 0 : i32
    %c0_i32_1 = arith.constant 0 : i32
    %c0_i32_2 = arith.constant 0 : i32
    return %c0_i32, %c0_i32_0, %c0_i32_1 : i32, i32, i32
  }
  func.func @transform_3(%arg0: i32) -> (i32, i32, i32, i32) {
    %c0_i32 = arith.constant 0 : i32
    %c0_i32_0 = arith.constant 0 : i32
    %c0_i32_1 = arith.constant 0 : i32
    %c0_i32_2 = arith.constant 0 : i32
    %c0_i32_3 = arith.constant 0 : i32
    return %c0_i32, %c0_i32_0, %c0_i32_1, %c0_i32_2 : i32, i32, i32, i32
  }
  func.func @transform_4(%arg0: i32) -> (i32, i32, i32, i32) {
    %c0_i32 = arith.constant 0 : i32
    %c0_i32_0 = arith.constant 0 : i32
    %c0_i32_1 = arith.constant 0 : i32
    %c0_i32_2 = arith.constant 0 : i32
    %c0_i32_3 = arith.constant 0 : i32
    return %c0_i32, %c0_i32_0, %c0_i32_1, %c0_i32_2 : i32, i32, i32, i32
  }
  func.func @transform_5(%arg0: i32) -> (i32, i32, i32, i32) {
    %c0_i32 = arith.constant 0 : i32
    %c0_i32_0 = arith.constant 0 : i32
    %c0_i32_1 = arith.constant 0 : i32
    %c0_i32_2 = arith.constant 0 : i32
    %c0_i32_3 = arith.constant 0 : i32
    return %c0_i32, %c0_i32_0, %c0_i32_1, %c0_i32_2 : i32, i32, i32, i32
  }
  func.func @transform_6(%arg0: i32) -> (i32, i32, i32, i32) {
    %c0_i32 = arith.constant 0 : i32
    %c0_i32_0 = arith.constant 0 : i32
    %c0_i32_1 = arith.constant 0 : i32
    %c0_i32_2 = arith.constant 0 : i32
    %c0_i32_3 = arith.constant 0 : i32
    return %c0_i32, %c0_i32_0, %c0_i32_1, %c0_i32_2 : i32, i32, i32, i32
  }
  func.func @transform_7(%arg0: i32) -> (i32, i32, i32) {
    %c0_i32 = arith.constant 0 : i32
    %c0_i32_0 = arith.constant 0 : i32
    %c0_i32_1 = arith.constant 0 : i32
    %c0_i32_2 = arith.constant 0 : i32
    return %c0_i32, %c0_i32_0, %c0_i32_1 : i32, i32, i32
  }
  func.func @transform_8(%arg0: i32) -> (i32, i32, i32) {
    %c0_i32 = arith.constant 0 : i32
    %c0_i32_0 = arith.constant 0 : i32
    %c0_i32_1 = arith.constant 0 : i32
    %c0_i32_2 = arith.constant 0 : i32
    return %c0_i32, %c0_i32_0, %c0_i32_1 : i32, i32, i32
  }
  func.func @transform_9(%arg0: i32) -> (i32, i32, i32) {
    %c0_i32 = arith.constant 0 : i32
    %c0_i32_0 = arith.constant 0 : i32
    %c0_i32_1 = arith.constant 0 : i32
    %c0_i32_2 = arith.constant 0 : i32
    return %c0_i32, %c0_i32_0, %c0_i32_1 : i32, i32, i32
  }
  func.func @transform_10(%arg0: i32) -> (i32, i32, i32) {
    %c0_i32 = arith.constant 0 : i32
    %c0_i32_0 = arith.constant 0 : i32
    %c0_i32_1 = arith.constant 0 : i32
    %c0_i32_2 = arith.constant 0 : i32
    return %c0_i32, %c0_i32_0, %c0_i32_1 : i32, i32, i32
  }
  func.func @transform_11(%arg0: i32) -> (i32, i32, i32) {
    %c0_i32 = arith.constant 0 : i32
    %c0_i32_0 = arith.constant 0 : i32
    %c0_i32_1 = arith.constant 0 : i32
    %c0_i32_2 = arith.constant 0 : i32
    return %c0_i32, %c0_i32_0, %c0_i32_1 : i32, i32, i32
  }
  func.func @transform_12(%arg0: i32) -> (i32, i32, i32) {
    %c0_i32 = arith.constant 0 : i32
    %c0_i32_0 = arith.constant 0 : i32
    %c0_i32_1 = arith.constant 0 : i32
    %c0_i32_2 = arith.constant 0 : i32
    return %c0_i32, %c0_i32_0, %c0_i32_1 : i32, i32, i32
  }
  func.func @transform_13(%arg0: i32) -> (i32, i32, i32) {
    %c0_i32 = arith.constant 0 : i32
    %c0_i32_0 = arith.constant 0 : i32
    %c0_i32_1 = arith.constant 0 : i32
    %c0_i32_2 = arith.constant 0 : i32
    return %c0_i32, %c0_i32_0, %c0_i32_1 : i32, i32, i32
  }
  func.func @transform_14(%arg0: i32) -> (i32, i32, i32) {
    %c0_i32 = arith.constant 0 : i32
    %c0_i32_0 = arith.constant 0 : i32
    %c0_i32_1 = arith.constant 0 : i32
    %c0_i32_2 = arith.constant 0 : i32
    return %c0_i32, %c0_i32_0, %c0_i32_1 : i32, i32, i32
  }
  func.func @transform_15(%arg0: i32) -> (i32, i32, i32) {
    %c0_i32 = arith.constant 0 : i32
    %c0_i32_0 = arith.constant 0 : i32
    %c0_i32_1 = arith.constant 0 : i32
    %c0_i32_2 = arith.constant 0 : i32
    return %c0_i32, %c0_i32_0, %c0_i32_1 : i32, i32, i32
  }
  func.func @transform_16(%arg0: i32) -> (i32, i32, i32) {
    %c0_i32 = arith.constant 0 : i32
    %c0_i32_0 = arith.constant 0 : i32
    %c0_i32_1 = arith.constant 0 : i32
    %c0_i32_2 = arith.constant 0 : i32
    return %c0_i32, %c0_i32_0, %c0_i32_1 : i32, i32, i32
  }
  func.func @transform_17(%arg0: i32) -> (i32, i32, i32) {
    %c0_i32 = arith.constant 0 : i32
    %c0_i32_0 = arith.constant 0 : i32
    %c0_i32_1 = arith.constant 0 : i32
    %c0_i32_2 = arith.constant 0 : i32
    return %c0_i32, %c0_i32_0, %c0_i32_1 : i32, i32, i32
  }
  func.func @transform_18(%arg0: i32) -> (i32, i32, i32) {
    %c0_i32 = arith.constant 0 : i32
    %c0_i32_0 = arith.constant 0 : i32
    %c0_i32_1 = arith.constant 0 : i32
    %c0_i32_2 = arith.constant 0 : i32
    return %c0_i32, %c0_i32_0, %c0_i32_1 : i32, i32, i32
  }
  func.func @transform_19(%arg0: i32) -> (i32, i32, i32) {
    %c0_i32 = arith.constant 0 : i32
    %c0_i32_0 = arith.constant 0 : i32
    %c0_i32_1 = arith.constant 0 : i32
    %c0_i32_2 = arith.constant 0 : i32
    return %c0_i32, %c0_i32_0, %c0_i32_1 : i32, i32, i32
  }
  func.func @transform_20(%arg0: i32) -> (i32, i32, i32) {
    %c0_i32 = arith.constant 0 : i32
    %c0_i32_0 = arith.constant 0 : i32
    %c0_i32_1 = arith.constant 0 : i32
    return %arg0, %c0_i32, %c0_i32_0 : i32, i32, i32
  }
}

</mosaic_0001>

<bundles_post_ra>
// kernel: tpu_custom_call.1
= control target key start
LH: loop header
LB: loop body
LE: loop exit
PB: predicated region body
PF: predicated region fallthrough
CT: control target
= control target key end

     0   :  { %s10373_s0 = inlined_call_operand.hbm [shape: f32[2,8,32], index: 0, kind: input, shape index: {}]   ;;  %s10374_s1 = inlined_call_operand.hbm [shape: f32[2,1,32], index: 1, kind: input, shape index: {}]   ;;  %s10375_s2 = inlined_call_operand.hbm [shape: f32[2,1,32], index: 2, kind: input, shape index: {}]   ;;  %s10376_s3 = inlined_call_operand.vmem [shape: bf16[2,4,32,16], index: 3, kind: input, shape index: {}]   ;;  %s10377_s4 = inlined_call_operand.vmem [shape: bf16[2,4,32,16], index: 4, kind: input, shape index: {}]   ;;  %s10378_s5 = inlined_call_operand.vmem [shape: bf16[2,4,32,16], index: 5, kind: input, shape index: {}]   ;;  %s10379_s6 = inlined_call_operand.vmem [shape: bf16[2,4,16,32], index: 6, kind: input, shape index: {}]   ;;  %s10380_s7 = inlined_call_operand.hbm [shape: f32[2,1,32], index: 7, kind: input, shape index: {}]   ;;  %s10381_s8 = inlined_call_operand.hbm [shape: f32[2,1,32], index: 8, kind: input, shape index: {}]   ;;  %s10382_s9 = inlined_call_operand.hbm [shape: f32[2,1,32], index: 9, kind: input, shape index: {}]   ;;  %s10383_s10 = inlined_call_operand.vmem [shape: bf16[2,32,128], index: 10, kind: input, shape index: {}]   ;;  %s10384_s11 = inlined_call_operand.hbm [shape: f32[2,1,128], index: 11, kind: input, shape index: {}]   ;;  %s10385_s12 = inlined_call_operand.vmem [shape: bf16[2,32,128], index: 12, kind: input, shape index: {}]   ;;  %s10386_s13 = inlined_call_operand.hbm [shape: f32[2,1,128], index: 13, kind: input, shape index: {}]   ;;  %s10387_s14 = inlined_call_operand.vmem [shape: bf16[2,128,32], index: 14, kind: input, shape index: {}]   ;;  %s10388_s15 = inlined_call_operand.hbm [shape: f32[2,1,32], index: 15, kind: input, shape index: {}]   ;;  %s10389_s16 = inlined_call_operand.hbm [shape: bf16[8,32,160], index: 16, kind: input, shape index: {}]   ;;  %s10390_s17 = inlined_call_operand.hbm [shape: f32[8,1,160], index: 17, kind: input, shape index: {}]   ;;  %s10391_s18 = inlined_call_operand.vmem [shape: bf16[8,160,128], index: 18, kind: input, shape index: {}]   ;;  %s10392_s19 = inlined_call_operand.hbm [shape: f32[8,1,128], index: 19, kind: input, shape index: {}]   ;;  %s10393_s20 = inlined_call_operand.hbm [shape: f32[2,8,128], index: 20, kind: output, shape index: {}]  }
   0x1   :  { %10396 = sst [smem:[#allocation31_spill]] %s10373_s0 }
   0x2   :  { %10397 = sst [smem:[#allocation32_spill]] %s10374_s1 }
   0x3   :  { %10398 = sst [smem:[#allocation33_spill]] %s10375_s2 }
   0x4   :  { %10399 = sst [smem:[#allocation34_spill]] %s10376_s3 }
   0x5   :  { %10400 = sst [smem:[#allocation35_spill]] %s10377_s4 }
   0x6   :  { %25 = vsyncpa [#allocation3], 0 }
   0x7   :  { %26 = vsyncpa [#allocation6], 0 }
   0x8   :  { %27 = vsyncpa [#allocation9], 0 }
   0x9   :  { %28 = vsyncpa [#allocation12], 0 }
   0xa   :  { %29 = vsyncpa [#allocation15], 0 }
   0xb   :  { %30 = vsyncpa [#allocation18], 0 }
   0xc   :  { %31 = vsyncpa [#allocation21], 0 }
   0xd   :  { %32 = vsyncpa [#allocation4], 0  ;;  %s8929_s1 = smov [#allocation5]  }
   0xe   :  { %s50_s22 = sshll.u32 %s8929_s1, 4  ;;  %s51_s22 = int_to_ptr.vmem [resolvable:$true] %s50_s22 }
   0xf   :  { %s8661_s23 = scalar_lea.vmem %s51_s22, 32  ;;  %p8666_p1 = scmp.lt.s32.totalorder %s51_s22, %s51_s22 }
  0x10   :  { %p8662_p0 = scmp.ne.s32.totalorder %s51_s22, %s8661_s23  ;;  %p8667_p2 = scmp.lt.s32.totalorder %s8661_s23, %s8661_s23 }
  0x12   :  { %p8668_p3 = por %p8667_p2, %p8666_p1 }
  0x14   :  { %p8669_p4 = pnand %p8668_p3, %p8662_p0 }
  0x16   :  { %8672 = shalt.err (!%p8669_p4)
}
  0x17   :  { %s8930_s24 = smov 16   ;;  %s8931_s2 = smov 1  }
  0x18   :  { %s10401_s26 = sld [smem:[#allocation32_spill]]  ;;  %s8932_s27 = smov [#allocation8]  }
  0x19   :  { %s82_s28 = sshll.u32 %s8932_s27, 4  ;;  %s8933_s4 = smov [#allocation11]   ;;  %s83_s28 = int_to_ptr.vmem [resolvable:$true] %s82_s28 }
  0x1a   :  { %s106_s29 = sshll.u32 %s8933_s4, 4  ;;  %s8681_s30 = scalar_lea.vmem %s83_s28, 32  ;;  %s107_s29 = int_to_ptr.vmem [resolvable:$true] %s106_s29 }
  0x1b   :  { %p8682_p5 = scmp.ne.s32.totalorder %s83_s28, %s8681_s30  ;;  %p8686_p6 = scmp.lt.s32.totalorder %s83_s28, %s83_s28 }
  0x1c   :  { %p8687_p7 = scmp.lt.s32.totalorder %s8681_s30, %s8681_s30 }
  0x1e   :  { %56 = dma.hbm_to_vmem [thread:$0]  %s10401_s26, 32, %s51_s22, [#allocation6], %s8930_s24, %s8930_s24, %s8931_s2  }
  0x1f   :  { %p8688_p8 = por %p8687_p7, %p8686_p6 }
  0x21   :  { %p8689_p9 = pnand %p8688_p8, %p8682_p5 }
  0x23   :  { %8692 = shalt.err (!%p8689_p9)
}
  0x24   :  { %88 = dma.hbm_to_vmem [thread:$0]  %s10380_s7, 32, %s83_s28, [#allocation9], %s8930_s24, %s8930_s24, %s8931_s2  }
  0x25   :  { %s8701_s1 = scalar_lea.vmem %s107_s29, 32  ;;  %p8706_p11 = scmp.lt.s32.totalorder %s107_s29, %s107_s29 }
  0x26   :  { %p8702_p10 = scmp.ne.s32.totalorder %s107_s29, %s8701_s1  ;;  %p8707_p12 = scmp.lt.s32.totalorder %s8701_s1, %s8701_s1 }
  0x28   :  { %p8708_p13 = por %p8707_p12, %p8706_p11 }
  0x2a   :  { %p8709_p0 = pnand %p8708_p13, %p8702_p10 }
  0x2c   :  { %8712 = shalt.err (!%p8709_p0)
}
  0x2d   :  { %112 = dma.hbm_to_vmem [thread:$0]  %s10382_s9, 32, %s107_s29, [#allocation12], %s8930_s24, %s8930_s24, %s8931_s2  }
  0x2e   :  { %s8934_s25 = smov [#allocation14]  }
  0x2f   :  { %s134_s3 = sshll.u32 %s8934_s25, 4  ;;  %s135_s3 = int_to_ptr.vmem [resolvable:$true] %s134_s3 }
  0x30   :  { %s8721_s26 = scalar_lea.vmem %s135_s3, 32  ;;  %p8726_p2 = scmp.lt.s32.totalorder %s135_s3, %s135_s3 }
  0x31   :  { %p8722_p1 = scmp.ne.s32.totalorder %s135_s3, %s8721_s26  ;;  %p8727_p3 = scmp.lt.s32.totalorder %s8721_s26, %s8721_s26 }
  0x33   :  { %p8728_p4 = por %p8727_p3, %p8726_p2 }
  0x35   :  { %p8729_p5 = pnand %p8728_p4, %p8722_p1 }
  0x37   :  { %8732 = shalt.err (!%p8729_p5)
}
  0x38   :  { %140 = dma.hbm_to_vmem [thread:$0]  %s10386_s13, 32, %s135_s3, [#allocation15], %s8930_s24, %s8930_s24, %s8931_s2  }
  0x39   :  { %s8935_s28 = smov [#allocation17]   ;;  %s8936_s9 = smov [#allocation2]  }
  0x3a   :  { %s160_s4 = sshll.u32 %s8935_s28, 4  ;;  %s38_s29 = sshll.u32 %s8936_s9, 4  ;;  %s161_s4 = int_to_ptr.vmem [resolvable:$true] %s160_s4  ;;  %s39_s29 = int_to_ptr.vmem [resolvable:$true] %s38_s29 }
  0x3b   :  { %s8741_s30 = scalar_lea.vmem %s161_s4, 4096  ;;  %p8746_p7 = scmp.lt.s32.totalorder %s161_s4, %s161_s4 }
  0x3c   :  { %p8742_p6 = scmp.ne.s32.totalorder %s161_s4, %s8741_s30  ;;  %p8747_p8 = scmp.lt.s32.totalorder %s8741_s30, %s8741_s30 }
  0x3e   :  { %p8748_p9 = por %p8747_p8, %p8746_p7 }
  0x40   :  { %p8749_p10 = pnand %p8748_p9, %p8742_p6 }
  0x42   :  { %8752 = shalt.err (!%p8749_p10)
}
  0x43   :  { %s8937_s0 = smov 128   ;;  %s8938_s21 = smov 8  }
  0x44   :  { %166 = dma.hbm_to_vmem [thread:$0]  %s10389_s16, 4096, %s161_s4, [#allocation18], %s8937_s0, %s8937_s0, %s8938_s21  }
  0x45   :  { %s8761_s22 = scalar_lea.vmem %s39_s29, 256  ;;  %p8766_p12 = scmp.lt.s32.totalorder %s39_s29, %s39_s29 }
  0x46   :  { %p8762_p11 = scmp.ne.s32.totalorder %s39_s29, %s8761_s22  ;;  %p8767_p13 = scmp.lt.s32.totalorder %s8761_s22, %s8761_s22 }
  0x48   :  { %p8768_p0 = por %p8767_p13, %p8766_p12 }
  0x4a   :  { %p8769_p1 = pnand %p8768_p0, %p8762_p11 }
  0x4c   :  { %8772 = shalt.err (!%p8769_p1)
}
  0x4d   :  { %s10402_s3 = sld [smem:[#allocation31_spill]]  ;;  %s8939_s26 = smov [#allocation7]  }
  0x4e   :  { %s62_s7 = sshll.u32 %s8939_s26, 4  ;;  %s8940_s27 = smov [#allocation10]   ;;  %s63_s7 = int_to_ptr.vmem [resolvable:$true] %s62_s7 }
  0x4f   :  { %s94_s28 = sshll.u32 %s8940_s27, 4  ;;  %s8781_s16 = scalar_lea.vmem %s63_s7, 32  ;;  %s95_s28 = int_to_ptr.vmem [resolvable:$true] %s94_s28 }
  0x50   :  { %p8782_p2 = scmp.ne.s32.totalorder %s63_s7, %s8781_s16  ;;  %p8786_p3 = scmp.lt.s32.totalorder %s63_s7, %s63_s7 }
  0x51   :  { %p8787_p4 = scmp.lt.s32.totalorder %s8781_s16, %s8781_s16 }
  0x53   :  { %44 = dma.hbm_to_vmem [thread:$0]  %s10402_s3, 256, %s39_s29, [#allocation3], %s8937_s0, %s8937_s0, %s8938_s21  }
  0x54   :  { %p8788_p5 = por %p8787_p4, %p8786_p3 }
  0x56   :  { %p8789_p6 = pnand %p8788_p5, %p8782_p2 }
  0x58   :  { %8792 = shalt.err (!%p8789_p6)
}
  0x59   :  { %s10403_s30 = sld [smem:[#allocation33_spill]]  ;;  %s8801_s29 = scalar_lea.vmem %s95_s28, 32 }
  0x5a   :  { %p8802_p7 = scmp.ne.s32.totalorder %s95_s28, %s8801_s29  ;;  %p8806_p8 = scmp.lt.s32.totalorder %s95_s28, %s95_s28 }
  0x5b   :  { %p8807_p9 = scmp.lt.s32.totalorder %s8801_s29, %s8801_s29 }
  0x5d   :  { %p8808_p10 = por %p8807_p9, %p8806_p8 }
  0x5f   :  { %68 = dma.hbm_to_vmem [thread:$0]  %s10403_s30, 32, %s63_s7, [#allocation6], %s8930_s24, %s8930_s24, %s8931_s2  }
  0x60   :  { %p8809_p11 = pnand %p8808_p10, %p8802_p7 }
  0x62   :  { %8812 = shalt.err (!%p8809_p11)
}
  0x63   :  { %100 = dma.hbm_to_vmem [thread:$0]  %s10381_s8, 32, %s95_s28, [#allocation9], %s8930_s24, %s8930_s24, %s8931_s2  }
  0x64   :  { %s8941_s22 = smov [#allocation13]   ;;  %s8942_s25 = smov [#allocation16]  }
  0x65   :  { %s120_s23 = sshll.u32 %s8941_s22, 4  ;;  %s148_s3 = sshll.u32 %s8942_s25, 4  ;;  %s121_s23 = int_to_ptr.vmem [resolvable:$true] %s120_s23  ;;  %s149_s3 = int_to_ptr.vmem [resolvable:$true] %s148_s3 }
  0x66   :  { %s8821_s26 = scalar_lea.vmem %s121_s23, 32  ;;  %p8826_p13 = scmp.lt.s32.totalorder %s121_s23, %s121_s23 }
  0x67   :  { %p8822_p12 = scmp.ne.s32.totalorder %s121_s23, %s8821_s26  ;;  %p8827_p0 = scmp.lt.s32.totalorder %s8821_s26, %s8821_s26 }
  0x69   :  { %p8828_p1 = por %p8827_p0, %p8826_p13 }
  0x6b   :  { %p8829_p2 = pnand %p8828_p1, %p8822_p12 }
  0x6d   :  { %8832 = shalt.err (!%p8829_p2)
}
  0x6e   :  { %126 = dma.hbm_to_vmem [thread:$0]  %s10384_s11, 32, %s121_s23, [#allocation12], %s8930_s24, %s8930_s24, %s8931_s2  }
  0x6f   :  { %s8841_s8 = scalar_lea.vmem %s149_s3, 32  ;;  %p8846_p4 = scmp.lt.s32.totalorder %s149_s3, %s149_s3 }
  0x70   :  { %p8842_p3 = scmp.ne.s32.totalorder %s149_s3, %s8841_s8  ;;  %p8847_p5 = scmp.lt.s32.totalorder %s8841_s8, %s8841_s8 }
  0x72   :  { %p8848_p6 = por %p8847_p5, %p8846_p4 }
  0x74   :  { %p8849_p7 = pnand %p8848_p6, %p8842_p3 }
  0x76   :  { %8852 = shalt.err (!%p8849_p7)
}
  0x77   :  { %154 = dma.hbm_to_vmem [thread:$0]  %s10388_s15, 32, %s149_s3, [#allocation15], %s8930_s24, %s8930_s24, %s8931_s2  }
  0x78   :  { %s8943_s4 = smov [#allocation19]  }
  0x79   :  { %s172_s9 = sshll.u32 %s8943_s4, 4  ;;  %s173_s9 = int_to_ptr.vmem [resolvable:$true] %s172_s9 }
  0x7a   :  { %s8861_s30 = scalar_lea.vmem %s173_s9, 256  ;;  %p8866_p9 = scmp.lt.s32.totalorder %s173_s9, %s173_s9 }
  0x7b   :  { %p8862_p8 = scmp.ne.s32.totalorder %s173_s9, %s8861_s30  ;;  %p8867_p10 = scmp.lt.s32.totalorder %s8861_s30, %s8861_s30 }
  0x7d   :  { %p8868_p11 = por %p8867_p10, %p8866_p9 }
  0x7f   :  { %p8869_p12 = pnand %p8868_p11, %p8862_p8 }
  0x81   :  { %8872 = shalt.err (!%p8869_p12)
}
  0x82   :  { %s8944_s11 = smov 32   ;;  %s8945_s29 = smov 2  }
  0x83   :  { %178 = dma.hbm_to_vmem [thread:$0]  %s10390_s17, 256, %s173_s9, [#allocation18], %s8944_s11, %s8944_s11, %s8945_s29  }
  0x84   :  { %s8946_s22 = smov [#allocation20]  }
  0x85   :  { %s186_s23 = sshll.u32 %s8946_s22, 4  ;;  %s187_s23 = int_to_ptr.vmem [resolvable:$true] %s186_s23 }
  0x86   :  { %s8881_s15 = scalar_lea.vmem %s187_s23, 128  ;;  %p8886_p0 = scmp.lt.s32.totalorder %s187_s23, %s187_s23 }
  0x87   :  { %p8882_p13 = scmp.ne.s32.totalorder %s187_s23, %s8881_s15  ;;  %p8887_p1 = scmp.lt.s32.totalorder %s8881_s15, %s8881_s15 }
  0x89   :  { %p8888_p2 = por %p8887_p1, %p8886_p0 }
  0x8b   :  { %p8889_p3 = pnand %p8888_p2, %p8882_p13 }
  0x8d   :  { %8892 = shalt.err (!%p8889_p3)
}
  0x8e   :  { %192 = dma.hbm_to_vmem [thread:$0]  %s10392_s19, 128, %s187_s23, [#allocation21], %s8930_s24, %s8930_s24, %s8931_s2  }
  0x8f   :  { %8913 = dma.done.wait [#allocation3], 256  }
  0x90   :  { %8914 = vsyncadd [#allocation3], 4294967040 }
  0x91   :  { %8915 = dma.done.wait [#allocation6], 64  }
  0x92   :  { %8916 = vsyncadd [#allocation6], 4294967232 }
  0x93   :  { %8917 = dma.done.wait [#allocation9], 64  }
  0x94   :  { %8918 = vsyncadd [#allocation9], 4294967232 }
  0x95   :  { %8919 = dma.done.wait [#allocation12], 64  }
  0x96   :  { %8920 = vsyncadd [#allocation12], 4294967232 }
  0x97   :  { %8921 = dma.done.wait [#allocation15], 64  }
  0x98   :  { %8922 = vsyncadd [#allocation15], 4294967232 }
  0x99   :  { %8923 = dma.done.wait [#allocation18], 4352  }
  0x9a   :  { %8924 = vsyncadd [#allocation18], 4294962944 }
  0x9b   :  { %8925 = dma.done.wait [#allocation21], 128  }
  0x9c   :  { %8926 = vsyncadd [#allocation21], 4294967168  ;;  %vm234_vm0 = vcmask 261120   ;;  %v230_v0 = vld [vmem:[#allocation2] sm:$0xff]  ;;  %v231_v1 = vld [vmem:[#allocation2 + $0x8] sm:$0xff]  ;;  %s10404_s24 = sld [smem:[#allocation34_spill]] }
  0x9d   :  { %v235_v2 = vsel %vm234_vm0, %v230_v0, 0.0  ;;  %v238_v3 = vsel %vm234_vm0, %v231_v1, 0.0  ;;  %v8947_v15 = vmov 0.0   ;;  %vm8948_vm1 = vmmov 0   ;;  %v7086_v25 = vld [vmem:[#allocation5] ss:$0 sm:$0xff] }
  0x9e   :  { %236 = vadd.xlane.f32.xlu0 %v235_v2  ;;  %7830 = vmatprep.subr.bf16.mxu1 %v8947_v15  ;;  %v7087_v29 = vld [vmem:[#allocation7] ss:$0 sm:$0xff]  ;;  %s10405_s8 = sld [smem:[#allocation35_spill]]  ;;  %v8361_v36 = vld [vmem:[%s10378_s5 + $0x8] sm:$0xff]   ;;  %v8362_v37 = vld [vmem:[%s10378_s5] sm:$0xff]   ;;  %vm549_vm2 = vcmask 1043456  }
  0x9f   :  { %7860 = vmatprep.subr.bf16.mxu0 %v8947_v15  ;;  %7834 = vmatprep.mubr.msk.bf16.mxu1 %vm8948_vm1, %v8947_v15  ;;  %vm487_vm3 = vcmask 130048   ;;  %v8365_v62 = vld [vmem:[%s10378_s5 + $0x18] sm:$0xff]   ;;  %v8366_v63 = vld [vmem:[%s10378_s5 + $0x10] sm:$0xff]   ;;  %vm532_vm4 = vcmask 64512   ;;  %vm5031_vm5 = vcmask 1041409   ;;  %vm7041_vm6 = vcmask 1040384  }
  0xa0   :  { %7862 = vmatprep.mubr.msk.bf16.mxu0 %vm8948_vm1, %v8947_v15  ;;  %vm7044_vm7 = vcmask 1041408   ;;  %vm7047_vm8 = vcmask 1042432   ;;  %vm7052_vm9 = vcmask 1044480   ;;  %vm7055_vm10 = vcmask 1045504  }
  0xa1   :  { %vm7058_vm11 = vcmask 1046528  }
  0xa2   :  { %239 = vadd.xlane.f32.xlu0 %v238_v3  ;;  %v8357_v14 = vld [vmem:[%s10404_s24 + $0x8] sm:$0xff]   ;;  %v8358_v16 = vld [vmem:[%s10404_s24] sm:$0xff]   ;;  %v8363_v59 = vld [vmem:[%s10404_s24 + $0x18] sm:$0xff]  }
  0xa3   :  { %7831 = vmatpush3.bf16.msra.mxu1 %v8357_v14  ;;  %v8364_v61 = vld [vmem:[%s10404_s24 + $0x10] sm:$0xff]  }
  0xa4   :  { %7832 = vmatprep.subr.bf16.mxu1 %v8947_v15  ;;  %v8359_v33 = vld [vmem:[%s10405_s8 + $0x8] sm:$0xff]   ;;  %v8360_v35 = vld [vmem:[%s10405_s8] sm:$0xff]  }
  0xa7   :  { %7833 = vmatpush3.bf16.msra.mxu1 %v8358_v16 }
  0xa8   :  { %7838 = vmatprep.subr.bf16.mxu1 %v8947_v15 }
 0x127   :  { %v237_v4 = vpop.xlane.xlu0 %236 }
 0x128   :  { %v242_v5 = vmul.f32 0.03125, %v237_v4 }
 0x12a   :  { %v244_v6 = vsub.f32 %v230_v0, %v242_v5 }
 0x12b   :  { %v240_v7 = vpop.xlane.xlu0 %239 }
 0x12c   :  { %v243_v8 = vmul.f32 0.03125, %v240_v7  ;;  %v246_v9 = vmul.f32 %v244_v6, %v244_v6 }
 0x12e   :  { %v245_v10 = vsub.f32 %v231_v1, %v243_v8  ;;  %v248_v11 = vsel %vm234_vm0, %v246_v9, 0.0 }
 0x12f   :  { %249 = vadd.xlane.f32.xlu1 %v248_v11 }
 0x130   :  { %v247_v12 = vmul.f32 %v245_v10, %v245_v10 }
 0x132   :  { %v251_v13 = vsel %vm234_vm0, %v247_v12, 0.0 }
 0x133   :  { %252 = vadd.xlane.f32.xlu1 %v251_v13 }
 0x1b8   :  { %v250_v17 = vpop.xlane.xlu1 %249 }
 0x1b9   :  { %v254_v18 = vmul.f32 0.03125, %v250_v17 }
 0x1bb   :  { %v256_v19 = vadd.f32 1e-05, %v254_v18 }
 0x1bc   :  { %v253_v20 = vpop.xlane.xlu1 %252 }
 0x1bd   :  { %8565 = vrsqrt.f32 %v256_v19  ;;  %v255_v21 = vmul.f32 0.03125, %v253_v20 }
 0x1bf   :  { %v257_v22 = vadd.f32 1e-05, %v255_v21 }
 0x1c1   :  { %8567 = vrsqrt.f32 %v257_v22 }
 0x1ca   :  { %v8566_v23 = vpop.eup %8565 }
 0x1cb   :  { %v260_v24 = vmul.f32 %v8566_v23, %v244_v6 }
 0x1cd   :  { %v268_v27 = vmul.f32 %v7086_v25, %v260_v24 }
 0x1ce   :  { %v8568_v26 = vpop.eup %8567 }
 0x1cf   :  { %v261_v28 = vmul.f32 %v8568_v26, %v245_v10  ;;  %v9144_v31 = vadd.f32 %v7087_v29, %v268_v27 }
 0x1d1   :  { %v269_v30 = vmul.f32 %v7086_v25, %v261_v28 }
 0x1d3   :  { %v9146_v32 = vadd.f32 %v7087_v29, %v269_v30 }
 0x1d5   :  { %v9153_v34 = vpack.c.bf16 %v9146_v32, %v9144_v31 }
 0x1d7   :  { %7835 = vmatmul.mubr.msk.bf16.vlgmr.msra.gmra.mxu1 %vm234_vm0, %v9153_v34 }
 0x1d8   :  { %7839 = vmatpush3.bf16.msra.mxu1 %v8359_v33  ;;  %7842 = vmatprep.mubr.msk.bf16.mxu1 %vm8948_vm1, %v8947_v15 }
 0x1d9   :  { %7840 = vmatprep.subr.bf16.mxu1 %v8947_v15 }
 0x1dc   :  { %7841 = vmatpush3.bf16.msra.mxu1 %v8360_v35 }
 0x1dd   :  { %7846 = vmatprep.subr.bf16.mxu1 %v8947_v15 }
 0x1df   :  { %7843 = vmatmul.mubr.msk.bf16.vlgmr.msra.gmra.mxu1 %vm234_vm0, %v9153_v34 }
 0x1e0   :  { %7847 = vmatpush3.bf16.msra.mxu1 %v8361_v36  ;;  %7850 = vmatprep.mubr.msk.bf16.mxu1 %vm8948_vm1, %v8947_v15 }
 0x1e1   :  { %7848 = vmatprep.subr.bf16.mxu1 %v8947_v15 }
 0x1e4   :  { %7849 = vmatpush3.bf16.msra.mxu1 %v8362_v37 }
 0x1e5   :  { %7854 = vmatprep.subr.bf16.mxu1 %v8947_v15 }
 0x1e7   :  { %7851 = vmatmul.mubr.msk.bf16.vlgmr.msra.gmra.mxu1 %vm234_vm0, %v9153_v34 }
 0x1e8   :  { %7856 = vmatprep.mubr.msk.bf16.mxu1 %vm8948_vm1, %v8947_v15 }
 0x297   :  { %v332_v38 = vpop.f32.mrf.mxu1 }
 0x298   :  { %v485_v56 = vpack.c.bf16 %v332_v38, %v332_v38 }
 0x299   :  { %v7836_v39 = vpop.f32.mrf.mxu1 }
 0x29b   :  { %v335_v40 = vpop.f32.mrf.mxu1 }
 0x29c   :  { %v625_v60 = vpack.c.bf16 %v335_v40, %v335_v40 }
 0x29d   :  { %v7837_v41 = vpop.f32.mrf.mxu1 }
 0x29f   :  { %v389_v42 = vpop.f32.mrf.mxu1 }
 0x2a0   :  { %453 = vxpose.xlu0.b32.start.end [1/1] (short) (narrow) %v389_v42, 16 }
 0x2a1   :  { %v7844_v43 = vpop.f32.mrf.mxu1 }
 0x2a3   :  { %v392_v44 = vpop.f32.mrf.mxu1 }
 0x2a4   :  { %593 = vxpose.xlu1.b32.start.end [1/1] (short) (narrow) %v392_v44, 16 }
 0x2a5   :  { %v7845_v45 = vpop.f32.mrf.mxu1 }
 0x2a6   :  { %v8367_v45 = vld [vmem:[%s10405_s8 + $0x18] sm:$0xff]  }
 0x2a7   :  { %v446_v46 = vpop.f32.mrf.mxu1 }
 0x2a8   :  { %v545_v47 = vpack.c.bf16 %v446_v46, %v446_v46 }
 0x2a9   :  { %v7852_v48 = vpop.f32.mrf.mxu1 }
 0x2aa   :  { %v551_v49 = vsel %vm549_vm2, %v545_v47, 0  ;;  %v8368_v47 = vld [vmem:[%s10405_s8 + $0x10] sm:$0xff]  }
 0x2ab   :  { %v9181_v50 = vpop.f32.mrf.mxu1  ;;  %7861 = vmatpush3.bf16.msra.mxu0 %v551_v49 }
 0x2ac   :  { %7872 = vmatprep.subr.bf16.mxu0 %v8947_v15  ;;  %v683_v39 = vpack.c.bf16 %v9181_v50, %v9181_v50 }
 0x2ad   :  { %v7853_v51 = vpop.f32.mrf.mxu1 }
 0x2ae   :  { %v688_v42 = vsel %vm549_vm2, %v683_v39, 0 }
 0x31c   :  { %v469_v52 = vpop.trf.xlu0 }
 0x320   :  { %v470_v53 = vpop.trf.xlu0  ;;  %v609_v54 = vpop.trf.xlu1 }
 0x321   :  { %v486_v55 = vpack.c.bf16 %v470_v53, %v469_v52 }
 0x323   :  { %7855 = vmatpush3.bf16.msra.mxu1 %v486_v55 }
 0x324   :  { %v610_v57 = vpop.trf.xlu1  ;;  %7866 = vmatprep.subr.bf16.mxu1 %v8947_v15 }
 0x325   :  { %v626_v58 = vpack.c.bf16 %v610_v57, %v609_v54 }
 0x326   :  { %7857 = vmatmul.mubr.msk.bf16.vlgmr.msra.gmra.mxu1 %vm487_vm3, %v485_v56 }
 0x327   :  { %7867 = vmatpush3.bf16.msra.mxu1 %v626_v58  ;;  %7868 = vmatprep.mubr.msk.bf16.mxu1 %vm8948_vm1, %v8947_v15 }
 0x328   :  { %7878 = vmatprep.subr.bf16.mxu1 %v8947_v15 }
 0x32e   :  { %7869 = vmatmul.mubr.msk.bf16.vlgmr.msra.gmra.mxu1 %vm487_vm3, %v625_v60 }
 0x32f   :  { %7879 = vmatpush3.bf16.msra.mxu1 %v8363_v59  ;;  %7882 = vmatprep.mubr.msk.bf16.mxu1 %vm8948_vm1, %v8947_v15 }
 0x330   :  { %7880 = vmatprep.subr.bf16.mxu1 %v8947_v15 }
 0x333   :  { %7881 = vmatpush3.bf16.msra.mxu1 %v8364_v61 }
 0x334   :  { %7894 = vmatprep.subr.bf16.mxu1 %v8947_v15 }
 0x336   :  { %7883 = vmatmul.mubr.msk.bf16.vlgmr.msra.gmra.mxu1 %vm234_vm0, %v9153_v34 }
 0x337   :  { %7895 = vmatpush3.bf16.msra.mxu1 %v8365_v62  ;;  %7898 = vmatprep.mubr.msk.bf16.mxu1 %vm8948_vm1, %v8947_v15 }
 0x338   :  { %7896 = vmatprep.subr.bf16.mxu1 %v8947_v15 }
 0x33b   :  { %7897 = vmatpush3.bf16.msra.mxu1 %v8366_v63 }
 0x33c   :  { %7908 = vmatprep.subr.bf16.mxu1 %v8947_v15 }
 0x33e   :  { %7899 = vmatmul.mubr.msk.bf16.vlgmr.msra.gmra.mxu1 %vm234_vm0, %v9153_v34 }
 0x33f   :  { %7910 = vmatprep.mubr.msk.bf16.mxu1 %vm8948_vm1, %v8947_v15 }
 0x3e6   :  { %v525_v0 = vpop.f32.mrf.mxu1 }
 0x3e7   :  { %v531_v1 = vmul.f32 0.25, %v525_v0 }
 0x3e8   :  { %v7858_v2 = vpop.f32.mrf.mxu1 }
 0x3e9   :  { %v533_v3 = vsel %vm532_vm4, %v531_v1, -inf }
 0x3ea   :  { %534 = vmax.xlane.f32.xlu0 %v533_v3  ;;  %v528_v4 = vpop.f32.mrf.mxu1 }
 0x3ec   :  { %v7859_v5 = vpop.f32.mrf.mxu1 }
 0x3ee   :  { %v664_v6 = vpop.f32.mrf.mxu1 }
 0x3ef   :  { %v670_v7 = vmul.f32 0.25, %v664_v6 }
 0x3f0   :  { %v7870_v8 = vpop.f32.mrf.mxu1 }
 0x3f1   :  { %v671_v9 = vsel %vm532_vm4, %v670_v7, -inf }
 0x3f2   :  { %672 = vmax.xlane.f32.xlu1 %v671_v9  ;;  %v667_v10 = vpop.f32.mrf.mxu1 }
 0x3f4   :  { %v7871_v11 = vpop.f32.mrf.mxu1 }
 0x3f6   :  { %v9218_v12 = vpop.f32.mrf.mxu1 }
 0x3f8   :  { %v7884_v13 = vpop.f32.mrf.mxu1 }
 0x3fa   :  { %v9220_v14 = vpop.f32.mrf.mxu1 }
 0x3fb   :  { %v1076_v4 = vpack.c.bf16 %v9220_v14, %v9220_v14 }
 0x3fc   :  { %v7885_v16 = vpop.f32.mrf.mxu1 }
 0x3fe   :  { %v900_v17 = vpop.f32.mrf.mxu1 }
 0x3ff   :  { %v997_v18 = vpack.c.bf16 %v900_v17, %v900_v17 }
 0x400   :  { %v7900_v19 = vpop.f32.mrf.mxu1 }
 0x401   :  { %v1002_v20 = vsel %vm549_vm2, %v997_v18, 0 }
 0x402   :  { %v9223_v21 = vpop.f32.mrf.mxu1  ;;  %7909 = vmatpush3.bf16.msra.mxu1 %v1002_v20 }
 0x403   :  { %7920 = vmatprep.subr.bf16.mxu1 %v8947_v15 }
 0x404   :  { %v7901_v22 = vpop.f32.mrf.mxu1 }
 0x473   :  { %v535_v23 = vpop.xlane.xlu0 %534 }
 0x474   :  { %v536_v24 = vsub.f32 %v531_v1, %v535_v23  ;;  %v939_v1 = vpack.c.bf16 %v9218_v12, %v9218_v12 }
 0x476   :  { %v537_v25 = vmul.f32 1.442695, %v536_v24 }
 0x478   :  { %8569 = vpow2.f32 %v537_v25 }
 0x47b   :  { %v673_v26 = vpop.xlane.xlu1 %672 }
 0x47c   :  { %v674_v27 = vsub.f32 %v670_v7, %v673_v26 }
 0x47e   :  { %v675_v28 = vmul.f32 1.442695, %v674_v27 }
 0x480   :  { %8571 = vpow2.f32 %v675_v28 }
 0x485   :  { %v8570_v29 = vpop.eup %8569 }
 0x486   :  { %v539_v30 = vsel %vm532_vm4, %v8570_v29, 0.0 }
 0x487   :  { %540 = vadd.xlane.f32.xlu0 %v539_v30 }
 0x48d   :  { %v8572_v33 = vpop.eup %8571 }
 0x48e   :  { %v677_v35 = vsel %vm532_vm4, %v8572_v33, 0.0 }
 0x48f   :  { %678 = vadd.xlane.f32.xlu1 %v677_v35  ;;  %v1134_v35 = vpack.c.bf16 %v9223_v21, %v9223_v21  ;;  %v8370_v21 = vld [vmem:[%s10405_s8 + $0x28] sm:$0xff]  }
 0x510   :  { %v541_v36 = vpop.xlane.xlu0 %540 }
 0x511   :  { %8573 = vrcp.f32 %v541_v36 }
 0x518   :  { %v679_v37 = vpop.xlane.xlu1 %678 }
 0x519   :  { %8575 = vrcp.f32 %v679_v37 }
 0x51e   :  { %v8574_v38 = vpop.eup %8573 }
 0x51f   :  { %v543_v40 = vmul.f32 %v8574_v38, %v8570_v29  ;;  %v1139_v38 = vsel %vm549_vm2, %v1134_v35, 0 }
 0x521   :  { %v544_v41 = vpack.c.bf16 %v543_v40, %v543_v40 }
 0x523   :  { %7863 = vmatmul.mubr.msk.bf16.vlgmr.msra.gmra.mxu0 %vm532_vm4, %v544_v41  ;;  %v8369_v41 = vld [vmem:[%s10379_s6] sm:$0xff]  }
 0x524   :  { %7873 = vmatpush3.bf16.msra.mxu0 %v688_v42  ;;  %7874 = vmatprep.mubr.msk.bf16.mxu0 %vm8948_vm1, %v8947_v15 }
 0x525   :  { %7886 = vmatprep.subr.bf16.mxu0 %v8947_v15 }
 0x526   :  { %v8576_v43 = vpop.eup %8575 }
 0x527   :  { %v681_v44 = vmul.f32 %v8576_v43, %v8572_v33  ;;  %v8371_v43 = vld [vmem:[%s10405_s8 + $0x20] sm:$0xff]  }
 0x529   :  { %v682_v46 = vpack.c.bf16 %v681_v44, %v681_v44  ;;  %v8372_v44 = vld [vmem:[%s10379_s6 + $0x8] sm:$0xff]  }
 0x52b   :  { %7875 = vmatmul.mubr.msk.bf16.vlgmr.msra.gmra.mxu0 %vm532_vm4, %v682_v46 }
 0x52c   :  { %7887 = vmatpush3.bf16.msra.mxu0 %v8367_v45  ;;  %7890 = vmatprep.mubr.msk.bf16.mxu0 %vm8948_vm1, %v8947_v15 }
 0x52d   :  { %7888 = vmatprep.subr.bf16.mxu0 %v8947_v15 }
 0x530   :  { %7889 = vmatpush3.bf16.msra.mxu0 %v8368_v47 }
 0x531   :  { %7902 = vmatprep.subr.bf16.mxu0 %v8947_v15 }
 0x533   :  { %7891 = vmatmul.mubr.msk.bf16.vlgmr.msra.gmra.mxu0 %vm234_vm0, %v9153_v34 }
 0x534   :  { %7904 = vmatprep.mubr.msk.bf16.mxu0 %vm8948_vm1, %v8947_v15 }
 0x5e3   :  { %v9250_v48 = vpop.f32.mrf.mxu0 }
 0x5e5   :  { %v7864_v49 = vpop.f32.mrf.mxu0 }
 0x5e7   :  { %v590_v50 = vpop.f32.mrf.mxu0 }
 0x5e8   :  { %v8373_v50 = vld [vmem:[%s10404_s24 + $0x28] sm:$0xff]  }
 0x5e9   :  { %v7865_v51 = vpop.f32.mrf.mxu0 }
 0x5eb   :  { %v9252_v52 = vpop.f32.mrf.mxu0 }
 0x5ec   :  { %v732_v53 = vpack.c.bf16 %v9252_v52, %v9250_v48 }
 0x5ed   :  { %v7876_v54 = vpop.f32.mrf.mxu0 }
 0x5ee   :  { %v8374_v54 = vld [vmem:[%s10404_s24 + $0x20] sm:$0xff]  }
 0x5ef   :  { %v727_v55 = vpop.f32.mrf.mxu0 }
 0x5f1   :  { %v7877_v56 = vpop.f32.mrf.mxu0 }
 0x5f3   :  { %v842_v57 = vpop.f32.mrf.mxu0 }
 0x5f4   :  { %907 = vxpose.xlu0.b32.start.end [1/1] (short) (narrow) %v842_v57, 16  ;;  %v8375_v57 = vld [vmem:[%s10378_s5 + $0x28] sm:$0xff]  }
 0x5f5   :  { %v7892_v58 = vpop.f32.mrf.mxu0 }
 0x5f7   :  { %v845_v59 = vpop.f32.mrf.mxu0 }
 0x5f8   :  { %1044 = vxpose.xlu1.b32.start.end [1/1] (short) (narrow) %v845_v59, 16 }
 0x5f9   :  { %v7893_v60 = vpop.f32.mrf.mxu0 }
 0x5fa   :  { %v8376_v60 = vld [vmem:[%s10378_s5 + $0x20] sm:$0xff]  }
 0x670   :  { %v923_v61 = vpop.trf.xlu0 }
 0x674   :  { %v924_v62 = vpop.trf.xlu0  ;;  %v1060_v63 = vpop.trf.xlu1 }
 0x675   :  { %v940_v0 = vpack.c.bf16 %v924_v62, %v923_v61 }
 0x677   :  { %7903 = vmatpush3.bf16.msra.mxu0 %v940_v0 }
 0x678   :  { %v1061_v2 = vpop.trf.xlu1  ;;  %7914 = vmatprep.subr.bf16.mxu0 %v8947_v15 }
 0x679   :  { %v1077_v3 = vpack.c.bf16 %v1061_v2, %v1060_v63 }
 0x67a   :  { %7905 = vmatmul.mubr.msk.bf16.vlgmr.msra.gmra.mxu0 %vm487_vm3, %v939_v1 }
 0x67b   :  { %7915 = vmatpush3.bf16.msra.mxu0 %v1077_v3  ;;  %7916 = vmatprep.mubr.msk.bf16.mxu0 %vm8948_vm1, %v8947_v15 }
 0x67c   :  { %7926 = vmatprep.subr.bf16.mxu0 %v8947_v15 }
 0x682   :  { %7917 = vmatmul.mubr.msk.bf16.vlgmr.msra.gmra.mxu0 %vm487_vm3, %v1076_v4 }
 0x683   :  { %7928 = vmatprep.mubr.msk.bf16.mxu0 %vm8948_vm1, %v8947_v15  ;;  %7927 = vmatpush3.bf16.msra.mxu0 %v8372_v44 }
 0x684   :  { %7938 = vmatprep.subr.bf16.mxu0 %v8947_v15 }
 0x73a   :  { %v978_v5 = vpop.f32.mrf.mxu0 }
 0x73b   :  { %v984_v6 = vmul.f32 0.25, %v978_v5 }
 0x73c   :  { %v7906_v7 = vpop.f32.mrf.mxu0 }
 0x73d   :  { %v985_v8 = vsel %vm532_vm4, %v984_v6, -inf }
 0x73e   :  { %986 = vmax.xlane.f32.xlu0 %v985_v8  ;;  %v981_v9 = vpop.f32.mrf.mxu0 }
 0x740   :  { %v7907_v10 = vpop.f32.mrf.mxu0 }
 0x742   :  { %v1115_v11 = vpop.f32.mrf.mxu0 }
 0x743   :  { %v1121_v12 = vmul.f32 0.25, %v1115_v11 }
 0x744   :  { %v7918_v13 = vpop.f32.mrf.mxu0 }
 0x745   :  { %v1122_v16 = vsel %vm532_vm4, %v1121_v12, -inf }
 0x746   :  { %1123 = vmax.xlane.f32.xlu1 %v1122_v16  ;;  %v1118_v14 = vpop.f32.mrf.mxu0 }
 0x748   :  { %v7919_v17 = vpop.f32.mrf.mxu0 }
 0x7c7   :  { %v987_v18 = vpop.xlane.xlu0 %986 }
 0x7c8   :  { %v988_v19 = vsub.f32 %v984_v6, %v987_v18 }
 0x7ca   :  { %v989_v20 = vmul.f32 1.442695, %v988_v19 }
 0x7cc   :  { %8577 = vpow2.f32 %v989_v20 }
 0x7cf   :  { %v1124_v22 = vpop.xlane.xlu1 %1123 }
 0x7d0   :  { %v1125_v23 = vsub.f32 %v1121_v12, %v1124_v22 }
 0x7d2   :  { %v1126_v24 = vmul.f32 1.442695, %v1125_v23 }
 0x7d4   :  { %8579 = vpow2.f32 %v1126_v24 }
 0x7d9   :  { %v8578_v25 = vpop.eup %8577 }
 0x7da   :  { %v991_v26 = vsel %vm532_vm4, %v8578_v25, 0.0 }
 0x7db   :  { %992 = vadd.xlane.f32.xlu0 %v991_v26 }
 0x7e1   :  { %v8580_v27 = vpop.eup %8579 }
 0x7e2   :  { %v1128_v28 = vsel %vm532_vm4, %v8580_v27, 0.0 }
 0x7e3   :  { %1129 = vadd.xlane.f32.xlu1 %v1128_v28 }
 0x864   :  { %v993_v29 = vpop.xlane.xlu0 %992 }
 0x865   :  { %8581 = vrcp.f32 %v993_v29 }
 0x86c   :  { %v1130_v30 = vpop.xlane.xlu1 %1129 }
 0x86d   :  { %8583 = vrcp.f32 %v1130_v30 }
 0x872   :  { %v8582_v33 = vpop.eup %8581 }
 0x873   :  { %v995_v36 = vmul.f32 %v8582_v33, %v8578_v25 }
 0x875   :  { %v996_v37 = vpack.c.bf16 %v995_v36, %v995_v36 }
 0x877   :  { %7911 = vmatmul.mubr.msk.bf16.vlgmr.msra.gmra.mxu1 %vm532_vm4, %v996_v37 }
 0x878   :  { %7921 = vmatpush3.bf16.msra.mxu1 %v1139_v38  ;;  %7922 = vmatprep.mubr.msk.bf16.mxu1 %vm8948_vm1, %v8947_v15 }
 0x879   :  { %7932 = vmatprep.subr.bf16.mxu1 %v8947_v15 }
 0x87a   :  { %v8584_v39 = vpop.eup %8583 }
 0x87b   :  { %v1132_v40 = vmul.f32 %v8584_v39, %v8580_v27 }
 0x87d   :  { %v1133_v42 = vpack.c.bf16 %v1132_v40, %v1132_v40 }
 0x87f   :  { %7923 = vmatmul.mubr.msk.bf16.vlgmr.msra.gmra.mxu1 %vm532_vm4, %v1133_v42 }
 0x880   :  { %7933 = vmatpush3.bf16.msra.mxu1 %v8369_v41  ;;  %7934 = vmatprep.mubr.msk.bf16.mxu1 %vm8948_vm1, %v8947_v15 }
 0x881   :  { %7946 = vmatprep.subr.bf16.mxu1 %v8947_v15 }
 0x887   :  { %7935 = vmatmul.mubr.msk.bf16.vlgmr.msra.gmra.mxu1 %vm487_vm3, %v732_v53 }
 0x888   :  { %7947 = vmatpush3.bf16.msra.mxu1 %v8370_v21  ;;  %7950 = vmatprep.mubr.msk.bf16.mxu1 %vm8948_vm1, %v8947_v15 }
 0x889   :  { %7948 = vmatprep.subr.bf16.mxu1 %v8947_v15 }
 0x88c   :  { %7949 = vmatpush3.bf16.msra.mxu1 %v8371_v43 }
 0x88d   :  { %7962 = vmatprep.subr.bf16.mxu1 %v8947_v15 }
 0x88f   :  { %7951 = vmatmul.mubr.msk.bf16.vlgmr.msra.gmra.mxu1 %vm234_vm0, %v9153_v34 }
 0x890   :  { %7964 = vmatprep.mubr.msk.bf16.mxu1 %vm8948_vm1, %v8947_v15 }
 0x937   :  { %v1038_v45 = vpop.f32.mrf.mxu1 }
 0x939   :  { %v7912_v46 = vpop.f32.mrf.mxu1 }
 0x93b   :  { %v1041_v47 = vpop.f32.mrf.mxu1 }
 0x93d   :  { %v7913_v48 = vpop.f32.mrf.mxu1 }
 0x93f   :  { %v1175_v49 = vpop.f32.mrf.mxu1 }
 0x940   :  { %v1184_v51 = vpack.c.bf16 %v1175_v49, %v1038_v45 }
 0x941   :  { %v7924_v52 = vpop.f32.mrf.mxu1 }
 0x942   :  { %7929 = vmatmul.mubr.msk.bf16.vlgmr.msra.gmra.mxu0 %vm487_vm3, %v1184_v51 }
 0x943   :  { %v1178_v53 = vpop.f32.mrf.mxu1  ;;  %7939 = vmatpush3.bf16.msra.mxu0 %v8373_v50  ;;  %7942 = vmatprep.mubr.msk.bf16.mxu0 %vm8948_vm1, %v8947_v15 }
 0x944   :  { %7940 = vmatprep.subr.bf16.mxu0 %v8947_v15 }
 0x945   :  { %v7925_v55 = vpop.f32.mrf.mxu1 }
 0x947   :  { %v9318_v56 = vpop.f32.mrf.mxu1  ;;  %7941 = vmatpush3.bf16.msra.mxu0 %v8374_v54 }
 0x948   :  { %7954 = vmatprep.subr.bf16.mxu0 %v8947_v15 }
 0x949   :  { %v7936_v58 = vpop.f32.mrf.mxu1 }
 0x94a   :  { %7943 = vmatmul.mubr.msk.bf16.vlgmr.msra.gmra.mxu0 %vm234_vm0, %v9153_v34 }
 0x94b   :  { %v9326_v59 = vpop.f32.mrf.mxu1  ;;  %7955 = vmatpush3.bf16.msra.mxu0 %v8375_v57  ;;  %7958 = vmatprep.mubr.msk.bf16.mxu0 %vm8948_vm1, %v8947_v15 }
 0x94c   :  { %7956 = vmatprep.subr.bf16.mxu0 %v8947_v15 }
 0x94d   :  { %v7937_v61 = vpop.f32.mrf.mxu1 }
 0x94e   :  { %v8377_v61 = vld [vmem:[%s10404_s24 + $0x38] sm:$0xff]  }
 0x94f   :  { %v1394_v62 = vpop.f32.mrf.mxu1  ;;  %7957 = vmatpush3.bf16.msra.mxu0 %v8376_v60 }
 0x950   :  { %1459 = vxpose.xlu0.b32.start.end [1/1] (short) (narrow) %v1394_v62, 16  ;;  %7968 = vmatprep.subr.bf16.mxu0 %v8947_v15 }
 0x951   :  { %v7952_v63 = vpop.f32.mrf.mxu1 }
 0x952   :  { %7959 = vmatmul.mubr.msk.bf16.vlgmr.msra.gmra.mxu0 %vm234_vm0, %v9153_v34  ;;  %v8378_v63 = vld [vmem:[%s10404_s24 + $0x30] sm:$0xff]  }
 0x953   :  { %v1397_v0 = vpop.f32.mrf.mxu1  ;;  %7970 = vmatprep.mubr.msk.bf16.mxu0 %vm8948_vm1, %v8947_v15 }
 0x954   :  { %1596 = vxpose.xlu1.b32.start.end [1/1] (short) (narrow) %v1397_v0, 16  ;;  %v8379_v0 = vld [vmem:[%s10378_s5 + $0x38] sm:$0xff]  }
 0x955   :  { %v7953_v1 = vpop.f32.mrf.mxu1 }
 0x956   :  { %v8380_v1 = vld [vmem:[%s10378_s5 + $0x30] sm:$0xff]  }
 0x9cc   :  { %v1475_v2 = vpop.trf.xlu0 }
 0x9d0   :  { %v1476_v3 = vpop.trf.xlu0  ;;  %v1612_v5 = vpop.trf.xlu1 }
 0x9d1   :  { %v1492_v4 = vpack.c.bf16 %v1476_v3, %v1475_v2  ;;  %v8381_v2 = vld [vmem:[%s10379_s6 + $0x10] sm:$0xff]  }
 0x9d3   :  { %7963 = vmatpush3.bf16.msra.mxu1 %v1492_v4 }
 0x9d4   :  { %7974 = vmatprep.subr.bf16.mxu1 %v8947_v15  ;;  %v1613_v9 = vpop.trf.xlu1 }
 0x9d5   :  { %v1629_v12 = vpack.c.bf16 %v1613_v9, %v1612_v5 }
 0xa02   :  { %v9340_v6 = vpop.f32.mrf.mxu0 }
 0xa04   :  { %v7930_v7 = vpop.f32.mrf.mxu0 }
 0xa06   :  { %v9342_v8 = vpop.f32.mrf.mxu0 }
 0xa08   :  { %v7931_v10 = vpop.f32.mrf.mxu0 }
 0xa09   :  { %v8382_v10 = vld [vmem:[%s10405_s8 + $0x38] sm:$0xff]  }
 0xa0a   :  { %v1336_v11 = vpop.f32.mrf.mxu0 }
 0xa0b   :  { %v1491_v13 = vpack.c.bf16 %v1336_v11, %v1336_v11 }
 0xa0c   :  { %v7944_v16 = vpop.f32.mrf.mxu0 }
 0xa0d   :  { %7965 = vmatmul.mubr.msk.bf16.vlgmr.msra.gmra.mxu1 %vm487_vm3, %v1491_v13  ;;  %v8383_v16 = vld [vmem:[%s10405_s8 + $0x30] sm:$0xff]  }
 0xa0e   :  { %v1339_v14 = vpop.f32.mrf.mxu0  ;;  %7975 = vmatpush3.bf16.msra.mxu1 %v1629_v12  ;;  %7976 = vmatprep.mubr.msk.bf16.mxu1 %vm8948_vm1, %v8947_v15 }
 0xa0f   :  { %7986 = vmatprep.subr.bf16.mxu1 %v8947_v15  ;;  %v1628_v19 = vpack.c.bf16 %v1339_v14, %v1339_v14 }
 0xa10   :  { %v7945_v17 = vpop.f32.mrf.mxu0 }
 0xa12   :  { %v1452_v18 = vpop.f32.mrf.mxu0 }
 0xa13   :  { %v1549_v20 = vpack.c.bf16 %v1452_v18, %v1452_v18 }
 0xa14   :  { %v7960_v22 = vpop.f32.mrf.mxu0 }
 0xa15   :  { %v1554_v23 = vsel %vm549_vm2, %v1549_v20, 0  ;;  %7977 = vmatmul.mubr.msk.bf16.vlgmr.msra.gmra.mxu1 %vm487_vm3, %v1628_v19 }
 0xa16   :  { %v1455_v24 = vpop.f32.mrf.mxu0  ;;  %7969 = vmatpush3.bf16.msra.mxu0 %v1554_v23  ;;  %7988 = vmatprep.mubr.msk.bf16.mxu1 %vm8948_vm1, %v8947_v15 }
 0xa17   :  { %7980 = vmatprep.subr.bf16.mxu0 %v8947_v15  ;;  %v1686_v53 = vpack.c.bf16 %v1455_v24, %v1455_v24  ;;  %7987 = vmatpush3.bf16.msra.mxu1 %v8381_v2 }
 0xa18   :  { %v7961_v25 = vpop.f32.mrf.mxu0  ;;  %8000 = vmatprep.subr.bf16.mxu1 %v8947_v15 }
 0xa19   :  { %v1691_v57 = vsel %vm549_vm2, %v1686_v53, 0 }
 0xacd   :  { %v1530_v26 = vpop.f32.mrf.mxu1 }
 0xace   :  { %v1536_v27 = vmul.f32 0.25, %v1530_v26 }
 0xacf   :  { %v7966_v28 = vpop.f32.mrf.mxu1 }
 0xad0   :  { %v1537_v29 = vsel %vm532_vm4, %v1536_v27, -inf  ;;  %v1279_v28 = vadd.f32 %v9318_v56, %v9340_v6 }
 0xad1   :  { %1538 = vmax.xlane.f32.xlu0 %v1537_v29  ;;  %v1533_v30 = vpop.f32.mrf.mxu1 }
 0xad3   :  { %v7967_v33 = vpop.f32.mrf.mxu1 }
 0xad4   :  { %v1282_v33 = vadd.f32 %v9326_v59, %v9342_v8 }
 0xad5   :  { %v1667_v35 = vpop.f32.mrf.mxu1 }
 0xad6   :  { %v1673_v36 = vmul.f32 0.25, %v1667_v35 }
 0xad7   :  { %v7978_v37 = vpop.f32.mrf.mxu1 }
 0xad8   :  { %v1674_v38 = vsel %vm532_vm4, %v1673_v36, -inf }
 0xad9   :  { %1675 = vmax.xlane.f32.xlu1 %v1674_v38  ;;  %v1670_v39 = vpop.f32.mrf.mxu1 }
 0xadb   :  { %v7979_v40 = vpop.f32.mrf.mxu1 }
 0xb5a   :  { %v1539_v41 = vpop.xlane.xlu0 %1538 }
 0xb5b   :  { %v1540_v42 = vsub.f32 %v1536_v27, %v1539_v41 }
 0xb5d   :  { %v1541_v21 = vmul.f32 1.442695, %v1540_v42 }
 0xb5f   :  { %8585 = vpow2.f32 %v1541_v21 }
 0xb62   :  { %v1676_v43 = vpop.xlane.xlu1 %1675 }
 0xb63   :  { %v1677_v44 = vsub.f32 %v1673_v36, %v1676_v43 }
 0xb65   :  { %v1678_v45 = vmul.f32 1.442695, %v1677_v44 }
 0xb67   :  { %8587 = vpow2.f32 %v1678_v45 }
 0xb6c   :  { %v8586_v46 = vpop.eup %8585 }
 0xb6d   :  { %v1543_v47 = vsel %vm532_vm4, %v8586_v46, 0.0 }
 0xb6e   :  { %1544 = vadd.xlane.f32.xlu0 %v1543_v47 }
 0xb74   :  { %v8588_v48 = vpop.eup %8587 }
 0xb75   :  { %v1680_v49 = vsel %vm532_vm4, %v8588_v48, 0.0 }
 0xb76   :  { %1681 = vadd.xlane.f32.xlu1 %v1680_v49 }
 0xbf7   :  { %v1545_v50 = vpop.xlane.xlu0 %1544 }
 0xbf8   :  { %8589 = vrcp.f32 %v1545_v50 }
 0xbff   :  { %v1682_v51 = vpop.xlane.xlu1 %1681 }
 0xc00   :  { %8591 = vrcp.f32 %v1682_v51 }
 0xc05   :  { %v8590_v52 = vpop.eup %8589 }
 0xc06   :  { %v1547_v54 = vmul.f32 %v8590_v52, %v8586_v46 }
 0xc08   :  { %v1548_v55 = vpack.c.bf16 %v1547_v54, %v1547_v54 }
 0xc0a   :  { %7971 = vmatmul.mubr.msk.bf16.vlgmr.msra.gmra.mxu0 %vm532_vm4, %v1548_v55 }
 0xc0b   :  { %7981 = vmatpush3.bf16.msra.mxu0 %v1691_v57  ;;  %7982 = vmatprep.mubr.msk.bf16.mxu0 %vm8948_vm1, %v8947_v15 }
 0xc0c   :  { %7992 = vmatprep.subr.bf16.mxu0 %v8947_v15 }
 0xc0d   :  { %v8592_v58 = vpop.eup %8591 }
 0xc0e   :  { %v1684_v60 = vmul.f32 %v8592_v58, %v8588_v48 }
 0xc10   :  { %v1685_v62 = vpack.c.bf16 %v1684_v60, %v1684_v60 }
 0xc12   :  { %7983 = vmatmul.mubr.msk.bf16.vlgmr.msra.gmra.mxu0 %vm532_vm4, %v1685_v62 }
 0xc13   :  { %7993 = vmatpush3.bf16.msra.mxu0 %v8377_v61  ;;  %7996 = vmatprep.mubr.msk.bf16.mxu0 %vm8948_vm1, %v8947_v15 }
 0xc14   :  { %7994 = vmatprep.subr.bf16.mxu0 %v8947_v15 }
 0xc17   :  { %7995 = vmatpush3.bf16.msra.mxu0 %v8378_v63 }
 0xc18   :  { %8008 = vmatprep.subr.bf16.mxu0 %v8947_v15 }
 0xc1a   :  { %7997 = vmatmul.mubr.msk.bf16.vlgmr.msra.gmra.mxu0 %vm234_vm0, %v9153_v34 }
 0xc1b   :  { %8009 = vmatpush3.bf16.msra.mxu0 %v8379_v0  ;;  %8012 = vmatprep.mubr.msk.bf16.mxu0 %vm8948_vm1, %v8947_v15 }
 0xc1c   :  { %8010 = vmatprep.subr.bf16.mxu0 %v8947_v15 }
 0xc1f   :  { %8011 = vmatpush3.bf16.msra.mxu0 %v8380_v1 }
 0xc20   :  { %8022 = vmatprep.subr.bf16.mxu0 %v8947_v15 }
 0xc22   :  { %8013 = vmatmul.mubr.msk.bf16.vlgmr.msra.gmra.mxu0 %vm234_vm0, %v9153_v34 }
 0xc23   :  { %8024 = vmatprep.mubr.msk.bf16.mxu0 %vm8948_vm1, %v8947_v15 }
 0xcca   :  { %v1590_v3 = vpop.f32.mrf.mxu0 }
 0xccc   :  { %v7972_v4 = vpop.f32.mrf.mxu0 }
 0xcce   :  { %v1593_v5 = vpop.f32.mrf.mxu0 }
 0xcd0   :  { %v7973_v7 = vpop.f32.mrf.mxu0 }
 0xcd2   :  { %v1727_v9 = vpop.f32.mrf.mxu0 }
 0xcd3   :  { %v1736_v11 = vpack.c.bf16 %v1727_v9, %v1590_v3 }
 0xcd4   :  { %v7984_v12 = vpop.f32.mrf.mxu0 }
 0xcd5   :  { %7989 = vmatmul.mubr.msk.bf16.vlgmr.msra.gmra.mxu1 %vm487_vm3, %v1736_v11 }
 0xcd6   :  { %v1730_v13 = vpop.f32.mrf.mxu0  ;;  %8001 = vmatpush3.bf16.msra.mxu1 %v8382_v10  ;;  %8004 = vmatprep.mubr.msk.bf16.mxu1 %vm8948_vm1, %v8947_v15 }
 0xcd7   :  { %8002 = vmatprep.subr.bf16.mxu1 %v8947_v15 }
 0xcd8   :  { %v7985_v14 = vpop.f32.mrf.mxu0 }
 0xcda   :  { %v1840_v17 = vpop.f32.mrf.mxu0  ;;  %8003 = vmatpush3.bf16.msra.mxu1 %v8383_v16 }
 0xcdb   :  { %8016 = vmatprep.subr.bf16.mxu1 %v8947_v15  ;;  %v1995_v43 = vpack.c.bf16 %v1840_v17, %v1840_v17 }
 0xcdc   :  { %v7998_v18 = vpop.f32.mrf.mxu0 }
 0xcdd   :  { %8005 = vmatmul.mubr.msk.bf16.vlgmr.msra.gmra.mxu1 %vm234_vm0, %v9153_v34  ;;  %v8384_v18 = vld [vmem:[%s10379_s6 + $0x18] sm:$0xff]  }
 0xcde   :  { %v1843_v19 = vpop.f32.mrf.mxu0  ;;  %8018 = vmatprep.mubr.msk.bf16.mxu1 %vm8948_vm1, %v8947_v15 }
 0xcdf   :  { %v2132_v8 = vpack.c.bf16 %v1843_v19, %v1843_v19 }
 0xce0   :  { %v7999_v20 = vpop.f32.mrf.mxu0 }
 0xce2   :  { %v1956_v22 = vpop.f32.mrf.mxu0 }
 0xce3   :  { %v2053_v23 = vpack.c.bf16 %v1956_v22, %v1956_v22 }
 0xce4   :  { %v8014_v24 = vpop.f32.mrf.mxu0 }
 0xce5   :  { %v2058_v25 = vsel %vm549_vm2, %v2053_v23, 0 }
 0xce6   :  { %v9409_v26 = vpop.f32.mrf.mxu0  ;;  %8023 = vmatpush3.bf16.msra.mxu0 %v2058_v25 }
 0xce7   :  { %8034 = vmatprep.subr.bf16.mxu0 %v8947_v15  ;;  %v2190_v10 = vpack.c.bf16 %v9409_v26, %v9409_v26 }
 0xce8   :  { %v8015_v27 = vpop.f32.mrf.mxu0 }
 0xce9   :  { %v2195_v13 = vsel %vm549_vm2, %v2190_v10, 0  ;;  %v8391_v10 = vld [vmem:[%s10387_s14 + $0x28] sm:$0xff]  }
 0xd95   :  { %v1780_v34 = vpop.f32.mrf.mxu1 }
 0xd96   :  { %v9414_v29 = vadd.f32 %v1780_v34, %v1279_v28 }
 0xd97   :  { %v7990_v30 = vpop.f32.mrf.mxu1 }
 0xd98   :  { %v7190_v30 = vld [vmem:[#allocation8] ss:$0 sm:$0xff] }
 0xd99   :  { %v1783_v35 = vpop.f32.mrf.mxu1 }
 0xd9a   :  { %v9418_v36 = vadd.f32 %v1783_v35, %v1282_v33 }
 0xd9b   :  { %v7991_v37 = vpop.f32.mrf.mxu1 }
 0xd9d   :  { %v1898_v38 = vpop.f32.mrf.mxu1 }
 0xd9e   :  { %1963 = vxpose.xlu0.b32.start.end [1/1] (short) (narrow) %v1898_v38, 16 }
 0xd9f   :  { %v8006_v39 = vpop.f32.mrf.mxu1 }
 0xda1   :  { %v1901_v40 = vpop.f32.mrf.mxu1 }
 0xda2   :  { %2100 = vxpose.xlu1.b32.start.end [1/1] (short) (narrow) %v1901_v40, 16 }
 0xda3   :  { %v8007_v41 = vpop.f32.mrf.mxu1 }
 0xe1a   :  { %v1979_v42 = vpop.trf.xlu0 }
 0xe1e   :  { %v1980_v21 = vpop.trf.xlu0  ;;  %v2116_v56 = vpop.trf.xlu1 }
 0xe1f   :  { %v1996_v6 = vpack.c.bf16 %v1980_v21, %v1979_v42 }
 0xe21   :  { %8017 = vmatpush3.bf16.msra.mxu1 %v1996_v6 }
 0xe22   :  { %v2117_v44 = vpop.trf.xlu1  ;;  %8028 = vmatprep.subr.bf16.mxu1 %v8947_v15 }
 0xe23   :  { %v2133_v59 = vpack.c.bf16 %v2117_v44, %v2116_v56 }
 0xe24   :  { %8019 = vmatmul.mubr.msk.bf16.vlgmr.msra.gmra.mxu1 %vm487_vm3, %v1995_v43 }
 0xe25   :  { %8029 = vmatpush3.bf16.msra.mxu1 %v2133_v59  ;;  %8030 = vmatprep.mubr.msk.bf16.mxu1 %vm8948_vm1, %v8947_v15 }
 0xe26   :  { %8040 = vmatprep.subr.bf16.mxu1 %v8947_v15 }
 0xe2c   :  { %8031 = vmatmul.mubr.msk.bf16.vlgmr.msra.gmra.mxu1 %vm487_vm3, %v2132_v8 }
 0xe2d   :  { %8042 = vmatprep.mubr.msk.bf16.mxu1 %vm8948_vm1, %v8947_v15  ;;  %8041 = vmatpush3.bf16.msra.mxu1 %v8384_v18 }
 0xe2e   :  { %8054 = vmatprep.subr.bf16.mxu1 %v8947_v15 }
 0xee4   :  { %v2034_v45 = vpop.f32.mrf.mxu1 }
 0xee5   :  { %v2040_v46 = vmul.f32 0.25, %v2034_v45 }
 0xee6   :  { %v8020_v47 = vpop.f32.mrf.mxu1 }
 0xee7   :  { %v2041_v48 = vsel %vm532_vm4, %v2040_v46, -inf }
 0xee8   :  { %2042 = vmax.xlane.f32.xlu0 %v2041_v48  ;;  %v2037_v49 = vpop.f32.mrf.mxu1  ;;  %v8386_v48 = vld [vmem:[%s10385_s12 + $0x8] sm:$0xff]  }
 0xee9   :  { %v8387_v49 = vld [vmem:[%s10383_s10] sm:$0xff]  }
 0xeea   :  { %v8021_v50 = vpop.f32.mrf.mxu1 }
 0xeeb   :  { %v8388_v50 = vld [vmem:[%s10385_s12] sm:$0xff]  }
 0xeec   :  { %v2171_v51 = vpop.f32.mrf.mxu1 }
 0xeed   :  { %v2177_v52 = vmul.f32 0.25, %v2171_v51 }
 0xeee   :  { %v8032_v53 = vpop.f32.mrf.mxu1 }
 0xeef   :  { %v2178_v54 = vsel %vm532_vm4, %v2177_v52, -inf }
 0xef0   :  { %2179 = vmax.xlane.f32.xlu1 %v2178_v54  ;;  %v2174_v55 = vpop.f32.mrf.mxu1 }
 0xef2   :  { %v8033_v57 = vpop.f32.mrf.mxu1 }
 0xf71   :  { %v2043_v58 = vpop.xlane.xlu0 %2042 }
 0xf72   :  { %v2044_v60 = vsub.f32 %v2040_v46, %v2043_v58 }
 0xf74   :  { %v2045_v61 = vmul.f32 1.442695, %v2044_v60 }
 0xf76   :  { %8593 = vpow2.f32 %v2045_v61  ;;  %v7191_v61 = vld [vmem:[#allocation10] ss:$0 sm:$0xff] }
 0xf79   :  { %v2180_v62 = vpop.xlane.xlu1 %2179 }
 0xf7a   :  { %v2181_v63 = vsub.f32 %v2177_v52, %v2180_v62 }
 0xf7c   :  { %v2182_v0 = vmul.f32 1.442695, %v2181_v63 }
 0xf7e   :  { %8595 = vpow2.f32 %v2182_v0 }
 0xf83   :  { %v8594_v1 = vpop.eup %8593 }
 0xf84   :  { %v2047_v2 = vsel %vm532_vm4, %v8594_v1, 0.0 }
 0xf85   :  { %2048 = vadd.xlane.f32.xlu0 %v2047_v2 }
 0xf8b   :  { %v8596_v3 = vpop.eup %8595 }
 0xf8c   :  { %v2184_v4 = vsel %vm532_vm4, %v8596_v3, 0.0 }
 0xf8d   :  { %2185 = vadd.xlane.f32.xlu1 %v2184_v4 }
0x100e   :  { %v2049_v5 = vpop.xlane.xlu0 %2048 }
0x100f   :  { %8597 = vrcp.f32 %v2049_v5 }
0x1016   :  { %v2186_v7 = vpop.xlane.xlu1 %2185 }
0x1017   :  { %8599 = vrcp.f32 %v2186_v7  ;;  %v8389_v7 = vld [vmem:[%s10387_s14 + $0x38] sm:$0xff]  }
0x101c   :  { %v8598_v9 = vpop.eup %8597 }
0x101d   :  { %v2051_v11 = vmul.f32 %v8598_v9, %v8594_v1  ;;  %v7192_v1 = vld [vmem:[#allocation11] ss:$0 sm:$0xff]  ;;  %v8390_v9 = vld [vmem:[%s10387_s14 + $0x30] sm:$0xff]  }
0x101f   :  { %v2052_v12 = vpack.c.bf16 %v2051_v11, %v2051_v11  ;;  %v8392_v11 = vld [vmem:[%s10387_s14 + $0x20] sm:$0xff]  }
0x1021   :  { %8025 = vmatmul.mubr.msk.bf16.vlgmr.msra.gmra.mxu0 %vm532_vm4, %v2052_v12  ;;  %v8393_v12 = vld [vmem:[%s10387_s14 + $0x18] sm:$0xff]  }
0x1022   :  { %8035 = vmatpush3.bf16.msra.mxu0 %v2195_v13  ;;  %8036 = vmatprep.mubr.msk.bf16.mxu0 %vm8948_vm1, %v8947_v15  ;;  %v8394_v13 = vld [vmem:[%s10387_s14 + $0x10] sm:$0xff]  }
0x1023   :  { %8046 = vmatprep.subr.bf16.mxu0 %v8947_v15 }
0x1024   :  { %v8600_v16 = vpop.eup %8599 }
0x1025   :  { %v2188_v14 = vmul.f32 %v8600_v16, %v8596_v3  ;;  %v8395_v16 = vld [vmem:[%s10387_s14 + $0x8] sm:$0xff]  }
0x1027   :  { %v2189_v17 = vpack.c.bf16 %v2188_v14, %v2188_v14  ;;  %v8396_v14 = vld [vmem:[%s10387_s14] sm:$0xff]  }
0x1029   :  { %8037 = vmatmul.mubr.msk.bf16.vlgmr.msra.gmra.mxu0 %vm532_vm4, %v2189_v17  ;;  %v7197_v17 = vld [vmem:[#allocation14] ss:$0 sm:$0xff] }
0x102a   :  { %8050 = vmatprep.mubr.msk.bf16.mxu0 %vm8948_vm1, %v8947_v15 }
0x10e1   :  { %v2094_v19 = vpop.f32.mrf.mxu0 }
0x10e3   :  { %v8026_v20 = vpop.f32.mrf.mxu0 }
0x10e5   :  { %v2097_v22 = vpop.f32.mrf.mxu0 }
0x10e7   :  { %v8027_v23 = vpop.f32.mrf.mxu0 }
0x10e9   :  { %v2231_v24 = vpop.f32.mrf.mxu0 }
0x10ea   :  { %v2240_v25 = vpack.c.bf16 %v2231_v24, %v2094_v19 }
0x10eb   :  { %v8038_v26 = vpop.f32.mrf.mxu0 }
0x10ec   :  { %8043 = vmatmul.mubr.msk.bf16.vlgmr.msra.gmra.mxu1 %vm487_vm3, %v2240_v25 }
0x10ed   :  { %v2234_v27 = vpop.f32.mrf.mxu0  ;;  %8058 = vmatprep.mubr.msk.bf16.mxu1 %vm8948_vm1, %v8947_v15  ;;  %8055 = vmatpush3.bf16.msra.mxu1 %v8386_v48  ;;  %v7201_v48 = vld [vmem:[#allocation16] ss:$0 sm:$0xff] }
0x10ee   :  { %8056 = vmatprep.subr.bf16.mxu1 %v8947_v15 }
0x10ef   :  { %v8039_v28 = vpop.f32.mrf.mxu0 }
0x10f1   :  { %8057 = vmatpush3.bf16.msra.mxu1 %v8388_v50 }
0x10f2   :  { %8082 = vmatprep.subr.bf16.mxu1 %v8947_v15 }
0x11ac   :  { %v2284_v34 = vpop.f32.mrf.mxu1 }
0x11ad   :  { %v2291_v33 = vadd.f32 %v2284_v34, %v9414_v29 }
0x11ae   :  { %v8044_v35 = vpop.f32.mrf.mxu1 }
0x11af   :  { %v2300_v37 = vadd.f32 %v7190_v30, %v2291_v33 }
0x11b0   :  { %v2287_v38 = vpop.f32.mrf.mxu1 }
0x11b1   :  { %v2292_v39 = vadd.f32 %v2287_v38, %v9418_v36  ;;  %v2302_v40 = vadd.f32 %v2300_v37, %v9144_v31 }
0x11b2   :  { %v8045_v41 = vpop.f32.mrf.mxu1 }
0x11b3   :  { %v2301_v42 = vadd.f32 %v7190_v30, %v2292_v39  ;;  %v2306_v21 = vsel %vm234_vm0, %v2302_v40, 0.0 }
0x11b4   :  { %2307 = vadd.xlane.f32.xlu0 %v2306_v21 }
0x11b5   :  { %v2303_v56 = vadd.f32 %v2301_v42, %v9146_v32  ;;  %v8385_v32 = vld [vmem:[%s10383_s10 + $0x8] sm:$0xff]  }
0x11b6   :  { %8047 = vmatpush3.bf16.msra.mxu0 %v8385_v32 }
0x11b7   :  { %v2309_v6 = vsel %vm234_vm0, %v2303_v56, 0.0  ;;  %8048 = vmatprep.subr.bf16.mxu0 %v8947_v15 }
0x11b8   :  { %2310 = vadd.xlane.f32.xlu1 %v2309_v6 }
0x11ba   :  { %8049 = vmatpush3.bf16.msra.mxu0 %v8387_v49 }
0x11bb   :  { %8062 = vmatprep.subr.bf16.mxu0 %v8947_v15 }
0x123d   :  { %v2308_v43 = vpop.xlane.xlu0 %2307 }
0x123e   :  { %v2312_v44 = vmul.f32 0.03125, %v2308_v43 }
0x1240   :  { %v2314_v29 = vsub.f32 %v2302_v40, %v2312_v44  ;;  %v7193_v44 = vld [vmem:[#allocation13] ss:$0 sm:$0xff] }
0x1241   :  { %v2311_v59 = vpop.xlane.xlu1 %2310 }
0x1242   :  { %v2313_v8 = vmul.f32 0.03125, %v2311_v59  ;;  %v2316_v45 = vmul.f32 %v2314_v29, %v2314_v29 }
0x1244   :  { %v2315_v46 = vsub.f32 %v2303_v56, %v2313_v8  ;;  %v2318_v36 = vsel %vm234_vm0, %v2316_v45, 0.0 }
0x1245   :  { %2319 = vadd.xlane.f32.xlu0 %v2318_v36 }
0x1246   :  { %v2317_v31 = vmul.f32 %v2315_v46, %v2315_v46 }
0x1248   :  { %v2321_v47 = vsel %vm234_vm0, %v2317_v31, 0.0 }
0x1249   :  { %2322 = vadd.xlane.f32.xlu1 %v2321_v47 }
0x12ce   :  { %v2320_v51 = vpop.xlane.xlu0 %2319 }
0x12cf   :  { %v2324_v52 = vmul.f32 0.03125, %v2320_v51 }
0x12d1   :  { %v2326_v53 = vadd.f32 1e-05, %v2324_v52 }
0x12d2   :  { %v2323_v54 = vpop.xlane.xlu1 %2322 }
0x12d3   :  { %8601 = vrsqrt.f32 %v2326_v53  ;;  %v2325_v55 = vmul.f32 0.03125, %v2323_v54 }
0x12d5   :  { %v2327_v57 = vadd.f32 1e-05, %v2325_v55 }
0x12d7   :  { %8603 = vrsqrt.f32 %v2327_v57 }
0x12e0   :  { %v8602_v58 = vpop.eup %8601 }
0x12e1   :  { %v2330_v60 = vmul.f32 %v8602_v58, %v2314_v29 }
0x12e3   :  { %v2338_v0 = vmul.f32 %v7191_v61, %v2330_v60 }
0x12e4   :  { %v8604_v62 = vpop.eup %8603 }
0x12e5   :  { %v2331_v63 = vmul.f32 %v8604_v62, %v2315_v46  ;;  %v9473_v3 = vadd.f32 %v7192_v1, %v2338_v0 }
0x12e7   :  { %v2339_v2 = vmul.f32 %v7191_v61, %v2331_v63 }
0x12e9   :  { %v9475_v4 = vadd.f32 %v7192_v1, %v2339_v2 }
0x12eb   :  { %v2352_v5 = vpack.c.bf16 %v9475_v4, %v9473_v3 }
0x12ed   :  { %8051 = vmatmul.mubr.msk.bf16.vlgmr.msra.gmra.mxu0 %vm234_vm0, %v2352_v5  ;;  %8059 = vmatmul.mubr.msk.bf16.vlgmr.msra.gmra.mxu1 %vm234_vm0, %v2352_v5 }
0x12ee   :  { %8078 = vmatprep.mubr.msk.bf16.mxu0 %vm8948_vm1, %v8947_v15  ;;  %8086 = vmatprep.mubr.msk.bf16.mxu1 %vm8948_vm1, %v8947_v15 }
0x12ef   :  { %8063 = vmatpush3.bf16.msra.mxu0 %v8389_v7 }
0x12f0   :  { %8064 = vmatprep.subr.bf16.mxu0 %v8947_v15 }
0x12f3   :  { %8065 = vmatpush3.bf16.msra.mxu0 %v8390_v9 }
0x12f4   :  { %8066 = vmatprep.subr.bf16.mxu0 %v8947_v15 }
0x12f7   :  { %8067 = vmatpush3.bf16.msra.mxu0 %v8391_v10  ;;  %v8398_v10 = vld [vmem:[%s10404_s24 + $0x40] sm:$0xff]  }
0x12f8   :  { %8068 = vmatprep.subr.bf16.mxu0 %v8947_v15 }
0x12fb   :  { %8069 = vmatpush3.bf16.msra.mxu0 %v8392_v11 }
0x12fc   :  { %8070 = vmatprep.subr.bf16.mxu0 %v8947_v15 }
0x12ff   :  { %8071 = vmatpush3.bf16.msra.mxu0 %v8393_v12 }
0x1300   :  { %8072 = vmatprep.subr.bf16.mxu0 %v8947_v15 }
0x1303   :  { %8073 = vmatpush3.bf16.msra.mxu0 %v8394_v13 }
0x1304   :  { %8074 = vmatprep.subr.bf16.mxu0 %v8947_v15 }
0x1307   :  { %8075 = vmatpush3.bf16.msra.mxu0 %v8395_v16 }
0x1308   :  { %8076 = vmatprep.subr.bf16.mxu0 %v8947_v15 }
0x130b   :  { %8077 = vmatpush3.bf16.msra.mxu0 %v8396_v14 }
0x130c   :  { %8112 = vmatprep.subr.bf16.mxu0 %v8947_v15 }
0x13ad   :  { %v2409_v18 = vpop.f32.mrf.mxu0  ;;  %v2473_v19 = vpop.f32.mrf.mxu1 }
0x13ae   :  { %v2474_v20 = vadd.f32 %v7197_v17, %v2473_v19  ;;  %v2410_v45 = vadd.f32 %v7193_v44, %v2409_v18 }
0x13af   :  { %v8052_v22 = vpop.f32.mrf.mxu0  ;;  %v8060_v23 = vpop.f32.mrf.mxu1 }
0x13b0   :  { %v2482_v24 = vmul.f32 0.044715, %v2474_v20  ;;  %v2480_v6 = vmul.f32 0.5, %v2474_v20 }
0x13b1   :  { %v2412_v25 = vpop.f32.mrf.mxu0  ;;  %v2476_v26 = vpop.f32.mrf.mxu1 }
0x13b2   :  { %v2484_v27 = vmul.f32 %v2482_v24, %v2474_v20  ;;  %v2477_v28 = vadd.f32 %v7197_v17, %v2476_v26  ;;  %v2413_v46 = vadd.f32 %v7193_v44, %v2412_v25  ;;  %v7211_v25 = vld [vmem:[#allocation7 + $0x1] ss:$0 sm:$0xff] }
0x13b3   :  { %v8053_v34 = vpop.f32.mrf.mxu0  ;;  %v8061_v30 = vpop.f32.mrf.mxu1 }
0x13b4   :  { %v2486_v33 = vmul.f32 %v2484_v27, %v2474_v20  ;;  %v2483_v35 = vmul.f32 0.044715, %v2477_v28  ;;  %v2481_v29 = vmul.f32 0.5, %v2477_v28  ;;  %v8399_v34 = vld [vmem:[%s10405_s8 + $0x48] sm:$0xff]  }
0x13b6   :  { %v2488_v37 = vadd.f32 %v2486_v33, %v2474_v20  ;;  %v2485_v38 = vmul.f32 %v2483_v35, %v2477_v28  ;;  %v7210_v20 = vld [vmem:[#allocation5 + $0x1] ss:$0 sm:$0xff]  ;;  %v8400_v33 = vld [vmem:[%s10405_s8 + $0x40] sm:$0xff]   ;;  %v8401_v35 = vld [vmem:[%s10378_s5 + $0x48] sm:$0xff]  }
0x13b8   :  { %v2490_v39 = vmul.f32 0.7978846, %v2488_v37  ;;  %v2487_v40 = vmul.f32 %v2485_v38, %v2477_v28  ;;  %v8402_v37 = vld [vmem:[%s10378_s5 + $0x40] sm:$0xff]  }
0x13ba   :  { %8605 = vtanh.f32 %v2490_v39  ;;  %v2489_v41 = vadd.f32 %v2487_v40, %v2477_v28 }
0x13bc   :  { %v2491_v42 = vmul.f32 0.7978846, %v2489_v41 }
0x13be   :  { %8607 = vtanh.f32 %v2491_v42 }
0x13c7   :  { %v8606_v21 = vpop.eup %8605 }
0x13c8   :  { %v2494_v56 = vadd.f32 1.0, %v8606_v21 }
0x13ca   :  { %v2496_v8 = vmul.f32 %v2494_v56, %v2480_v6 }
0x13cb   :  { %v8608_v43 = vpop.eup %8607 }
0x13cc   :  { %v2495_v59 = vadd.f32 1.0, %v8608_v43  ;;  %v2498_v31 = vmul.f32 %v2496_v8, %v2410_v45 }
0x13ce   :  { %v2497_v36 = vmul.f32 %v2495_v59, %v2481_v29 }
0x13d0   :  { %v2499_v47 = vmul.f32 %v2497_v36, %v2413_v46 }
0x13d2   :  { %v2516_v32 = vpack.c.bf16 %v2499_v47, %v2498_v31 }
0x13d4   :  { %8079 = vmatmul.mubr.bf16.vlgmr.msra.gmra.mxu0 %v2516_v32 }
0x13d5   :  { %8114 = vmatprep.mubr.msk.bf16.mxu0 %vm8948_vm1, %v8947_v15 }
0x1494   :  { %v2606_v49 = vpop.f32.mrf.mxu0 }
0x1495   :  { %v2607_v50 = vadd.f32 %v7201_v48, %v2606_v49 }
0x1496   :  { %v8080_v51 = vpop.f32.mrf.mxu0 }
0x1497   :  { %v2613_v52 = vadd.f32 %v2607_v50, %v9473_v3  ;;  %v8403_v50 = vld [vmem:[%s10404_s24 + $0x58] sm:$0xff]  }
0x1498   :  { %v2609_v53 = vpop.f32.mrf.mxu0 }
0x1499   :  { %v2610_v54 = vadd.f32 %v7201_v48, %v2609_v53  ;;  %v2619_v55 = vsel %vm234_vm0, %v2613_v52, 0.0  ;;  %v8405_v53 = vld [vmem:[%s10378_s5 + $0x58] sm:$0xff]  }
0x149a   :  { %2620 = vadd.xlane.f32.xlu0 %v2619_v55  ;;  %v8081_v57 = vpop.f32.mrf.mxu0 }
0x149b   :  { %v2614_v58 = vadd.f32 %v2610_v54, %v9475_v4  ;;  %v8397_v4 = vld [vmem:[%s10404_s24 + $0x48] sm:$0xff]   ;;  %v8406_v54 = vld [vmem:[%s10378_s5 + $0x50] sm:$0xff]  }
0x149c   :  { %8083 = vmatpush3.bf16.msra.mxu1 %v8397_v4 }
0x149d   :  { %v2622_v60 = vsel %vm234_vm0, %v2614_v58, 0.0  ;;  %8084 = vmatprep.subr.bf16.mxu1 %v8947_v15 }
0x149e   :  { %2623 = vadd.xlane.f32.xlu1 %v2622_v60 }
0x14a0   :  { %8085 = vmatpush3.bf16.msra.mxu1 %v8398_v10 }
0x14a1   :  { %8090 = vmatprep.subr.bf16.mxu1 %v8947_v15 }
0x1523   :  { %v2621_v61 = vpop.xlane.xlu0 %2620 }
0x1524   :  { %v2625_v62 = vmul.f32 0.03125, %v2621_v61 }
0x1526   :  { %v2627_v63 = vsub.f32 %v2613_v52, %v2625_v62  ;;  %v8404_v52 = vld [vmem:[%s10404_s24 + $0x50] sm:$0xff]  }
0x1527   :  { %v2624_v0 = vpop.xlane.xlu1 %2623 }
0x1528   :  { %v2626_v1 = vmul.f32 0.03125, %v2624_v0  ;;  %v2629_v2 = vmul.f32 %v2627_v63, %v2627_v63 }
0x152a   :  { %v2628_v5 = vsub.f32 %v2614_v58, %v2626_v1  ;;  %v2631_v3 = vsel %vm234_vm0, %v2629_v2, 0.0 }
0x152b   :  { %2632 = vadd.xlane.f32.xlu0 %v2631_v3 }
0x152c   :  { %v2630_v7 = vmul.f32 %v2628_v5, %v2628_v5 }
0x152e   :  { %v2634_v9 = vsel %vm234_vm0, %v2630_v7, 0.0 }
0x152f   :  { %2635 = vadd.xlane.f32.xlu1 %v2634_v9 }
0x15b4   :  { %v2633_v11 = vpop.xlane.xlu0 %2632 }
0x15b5   :  { %v2637_v12 = vmul.f32 0.03125, %v2633_v11 }
0x15b7   :  { %v2639_v13 = vadd.f32 1e-05, %v2637_v12 }
0x15b8   :  { %v2636_v16 = vpop.xlane.xlu1 %2635 }
0x15b9   :  { %8609 = vrsqrt.f32 %v2639_v13  ;;  %v2638_v14 = vmul.f32 0.03125, %v2636_v16 }
0x15bb   :  { %v2640_v17 = vadd.f32 1e-05, %v2638_v14 }
0x15bd   :  { %8611 = vrsqrt.f32 %v2640_v17 }
0x15c6   :  { %v8610_v18 = vpop.eup %8609 }
0x15c7   :  { %v2643_v19 = vmul.f32 %v8610_v18, %v2627_v63 }
0x15c9   :  { %v2651_v23 = vmul.f32 %v7210_v20, %v2643_v19 }
0x15ca   :  { %v8612_v22 = vpop.eup %8611 }
0x15cb   :  { %v2644_v24 = vmul.f32 %v8612_v22, %v2628_v5  ;;  %v9533_v27 = vadd.f32 %v7211_v25, %v2651_v23 }
0x15cd   :  { %v2652_v26 = vmul.f32 %v7210_v20, %v2644_v24 }
0x15cf   :  { %v9535_v28 = vadd.f32 %v7211_v25, %v2652_v26 }
0x15d1   :  { %v9542_v30 = vpack.c.bf16 %v9535_v28, %v9533_v27 }
0x15d3   :  { %8087 = vmatmul.mubr.msk.bf16.vlgmr.msra.gmra.mxu1 %vm234_vm0, %v9542_v30 }
0x15d4   :  { %8091 = vmatpush3.bf16.msra.mxu1 %v8399_v34  ;;  %8094 = vmatprep.mubr.msk.bf16.mxu1 %vm8948_vm1, %v8947_v15 }
0x15d5   :  { %8092 = vmatprep.subr.bf16.mxu1 %v8947_v15 }
0x15d8   :  { %8093 = vmatpush3.bf16.msra.mxu1 %v8400_v33 }
0x15d9   :  { %8098 = vmatprep.subr.bf16.mxu1 %v8947_v15 }
0x15db   :  { %8095 = vmatmul.mubr.msk.bf16.vlgmr.msra.gmra.mxu1 %vm234_vm0, %v9542_v30 }
0x15dc   :  { %8099 = vmatpush3.bf16.msra.mxu1 %v8401_v35  ;;  %8102 = vmatprep.mubr.msk.bf16.mxu1 %vm8948_vm1, %v8947_v15 }
0x15dd   :  { %8100 = vmatprep.subr.bf16.mxu1 %v8947_v15 }
0x15e0   :  { %8101 = vmatpush3.bf16.msra.mxu1 %v8402_v37 }
0x15e1   :  { %8106 = vmatprep.subr.bf16.mxu1 %v8947_v15 }
0x15e3   :  { %8103 = vmatmul.mubr.msk.bf16.vlgmr.msra.gmra.mxu1 %vm234_vm0, %v9542_v30 }
0x15e4   :  { %8108 = vmatprep.mubr.msk.bf16.mxu1 %vm8948_vm1, %v8947_v15 }
0x1693   :  { %v2716_v38 = vpop.f32.mrf.mxu1 }
0x1694   :  { %v2871_v32 = vpack.c.bf16 %v2716_v38, %v2716_v38 }
0x1695   :  { %v8088_v39 = vpop.f32.mrf.mxu1 }
0x1697   :  { %v2719_v40 = vpop.f32.mrf.mxu1 }
0x1698   :  { %v3008_v51 = vpack.c.bf16 %v2719_v40, %v2719_v40 }
0x1699   :  { %v8089_v41 = vpop.f32.mrf.mxu1 }
0x169b   :  { %v2774_v42 = vpop.f32.mrf.mxu1 }
0x169c   :  { %2839 = vxpose.xlu0.b32.start.end [1/1] (short) (narrow) %v2774_v42, 16 }
0x169d   :  { %v8096_v21 = vpop.f32.mrf.mxu1 }
0x169f   :  { %v2777_v56 = vpop.f32.mrf.mxu1 }
0x16a0   :  { %2976 = vxpose.xlu1.b32.start.end [1/1] (short) (narrow) %v2777_v56, 16 }
0x16a1   :  { %v8097_v6 = vpop.f32.mrf.mxu1 }
0x16a2   :  { %v8407_v6 = vld [vmem:[%s10405_s8 + $0x58] sm:$0xff]  }
0x16a3   :  { %v2832_v43 = vpop.f32.mrf.mxu1 }
0x16a4   :  { %v2929_v44 = vpack.c.bf16 %v2832_v43, %v2832_v43 }
0x16a5   :  { %v8104_v29 = vpop.f32.mrf.mxu1 }
0x16a6   :  { %v2934_v59 = vsel %vm549_vm2, %v2929_v44, 0  ;;  %v8408_v44 = vld [vmem:[%s10405_s8 + $0x50] sm:$0xff]  }
0x16a7   :  { %v9570_v8 = vpop.f32.mrf.mxu1  ;;  %8113 = vmatpush3.bf16.msra.mxu0 %v2934_v59 }
0x16a8   :  { %8124 = vmatprep.subr.bf16.mxu0 %v8947_v15  ;;  %v3066_v39 = vpack.c.bf16 %v9570_v8, %v9570_v8 }
0x16a9   :  { %v8105_v45 = vpop.f32.mrf.mxu1 }
0x16aa   :  { %v3071_v42 = vsel %vm549_vm2, %v3066_v39, 0 }
0x1718   :  { %v2855_v46 = vpop.trf.xlu0 }
0x171c   :  { %v2856_v36 = vpop.trf.xlu0  ;;  %v2992_v31 = vpop.trf.xlu1 }
0x171d   :  { %v2872_v47 = vpack.c.bf16 %v2856_v36, %v2855_v46 }
0x171f   :  { %8107 = vmatpush3.bf16.msra.mxu1 %v2872_v47 }
0x1720   :  { %v2993_v48 = vpop.trf.xlu1  ;;  %8118 = vmatprep.subr.bf16.mxu1 %v8947_v15 }
0x1721   :  { %v3009_v49 = vpack.c.bf16 %v2993_v48, %v2992_v31 }
0x1722   :  { %8109 = vmatmul.mubr.msk.bf16.vlgmr.msra.gmra.mxu1 %vm487_vm3, %v2871_v32 }
0x1723   :  { %8119 = vmatpush3.bf16.msra.mxu1 %v3009_v49  ;;  %8120 = vmatprep.mubr.msk.bf16.mxu1 %vm8948_vm1, %v8947_v15 }
0x1724   :  { %8130 = vmatprep.subr.bf16.mxu1 %v8947_v15 }
0x172a   :  { %8121 = vmatmul.mubr.msk.bf16.vlgmr.msra.gmra.mxu1 %vm487_vm3, %v3008_v51 }
0x172b   :  { %8131 = vmatpush3.bf16.msra.mxu1 %v8403_v50  ;;  %8134 = vmatprep.mubr.msk.bf16.mxu1 %vm8948_vm1, %v8947_v15 }
0x172c   :  { %8132 = vmatprep.subr.bf16.mxu1 %v8947_v15 }
0x172f   :  { %8133 = vmatpush3.bf16.msra.mxu1 %v8404_v52 }
0x1730   :  { %8146 = vmatprep.subr.bf16.mxu1 %v8947_v15 }
0x1732   :  { %8135 = vmatmul.mubr.msk.bf16.vlgmr.msra.gmra.mxu1 %vm234_vm0, %v9542_v30 }
0x1733   :  { %8147 = vmatpush3.bf16.msra.mxu1 %v8405_v53  ;;  %8150 = vmatprep.mubr.msk.bf16.mxu1 %vm8948_vm1, %v8947_v15 }
0x1734   :  { %8148 = vmatprep.subr.bf16.mxu1 %v8947_v15 }
0x1737   :  { %8149 = vmatpush3.bf16.msra.mxu1 %v8406_v54 }
0x1738   :  { %8160 = vmatprep.subr.bf16.mxu1 %v8947_v15 }
0x173a   :  { %8151 = vmatmul.mubr.msk.bf16.vlgmr.msra.gmra.mxu1 %vm234_vm0, %v9542_v30 }
0x173b   :  { %8162 = vmatprep.mubr.msk.bf16.mxu1 %vm8948_vm1, %v8947_v15 }
0x17e2   :  { %v2910_v55 = vpop.f32.mrf.mxu1 }
0x17e3   :  { %v2916_v57 = vmul.f32 0.25, %v2910_v55 }
0x17e4   :  { %v8110_v58 = vpop.f32.mrf.mxu1 }
0x17e5   :  { %v2917_v60 = vsel %vm532_vm4, %v2916_v57, -inf }
0x17e6   :  { %2918 = vmax.xlane.f32.xlu0 %v2917_v60  ;;  %v2913_v61 = vpop.f32.mrf.mxu1 }
0x17e8   :  { %v8111_v62 = vpop.f32.mrf.mxu1 }
0x17ea   :  { %v3047_v63 = vpop.f32.mrf.mxu1 }
0x17eb   :  { %v3053_v0 = vmul.f32 0.25, %v3047_v63 }
0x17ec   :  { %v8122_v1 = vpop.f32.mrf.mxu1 }
0x17ed   :  { %v3054_v2 = vsel %vm532_vm4, %v3053_v0, -inf }
0x17ee   :  { %3055 = vmax.xlane.f32.xlu1 %v3054_v2  ;;  %v3050_v5 = vpop.f32.mrf.mxu1 }
0x17f0   :  { %v8123_v3 = vpop.f32.mrf.mxu1 }
0x17f2   :  { %v9607_v7 = vpop.f32.mrf.mxu1 }
0x17f4   :  { %v8136_v9 = vpop.f32.mrf.mxu1 }
0x17f6   :  { %v9609_v4 = vpop.f32.mrf.mxu1 }
0x17f7   :  { %v3460_v61 = vpack.c.bf16 %v9609_v4, %v9609_v4 }
0x17f8   :  { %v8137_v10 = vpop.f32.mrf.mxu1 }
0x17fa   :  { %v3284_v11 = vpop.f32.mrf.mxu1 }
0x17fb   :  { %v3381_v12 = vpack.c.bf16 %v3284_v11, %v3284_v11 }
0x17fc   :  { %v8152_v13 = vpop.f32.mrf.mxu1 }
0x17fd   :  { %v3386_v16 = vsel %vm549_vm2, %v3381_v12, 0 }
0x17fe   :  { %v9612_v14 = vpop.f32.mrf.mxu1  ;;  %8161 = vmatpush3.bf16.msra.mxu1 %v3386_v16 }
0x17ff   :  { %8172 = vmatprep.subr.bf16.mxu1 %v8947_v15 }
0x1800   :  { %v8153_v17 = vpop.f32.mrf.mxu1 }
0x186f   :  { %v2919_v18 = vpop.xlane.xlu0 %2918 }
0x1870   :  { %v2920_v19 = vsub.f32 %v2916_v57, %v2919_v18  ;;  %v3323_v57 = vpack.c.bf16 %v9607_v7, %v9607_v7 }
0x1872   :  { %v2921_v20 = vmul.f32 1.442695, %v2920_v19 }
0x1874   :  { %8613 = vpow2.f32 %v2921_v20 }
0x1877   :  { %v3056_v22 = vpop.xlane.xlu1 %3055 }
0x1878   :  { %v3057_v23 = vsub.f32 %v3053_v0, %v3056_v22 }
0x187a   :  { %v3058_v24 = vmul.f32 1.442695, %v3057_v23 }
0x187c   :  { %8615 = vpow2.f32 %v3058_v24 }
0x1881   :  { %v8614_v25 = vpop.eup %8613 }
0x1882   :  { %v2923_v26 = vsel %vm532_vm4, %v8614_v25, 0.0 }
0x1883   :  { %2924 = vadd.xlane.f32.xlu0 %v2923_v26 }
0x1889   :  { %v8616_v34 = vpop.eup %8615 }
0x188a   :  { %v3060_v33 = vsel %vm532_vm4, %v8616_v34, 0.0 }
0x188b   :  { %3061 = vadd.xlane.f32.xlu1 %v3060_v33  ;;  %v3518_v33 = vpack.c.bf16 %v9612_v14, %v9612_v14  ;;  %v8410_v14 = vld [vmem:[%s10405_s8 + $0x68] sm:$0xff]  }
0x190c   :  { %v2925_v35 = vpop.xlane.xlu0 %2924 }
0x190d   :  { %8617 = vrcp.f32 %v2925_v35 }
0x1914   :  { %v3062_v37 = vpop.xlane.xlu1 %3061 }
0x1915   :  { %8619 = vrcp.f32 %v3062_v37 }
0x191a   :  { %v8618_v38 = vpop.eup %8617 }
0x191b   :  { %v2927_v40 = vmul.f32 %v8618_v38, %v8614_v25  ;;  %v3523_v38 = vsel %vm549_vm2, %v3518_v33, 0 }
0x191d   :  { %v2928_v41 = vpack.c.bf16 %v2927_v40, %v2927_v40 }
0x191f   :  { %8115 = vmatmul.mubr.msk.bf16.vlgmr.msra.gmra.mxu0 %vm532_vm4, %v2928_v41  ;;  %v8409_v41 = vld [vmem:[%s10379_s6 + $0x20] sm:$0xff]  }
0x1920   :  { %8125 = vmatpush3.bf16.msra.mxu0 %v3071_v42  ;;  %8126 = vmatprep.mubr.msk.bf16.mxu0 %vm8948_vm1, %v8947_v15 }
0x1921   :  { %8138 = vmatprep.subr.bf16.mxu0 %v8947_v15 }
0x1922   :  { %v8620_v21 = vpop.eup %8619 }
0x1923   :  { %v3064_v56 = vmul.f32 %v8620_v21, %v8616_v34  ;;  %v8411_v21 = vld [vmem:[%s10405_s8 + $0x60] sm:$0xff]  }
0x1925   :  { %v3065_v43 = vpack.c.bf16 %v3064_v56, %v3064_v56  ;;  %v8412_v56 = vld [vmem:[%s10379_s6 + $0x28] sm:$0xff]  }
0x1927   :  { %8127 = vmatmul.mubr.msk.bf16.vlgmr.msra.gmra.mxu0 %vm532_vm4, %v3065_v43 }
0x1928   :  { %8139 = vmatpush3.bf16.msra.mxu0 %v8407_v6  ;;  %8142 = vmatprep.mubr.msk.bf16.mxu0 %vm8948_vm1, %v8947_v15 }
0x1929   :  { %8140 = vmatprep.subr.bf16.mxu0 %v8947_v15 }
0x192c   :  { %8141 = vmatpush3.bf16.msra.mxu0 %v8408_v44 }
0x192d   :  { %8154 = vmatprep.subr.bf16.mxu0 %v8947_v15 }
0x192f   :  { %8143 = vmatmul.mubr.msk.bf16.vlgmr.msra.gmra.mxu0 %vm234_vm0, %v9542_v30 }
0x1930   :  { %8156 = vmatprep.mubr.msk.bf16.mxu0 %vm8948_vm1, %v8947_v15 }
0x19df   :  { %v9639_v29 = vpop.f32.mrf.mxu0 }
0x19e1   :  { %v8116_v59 = vpop.f32.mrf.mxu0 }
0x19e3   :  { %v2973_v8 = vpop.f32.mrf.mxu0 }
0x19e4   :  { %v8413_v8 = vld [vmem:[%s10404_s24 + $0x68] sm:$0xff]  }
0x19e5   :  { %v8117_v45 = vpop.f32.mrf.mxu0 }
0x19e7   :  { %v9641_v46 = vpop.f32.mrf.mxu0 }
0x19e8   :  { %v3116_v36 = vpack.c.bf16 %v9641_v46, %v9639_v29 }
0x19e9   :  { %v8128_v31 = vpop.f32.mrf.mxu0 }
0x19ea   :  { %v8414_v31 = vld [vmem:[%s10404_s24 + $0x60] sm:$0xff]  }
0x19eb   :  { %v3110_v47 = vpop.f32.mrf.mxu0 }
0x19ed   :  { %v8129_v32 = vpop.f32.mrf.mxu0 }
0x19ef   :  { %v3226_v48 = vpop.f32.mrf.mxu0 }
0x19f0   :  { %3291 = vxpose.xlu0.b32.start.end [1/1] (short) (narrow) %v3226_v48, 16  ;;  %v8415_v48 = vld [vmem:[%s10378_s5 + $0x68] sm:$0xff]  }
0x19f1   :  { %v8144_v49 = vpop.f32.mrf.mxu0 }
0x19f3   :  { %v3229_v50 = vpop.f32.mrf.mxu0 }
0x19f4   :  { %3428 = vxpose.xlu1.b32.start.end [1/1] (short) (narrow) %v3229_v50, 16 }
0x19f5   :  { %v8145_v51 = vpop.f32.mrf.mxu0 }
0x19f6   :  { %v8416_v51 = vld [vmem:[%s10378_s5 + $0x60] sm:$0xff]  }
0x1a6c   :  { %v3307_v52 = vpop.trf.xlu0 }
0x1a70   :  { %v3308_v53 = vpop.trf.xlu0  ;;  %v3444_v54 = vpop.trf.xlu1 }
0x1a71   :  { %v3324_v55 = vpack.c.bf16 %v3308_v53, %v3307_v52 }
0x1a73   :  { %8155 = vmatpush3.bf16.msra.mxu0 %v3324_v55 }
0x1a74   :  { %v3445_v58 = vpop.trf.xlu1  ;;  %8166 = vmatprep.subr.bf16.mxu0 %v8947_v15 }
0x1a75   :  { %v3461_v60 = vpack.c.bf16 %v3445_v58, %v3444_v54 }
0x1a76   :  { %8157 = vmatmul.mubr.msk.bf16.vlgmr.msra.gmra.mxu0 %vm487_vm3, %v3323_v57 }
0x1a77   :  { %8167 = vmatpush3.bf16.msra.mxu0 %v3461_v60  ;;  %8168 = vmatprep.mubr.msk.bf16.mxu0 %vm8948_vm1, %v8947_v15 }
0x1a78   :  { %8178 = vmatprep.subr.bf16.mxu0 %v8947_v15 }
0x1a7e   :  { %8169 = vmatmul.mubr.msk.bf16.vlgmr.msra.gmra.mxu0 %vm487_vm3, %v3460_v61 }
0x1a7f   :  { %8180 = vmatprep.mubr.msk.bf16.mxu0 %vm8948_vm1, %v8947_v15  ;;  %8179 = vmatpush3.bf16.msra.mxu0 %v8412_v56 }
0x1a80   :  { %8190 = vmatprep.subr.bf16.mxu0 %v8947_v15 }
0x1b36   :  { %v3362_v62 = vpop.f32.mrf.mxu0 }
0x1b37   :  { %v3368_v63 = vmul.f32 0.25, %v3362_v62 }
0x1b38   :  { %v8158_v0 = vpop.f32.mrf.mxu0 }
0x1b39   :  { %v3369_v1 = vsel %vm532_vm4, %v3368_v63, -inf }
0x1b3a   :  { %3370 = vmax.xlane.f32.xlu0 %v3369_v1  ;;  %v3365_v2 = vpop.f32.mrf.mxu0 }
0x1b3c   :  { %v8159_v5 = vpop.f32.mrf.mxu0 }
0x1b3e   :  { %v3499_v3 = vpop.f32.mrf.mxu0 }
0x1b3f   :  { %v3505_v7 = vmul.f32 0.25, %v3499_v3 }
0x1b40   :  { %v8170_v9 = vpop.f32.mrf.mxu0 }
0x1b41   :  { %v3506_v10 = vsel %vm532_vm4, %v3505_v7, -inf }
0x1b42   :  { %3507 = vmax.xlane.f32.xlu1 %v3506_v10  ;;  %v3502_v4 = vpop.f32.mrf.mxu0 }
0x1b44   :  { %v8171_v11 = vpop.f32.mrf.mxu0 }
0x1bc3   :  { %v3371_v12 = vpop.xlane.xlu0 %3370 }
0x1bc4   :  { %v3372_v13 = vsub.f32 %v3368_v63, %v3371_v12 }
0x1bc6   :  { %v3373_v16 = vmul.f32 1.442695, %v3372_v13 }
0x1bc8   :  { %8621 = vpow2.f32 %v3373_v16 }
0x1bcb   :  { %v3508_v17 = vpop.xlane.xlu1 %3507 }
0x1bcc   :  { %v3509_v18 = vsub.f32 %v3505_v7, %v3508_v17 }
0x1bce   :  { %v3510_v19 = vmul.f32 1.442695, %v3509_v18 }
0x1bd0   :  { %8623 = vpow2.f32 %v3510_v19 }
0x1bd5   :  { %v8622_v20 = vpop.eup %8621 }
0x1bd6   :  { %v3375_v22 = vsel %vm532_vm4, %v8622_v20, 0.0 }
0x1bd7   :  { %3376 = vadd.xlane.f32.xlu0 %v3375_v22 }
0x1bdd   :  { %v8624_v23 = vpop.eup %8623 }
0x1bde   :  { %v3512_v24 = vsel %vm532_vm4, %v8624_v23, 0.0 }
0x1bdf   :  { %3513 = vadd.xlane.f32.xlu1 %v3512_v24 }
0x1c60   :  { %v3377_v25 = vpop.xlane.xlu0 %3376 }
0x1c61   :  { %8625 = vrcp.f32 %v3377_v25 }
0x1c68   :  { %v3514_v26 = vpop.xlane.xlu1 %3513 }
0x1c69   :  { %8627 = vrcp.f32 %v3514_v26 }
0x1c6e   :  { %v8626_v34 = vpop.eup %8625 }
0x1c6f   :  { %v3379_v35 = vmul.f32 %v8626_v34, %v8622_v20 }
0x1c71   :  { %v3380_v37 = vpack.c.bf16 %v3379_v35, %v3379_v35 }
0x1c73   :  { %8163 = vmatmul.mubr.msk.bf16.vlgmr.msra.gmra.mxu1 %vm532_vm4, %v3380_v37 }
0x1c74   :  { %8173 = vmatpush3.bf16.msra.mxu1 %v3523_v38  ;;  %8174 = vmatprep.mubr.msk.bf16.mxu1 %vm8948_vm1, %v8947_v15 }
0x1c75   :  { %8184 = vmatprep.subr.bf16.mxu1 %v8947_v15 }
0x1c76   :  { %v8628_v39 = vpop.eup %8627 }
0x1c77   :  { %v3516_v40 = vmul.f32 %v8628_v39, %v8624_v23 }
0x1c79   :  { %v3517_v42 = vpack.c.bf16 %v3516_v40, %v3516_v40 }
0x1c7b   :  { %8175 = vmatmul.mubr.msk.bf16.vlgmr.msra.gmra.mxu1 %vm532_vm4, %v3517_v42 }
0x1c7c   :  { %8185 = vmatpush3.bf16.msra.mxu1 %v8409_v41  ;;  %8186 = vmatprep.mubr.msk.bf16.mxu1 %vm8948_vm1, %v8947_v15 }
0x1c7d   :  { %8198 = vmatprep.subr.bf16.mxu1 %v8947_v15 }
0x1c83   :  { %8187 = vmatmul.mubr.msk.bf16.vlgmr.msra.gmra.mxu1 %vm487_vm3, %v3116_v36 }
0x1c84   :  { %8199 = vmatpush3.bf16.msra.mxu1 %v8410_v14  ;;  %8202 = vmatprep.mubr.msk.bf16.mxu1 %vm8948_vm1, %v8947_v15 }
0x1c85   :  { %8200 = vmatprep.subr.bf16.mxu1 %v8947_v15 }
0x1c88   :  { %8201 = vmatpush3.bf16.msra.mxu1 %v8411_v21 }
0x1c89   :  { %8214 = vmatprep.subr.bf16.mxu1 %v8947_v15 }
0x1c8b   :  { %8203 = vmatmul.mubr.msk.bf16.vlgmr.msra.gmra.mxu1 %vm234_vm0, %v9542_v30 }
0x1c8c   :  { %8216 = vmatprep.mubr.msk.bf16.mxu1 %vm8948_vm1, %v8947_v15 }
0x1d33   :  { %v3422_v6 = vpop.f32.mrf.mxu1 }
0x1d35   :  { %v8164_v43 = vpop.f32.mrf.mxu1 }
0x1d37   :  { %v3425_v44 = vpop.f32.mrf.mxu1 }
0x1d39   :  { %v8165_v29 = vpop.f32.mrf.mxu1 }
0x1d3b   :  { %v3559_v59 = vpop.f32.mrf.mxu1 }
0x1d3c   :  { %v3568_v45 = vpack.c.bf16 %v3559_v59, %v3422_v6 }
0x1d3d   :  { %v8176_v46 = vpop.f32.mrf.mxu1 }
0x1d3e   :  { %8181 = vmatmul.mubr.msk.bf16.vlgmr.msra.gmra.mxu0 %vm487_vm3, %v3568_v45 }
0x1d3f   :  { %v3562_v36 = vpop.f32.mrf.mxu1  ;;  %8191 = vmatpush3.bf16.msra.mxu0 %v8413_v8  ;;  %8194 = vmatprep.mubr.msk.bf16.mxu0 %vm8948_vm1, %v8947_v15 }
0x1d40   :  { %8192 = vmatprep.subr.bf16.mxu0 %v8947_v15 }
0x1d41   :  { %v8177_v47 = vpop.f32.mrf.mxu1 }
0x1d43   :  { %v9707_v32 = vpop.f32.mrf.mxu1  ;;  %8193 = vmatpush3.bf16.msra.mxu0 %v8414_v31 }
0x1d44   :  { %8206 = vmatprep.subr.bf16.mxu0 %v8947_v15 }
0x1d45   :  { %v8188_v49 = vpop.f32.mrf.mxu1 }
0x1d46   :  { %8195 = vmatmul.mubr.msk.bf16.vlgmr.msra.gmra.mxu0 %vm234_vm0, %v9542_v30 }
0x1d47   :  { %v9715_v50 = vpop.f32.mrf.mxu1  ;;  %8207 = vmatpush3.bf16.msra.mxu0 %v8415_v48  ;;  %8210 = vmatprep.mubr.msk.bf16.mxu0 %vm8948_vm1, %v8947_v15 }
0x1d48   :  { %8208 = vmatprep.subr.bf16.mxu0 %v8947_v15 }
0x1d49   :  { %v8189_v52 = vpop.f32.mrf.mxu1 }
0x1d4a   :  { %v8417_v52 = vld [vmem:[%s10404_s24 + $0x78] sm:$0xff]  }
0x1d4b   :  { %v3778_v53 = vpop.f32.mrf.mxu1  ;;  %8209 = vmatpush3.bf16.msra.mxu0 %v8416_v51 }
0x1d4c   :  { %3843 = vxpose.xlu0.b32.start.end [1/1] (short) (narrow) %v3778_v53, 16  ;;  %8220 = vmatprep.subr.bf16.mxu0 %v8947_v15 }
0x1d4d   :  { %v8204_v54 = vpop.f32.mrf.mxu1 }
0x1d4e   :  { %8211 = vmatmul.mubr.msk.bf16.vlgmr.msra.gmra.mxu0 %vm234_vm0, %v9542_v30  ;;  %v8418_v54 = vld [vmem:[%s10404_s24 + $0x70] sm:$0xff]  }
0x1d4f   :  { %v3781_v55 = vpop.f32.mrf.mxu1  ;;  %8222 = vmatprep.mubr.msk.bf16.mxu0 %vm8948_vm1, %v8947_v15 }
0x1d50   :  { %3980 = vxpose.xlu1.b32.start.end [1/1] (short) (narrow) %v3781_v55, 16  ;;  %v8419_v55 = vld [vmem:[%s10378_s5 + $0x78] sm:$0xff]  }
0x1d51   :  { %v8205_v57 = vpop.f32.mrf.mxu1 }
0x1d52   :  { %v8420_v57 = vld [vmem:[%s10378_s5 + $0x70] sm:$0xff]  }
0x1dc8   :  { %v3859_v58 = vpop.trf.xlu0 }
0x1dcc   :  { %v3860_v60 = vpop.trf.xlu0  ;;  %v3996_v62 = vpop.trf.xlu1 }
0x1dcd   :  { %v3876_v61 = vpack.c.bf16 %v3860_v60, %v3859_v58  ;;  %v8421_v58 = vld [vmem:[%s10379_s6 + $0x30] sm:$0xff]  }
0x1dcf   :  { %8215 = vmatpush3.bf16.msra.mxu1 %v3876_v61 }
0x1dd0   :  { %8226 = vmatprep.subr.bf16.mxu1 %v8947_v15  ;;  %v3997_v2 = vpop.trf.xlu1 }
0x1dd1   :  { %v4013_v7 = vpack.c.bf16 %v3997_v2, %v3996_v62 }
0x1dfe   :  { %v9729_v63 = vpop.f32.mrf.mxu0 }
0x1e00   :  { %v8182_v0 = vpop.f32.mrf.mxu0 }
0x1e02   :  { %v9731_v1 = vpop.f32.mrf.mxu0 }
0x1e04   :  { %v8183_v5 = vpop.f32.mrf.mxu0 }
0x1e05   :  { %v8422_v5 = vld [vmem:[%s10405_s8 + $0x78] sm:$0xff]  }
0x1e06   :  { %v3720_v3 = vpop.f32.mrf.mxu0 }
0x1e07   :  { %v3875_v9 = vpack.c.bf16 %v3720_v3, %v3720_v3 }
0x1e08   :  { %v8196_v10 = vpop.f32.mrf.mxu0 }
0x1e09   :  { %8217 = vmatmul.mubr.msk.bf16.vlgmr.msra.gmra.mxu1 %vm487_vm3, %v3875_v9  ;;  %v8423_v10 = vld [vmem:[%s10405_s8 + $0x70] sm:$0xff]  }
0x1e0a   :  { %v3723_v4 = vpop.f32.mrf.mxu0  ;;  %8227 = vmatpush3.bf16.msra.mxu1 %v4013_v7  ;;  %8228 = vmatprep.mubr.msk.bf16.mxu1 %vm8948_vm1, %v8947_v15 }
0x1e0b   :  { %8238 = vmatprep.subr.bf16.mxu1 %v8947_v15  ;;  %v4012_v13 = vpack.c.bf16 %v3723_v4, %v3723_v4 }
0x1e0c   :  { %v8197_v11 = vpop.f32.mrf.mxu0 }
0x1e0e   :  { %v3836_v12 = vpop.f32.mrf.mxu0 }
0x1e0f   :  { %v3933_v16 = vpack.c.bf16 %v3836_v12, %v3836_v12 }
0x1e10   :  { %v8212_v17 = vpop.f32.mrf.mxu0 }
0x1e11   :  { %v3938_v18 = vsel %vm549_vm2, %v3933_v16, 0  ;;  %8229 = vmatmul.mubr.msk.bf16.vlgmr.msra.gmra.mxu1 %vm487_vm3, %v4012_v13 }
0x1e12   :  { %v3839_v19 = vpop.f32.mrf.mxu0  ;;  %8221 = vmatpush3.bf16.msra.mxu0 %v3938_v18  ;;  %8240 = vmatprep.mubr.msk.bf16.mxu1 %vm8948_vm1, %v8947_v15 }
0x1e13   :  { %8232 = vmatprep.subr.bf16.mxu0 %v8947_v15  ;;  %v4070_v36 = vpack.c.bf16 %v3839_v19, %v3839_v19  ;;  %8239 = vmatpush3.bf16.msra.mxu1 %v8421_v58 }
0x1e14   :  { %v8213_v20 = vpop.f32.mrf.mxu0  ;;  %8252 = vmatprep.subr.bf16.mxu1 %v8947_v15 }
0x1e15   :  { %v4075_v48 = vsel %vm549_vm2, %v4070_v36, 0 }
0x1ec9   :  { %v3914_v22 = vpop.f32.mrf.mxu1 }
0x1eca   :  { %v3920_v23 = vmul.f32 0.25, %v3914_v22 }
0x1ecb   :  { %v8218_v24 = vpop.f32.mrf.mxu1 }
0x1ecc   :  { %v3921_v25 = vsel %vm532_vm4, %v3920_v23, -inf  ;;  %v3663_v24 = vadd.f32 %v9707_v32, %v9729_v63 }
0x1ecd   :  { %3922 = vmax.xlane.f32.xlu0 %v3921_v25  ;;  %v3917_v26 = vpop.f32.mrf.mxu1 }
0x1ecf   :  { %v8219_v34 = vpop.f32.mrf.mxu1 }
0x1ed0   :  { %v3666_v34 = vadd.f32 %v9715_v50, %v9731_v1 }
0x1ed1   :  { %v4051_v33 = vpop.f32.mrf.mxu1 }
0x1ed2   :  { %v4057_v35 = vmul.f32 0.25, %v4051_v33 }
0x1ed3   :  { %v8230_v37 = vpop.f32.mrf.mxu1 }
0x1ed4   :  { %v4058_v38 = vsel %vm532_vm4, %v4057_v35, -inf }
0x1ed5   :  { %4059 = vmax.xlane.f32.xlu1 %v4058_v38  ;;  %v4054_v39 = vpop.f32.mrf.mxu1 }
0x1ed7   :  { %v8231_v40 = vpop.f32.mrf.mxu1 }
0x1f56   :  { %v3923_v41 = vpop.xlane.xlu0 %3922 }
0x1f57   :  { %v3924_v42 = vsub.f32 %v3920_v23, %v3923_v41 }
0x1f59   :  { %v3925_v14 = vmul.f32 1.442695, %v3924_v42 }
0x1f5b   :  { %8629 = vpow2.f32 %v3925_v14 }
0x1f5e   :  { %v4060_v21 = vpop.xlane.xlu1 %4059 }
0x1f5f   :  { %v4061_v56 = vsub.f32 %v4057_v35, %v4060_v21 }
0x1f61   :  { %v4062_v6 = vmul.f32 1.442695, %v4061_v56 }
0x1f63   :  { %8631 = vpow2.f32 %v4062_v6 }
0x1f68   :  { %v8630_v43 = vpop.eup %8629 }
0x1f69   :  { %v3927_v44 = vsel %vm532_vm4, %v8630_v43, 0.0 }
0x1f6a   :  { %3928 = vadd.xlane.f32.xlu0 %v3927_v44 }
0x1f70   :  { %v8632_v29 = vpop.eup %8631 }
0x1f71   :  { %v4064_v59 = vsel %vm532_vm4, %v8632_v29, 0.0 }
0x1f72   :  { %4065 = vadd.xlane.f32.xlu1 %v4064_v59 }
0x1ff3   :  { %v3929_v8 = vpop.xlane.xlu0 %3928 }
0x1ff4   :  { %8633 = vrcp.f32 %v3929_v8 }
0x1ffb   :  { %v4066_v45 = vpop.xlane.xlu1 %4065 }
0x1ffc   :  { %8635 = vrcp.f32 %v4066_v45 }
0x2001   :  { %v8634_v46 = vpop.eup %8633 }
0x2002   :  { %v3931_v31 = vmul.f32 %v8634_v46, %v8630_v43 }
0x2004   :  { %v3932_v47 = vpack.c.bf16 %v3931_v31, %v3931_v31 }
0x2006   :  { %8223 = vmatmul.mubr.msk.bf16.vlgmr.msra.gmra.mxu0 %vm532_vm4, %v3932_v47 }
0x2007   :  { %8233 = vmatpush3.bf16.msra.mxu0 %v4075_v48  ;;  %8234 = vmatprep.mubr.msk.bf16.mxu0 %vm8948_vm1, %v8947_v15 }
0x2008   :  { %8244 = vmatprep.subr.bf16.mxu0 %v8947_v15 }
0x2009   :  { %v8636_v49 = vpop.eup %8635 }
0x200a   :  { %v4068_v51 = vmul.f32 %v8636_v49, %v8632_v29 }
0x200c   :  { %v4069_v53 = vpack.c.bf16 %v4068_v51, %v4068_v51 }
0x200e   :  { %8235 = vmatmul.mubr.msk.bf16.vlgmr.msra.gmra.mxu0 %vm532_vm4, %v4069_v53 }
0x200f   :  { %8245 = vmatpush3.bf16.msra.mxu0 %v8417_v52  ;;  %8248 = vmatprep.mubr.msk.bf16.mxu0 %vm8948_vm1, %v8947_v15 }
0x2010   :  { %8246 = vmatprep.subr.bf16.mxu0 %v8947_v15 }
0x2013   :  { %8247 = vmatpush3.bf16.msra.mxu0 %v8418_v54 }
0x2014   :  { %8260 = vmatprep.subr.bf16.mxu0 %v8947_v15 }
0x2016   :  { %8249 = vmatmul.mubr.msk.bf16.vlgmr.msra.gmra.mxu0 %vm234_vm0, %v9542_v30 }
0x2017   :  { %8261 = vmatpush3.bf16.msra.mxu0 %v8419_v55  ;;  %8264 = vmatprep.mubr.msk.bf16.mxu0 %vm8948_vm1, %v8947_v15 }
0x2018   :  { %8262 = vmatprep.subr.bf16.mxu0 %v8947_v15 }
0x201b   :  { %8263 = vmatpush3.bf16.msra.mxu0 %v8420_v57 }
0x201c   :  { %8274 = vmatprep.subr.bf16.mxu0 %v8947_v15 }
0x201e   :  { %8265 = vmatmul.mubr.msk.bf16.vlgmr.msra.gmra.mxu0 %vm234_vm0, %v9542_v30 }
0x201f   :  { %8276 = vmatprep.mubr.msk.bf16.mxu0 %vm8948_vm1, %v8947_v15 }
0x20c6   :  { %v3974_v60 = vpop.f32.mrf.mxu0 }
0x20c8   :  { %v8224_v61 = vpop.f32.mrf.mxu0 }
0x20ca   :  { %v3977_v62 = vpop.f32.mrf.mxu0 }
0x20cc   :  { %v8225_v0 = vpop.f32.mrf.mxu0 }
0x20ce   :  { %v4111_v2 = vpop.f32.mrf.mxu0 }
0x20cf   :  { %v4120_v3 = vpack.c.bf16 %v4111_v2, %v3974_v60 }
0x20d0   :  { %v8236_v7 = vpop.f32.mrf.mxu0 }
0x20d1   :  { %8241 = vmatmul.mubr.msk.bf16.vlgmr.msra.gmra.mxu1 %vm487_vm3, %v4120_v3 }
0x20d2   :  { %v4114_v9 = vpop.f32.mrf.mxu0  ;;  %8253 = vmatpush3.bf16.msra.mxu1 %v8422_v5  ;;  %8256 = vmatprep.mubr.msk.bf16.mxu1 %vm8948_vm1, %v8947_v15 }
0x20d3   :  { %8254 = vmatprep.subr.bf16.mxu1 %v8947_v15 }
0x20d4   :  { %v8237_v4 = vpop.f32.mrf.mxu0 }
0x20d6   :  { %v4224_v11 = vpop.f32.mrf.mxu0  ;;  %8255 = vmatpush3.bf16.msra.mxu1 %v8423_v10 }
0x20d7   :  { %8268 = vmatprep.subr.bf16.mxu1 %v8947_v15  ;;  %v4379_v21 = vpack.c.bf16 %v4224_v11, %v4224_v11 }
0x20d8   :  { %v8250_v12 = vpop.f32.mrf.mxu0 }
0x20d9   :  { %8257 = vmatmul.mubr.msk.bf16.vlgmr.msra.gmra.mxu1 %vm234_vm0, %v9542_v30  ;;  %v8424_v12 = vld [vmem:[%s10379_s6 + $0x38] sm:$0xff]  }
0x20da   :  { %v4227_v13 = vpop.f32.mrf.mxu0  ;;  %8270 = vmatprep.mubr.msk.bf16.mxu1 %vm8948_vm1, %v8947_v15 }
0x20db   :  { %v4516_v1 = vpack.c.bf16 %v4227_v13, %v4227_v13 }
0x20dc   :  { %v8251_v16 = vpop.f32.mrf.mxu0 }
0x20de   :  { %v4340_v17 = vpop.f32.mrf.mxu0 }
0x20df   :  { %v4437_v18 = vpack.c.bf16 %v4340_v17, %v4340_v17 }
0x20e0   :  { %v8266_v19 = vpop.f32.mrf.mxu0 }
0x20e1   :  { %v4442_v20 = vsel %vm549_vm2, %v4437_v18, 0 }
0x20e2   :  { %v9798_v22 = vpop.f32.mrf.mxu0  ;;  %8275 = vmatpush3.bf16.msra.mxu0 %v4442_v20 }
0x20e3   :  { %8286 = vmatprep.subr.bf16.mxu0 %v8947_v15  ;;  %v4574_v5 = vpack.c.bf16 %v9798_v22, %v9798_v22 }
0x20e4   :  { %v8267_v23 = vpop.f32.mrf.mxu0 }
0x20e5   :  { %v4579_v9 = vsel %vm549_vm2, %v4574_v5, 0  ;;  %v8431_v5 = vld [vmem:[%s10387_s14 + $0x68] sm:$0xff]  }
0x2191   :  { %v4164_v30 = vpop.f32.mrf.mxu1 }
0x2192   :  { %v9803_v25 = vadd.f32 %v4164_v30, %v3663_v24 }
0x2193   :  { %v8242_v26 = vpop.f32.mrf.mxu1 }
0x2194   :  { %v7328_v26 = vld [vmem:[#allocation8 + $0x1] ss:$0 sm:$0xff] }
0x2195   :  { %v4167_v33 = vpop.f32.mrf.mxu1 }
0x2196   :  { %v9807_v35 = vadd.f32 %v4167_v33, %v3666_v34 }
0x2197   :  { %v8243_v37 = vpop.f32.mrf.mxu1 }
0x2199   :  { %v4282_v38 = vpop.f32.mrf.mxu1 }
0x219a   :  { %4347 = vxpose.xlu0.b32.start.end [1/1] (short) (narrow) %v4282_v38, 16 }
0x219b   :  { %v8258_v39 = vpop.f32.mrf.mxu1 }
0x219d   :  { %v4285_v40 = vpop.f32.mrf.mxu1 }
0x219e   :  { %4484 = vxpose.xlu1.b32.start.end [1/1] (short) (narrow) %v4285_v40, 16 }
0x219f   :  { %v8259_v41 = vpop.f32.mrf.mxu1 }
0x2216   :  { %v4363_v42 = vpop.trf.xlu0 }
0x221a   :  { %v4364_v14 = vpop.trf.xlu0  ;;  %v4500_v32 = vpop.trf.xlu1 }
0x221b   :  { %v4380_v63 = vpack.c.bf16 %v4364_v14, %v4363_v42 }
0x221d   :  { %8269 = vmatpush3.bf16.msra.mxu1 %v4380_v63 }
0x221e   :  { %v4501_v56 = vpop.trf.xlu1  ;;  %8280 = vmatprep.subr.bf16.mxu1 %v8947_v15 }
0x221f   :  { %v4517_v50 = vpack.c.bf16 %v4501_v56, %v4500_v32 }
0x2220   :  { %8271 = vmatmul.mubr.msk.bf16.vlgmr.msra.gmra.mxu1 %vm487_vm3, %v4379_v21 }
0x2221   :  { %8281 = vmatpush3.bf16.msra.mxu1 %v4517_v50  ;;  %8282 = vmatprep.mubr.msk.bf16.mxu1 %vm8948_vm1, %v8947_v15 }
0x2222   :  { %8292 = vmatprep.subr.bf16.mxu1 %v8947_v15 }
0x2228   :  { %8283 = vmatmul.mubr.msk.bf16.vlgmr.msra.gmra.mxu1 %vm487_vm3, %v4516_v1 }
0x2229   :  { %8294 = vmatprep.mubr.msk.bf16.mxu1 %vm8948_vm1, %v8947_v15  ;;  %8293 = vmatpush3.bf16.msra.mxu1 %v8424_v12 }
0x222a   :  { %8306 = vmatprep.subr.bf16.mxu1 %v8947_v15 }
0x22e0   :  { %v4418_v6 = vpop.f32.mrf.mxu1 }
0x22e1   :  { %v4424_v43 = vmul.f32 0.25, %v4418_v6 }
0x22e2   :  { %v8272_v44 = vpop.f32.mrf.mxu1 }
0x22e3   :  { %v4425_v29 = vsel %vm532_vm4, %v4424_v43, -inf }
0x22e4   :  { %4426 = vmax.xlane.f32.xlu0 %v4425_v29  ;;  %v4421_v59 = vpop.f32.mrf.mxu1  ;;  %v8426_v29 = vld [vmem:[%s10385_s12 + $0x18] sm:$0xff]  }
0x22e5   :  { %v8427_v59 = vld [vmem:[%s10383_s10 + $0x10] sm:$0xff]  }
0x22e6   :  { %v8273_v8 = vpop.f32.mrf.mxu1 }
0x22e7   :  { %v8428_v8 = vld [vmem:[%s10385_s12 + $0x10] sm:$0xff]  }
0x22e8   :  { %v4555_v45 = vpop.f32.mrf.mxu1 }
0x22e9   :  { %v4561_v46 = vmul.f32 0.25, %v4555_v45 }
0x22ea   :  { %v8284_v36 = vpop.f32.mrf.mxu1 }
0x22eb   :  { %v4562_v31 = vsel %vm532_vm4, %v4561_v46, -inf }
0x22ec   :  { %4563 = vmax.xlane.f32.xlu1 %v4562_v31  ;;  %v4558_v47 = vpop.f32.mrf.mxu1 }
0x22ee   :  { %v8285_v48 = vpop.f32.mrf.mxu1 }
0x236d   :  { %v4427_v49 = vpop.xlane.xlu0 %4426 }
0x236e   :  { %v4428_v51 = vsub.f32 %v4424_v43, %v4427_v49 }
0x2370   :  { %v4429_v52 = vmul.f32 1.442695, %v4428_v51 }
0x2372   :  { %8637 = vpow2.f32 %v4429_v52  ;;  %v7329_v52 = vld [vmem:[#allocation10 + $0x1] ss:$0 sm:$0xff] }
0x2375   :  { %v4564_v53 = vpop.xlane.xlu1 %4563 }
0x2376   :  { %v4565_v54 = vsub.f32 %v4561_v46, %v4564_v53 }
0x2378   :  { %v4566_v55 = vmul.f32 1.442695, %v4565_v54 }
0x237a   :  { %8639 = vpow2.f32 %v4566_v55 }
0x237f   :  { %v8638_v57 = vpop.eup %8637 }
0x2380   :  { %v4431_v58 = vsel %vm532_vm4, %v8638_v57, 0.0 }
0x2381   :  { %4432 = vadd.xlane.f32.xlu0 %v4431_v58 }
0x2387   :  { %v8640_v60 = vpop.eup %8639 }
0x2388   :  { %v4568_v61 = vsel %vm532_vm4, %v8640_v60, 0.0 }
0x2389   :  { %4569 = vadd.xlane.f32.xlu1 %v4568_v61 }
0x240a   :  { %v4433_v62 = vpop.xlane.xlu0 %4432 }
0x240b   :  { %8641 = vrcp.f32 %v4433_v62 }
0x2412   :  { %v4570_v0 = vpop.xlane.xlu1 %4569 }
0x2413   :  { %8643 = vrcp.f32 %v4570_v0  ;;  %v8429_v0 = vld [vmem:[%s10387_s14 + $0x78] sm:$0xff]  }
0x2418   :  { %v8642_v2 = vpop.eup %8641 }
0x2419   :  { %v4435_v3 = vmul.f32 %v8642_v2, %v8638_v57  ;;  %v7330_v57 = vld [vmem:[#allocation11 + $0x1] ss:$0 sm:$0xff]  ;;  %v8430_v2 = vld [vmem:[%s10387_s14 + $0x70] sm:$0xff]  }
0x241b   :  { %v4436_v7 = vpack.c.bf16 %v4435_v3, %v4435_v3  ;;  %v8432_v3 = vld [vmem:[%s10387_s14 + $0x60] sm:$0xff]  }
0x241d   :  { %8277 = vmatmul.mubr.msk.bf16.vlgmr.msra.gmra.mxu0 %vm532_vm4, %v4436_v7  ;;  %v8433_v7 = vld [vmem:[%s10387_s14 + $0x58] sm:$0xff]  }
0x241e   :  { %8287 = vmatpush3.bf16.msra.mxu0 %v4579_v9  ;;  %8288 = vmatprep.mubr.msk.bf16.mxu0 %vm8948_vm1, %v8947_v15  ;;  %v8434_v9 = vld [vmem:[%s10387_s14 + $0x50] sm:$0xff]  }
0x241f   :  { %8298 = vmatprep.subr.bf16.mxu0 %v8947_v15 }
0x2420   :  { %v8644_v10 = vpop.eup %8643 }
0x2421   :  { %v4572_v4 = vmul.f32 %v8644_v10, %v8640_v60  ;;  %v8435_v10 = vld [vmem:[%s10387_s14 + $0x48] sm:$0xff]  }
0x2423   :  { %v4573_v11 = vpack.c.bf16 %v4572_v4, %v4572_v4  ;;  %v8436_v4 = vld [vmem:[%s10387_s14 + $0x40] sm:$0xff]  }
0x2425   :  { %8289 = vmatmul.mubr.msk.bf16.vlgmr.msra.gmra.mxu0 %vm532_vm4, %v4573_v11  ;;  %v7343_v11 = vld [vmem:[#allocation14 + $0x1] ss:$0 sm:$0xff] }
0x2426   :  { %8302 = vmatprep.mubr.msk.bf16.mxu0 %vm8948_vm1, %v8947_v15 }
0x24dd   :  { %v4478_v13 = vpop.f32.mrf.mxu0 }
0x24df   :  { %v8278_v16 = vpop.f32.mrf.mxu0 }
0x24e1   :  { %v4481_v17 = vpop.f32.mrf.mxu0 }
0x24e3   :  { %v8279_v18 = vpop.f32.mrf.mxu0 }
0x24e5   :  { %v4615_v19 = vpop.f32.mrf.mxu0 }
0x24e6   :  { %v4624_v20 = vpack.c.bf16 %v4615_v19, %v4478_v13 }
0x24e7   :  { %v8290_v22 = vpop.f32.mrf.mxu0 }
0x24e8   :  { %8295 = vmatmul.mubr.msk.bf16.vlgmr.msra.gmra.mxu1 %vm487_vm3, %v4624_v20 }
0x24e9   :  { %v4618_v23 = vpop.f32.mrf.mxu0  ;;  %8310 = vmatprep.mubr.msk.bf16.mxu1 %vm8948_vm1, %v8947_v15  ;;  %8307 = vmatpush3.bf16.msra.mxu1 %v8426_v29  ;;  %v8437_v29 = vld [vmem:[#allocation17 + $0x30] ss:$8 sps:$4 sm:$0xff]  }
0x24ea   :  { %8308 = vmatprep.subr.bf16.mxu1 %v8947_v15 }
0x24eb   :  { %v8291_v24 = vpop.f32.mrf.mxu0 }
0x24ed   :  { %8309 = vmatpush3.bf16.msra.mxu1 %v8428_v8  ;;  %v8440_v8 = vld [vmem:[#allocation17 + $0x10] ss:$8 sps:$4 sm:$0xff]  }
0x25a8   :  { %v4668_v30 = vpop.f32.mrf.mxu1 }
0x25a9   :  { %v4675_v34 = vadd.f32 %v4668_v30, %v9803_v25 }
0x25aa   :  { %v8296_v33 = vpop.f32.mrf.mxu1 }
0x25ab   :  { %v4685_v37 = vadd.f32 %v7328_v26, %v4675_v34 }
0x25ac   :  { %v4671_v38 = vpop.f32.mrf.mxu1 }
0x25ad   :  { %v4676_v39 = vadd.f32 %v4671_v38, %v9807_v35  ;;  %v4687_v40 = vadd.f32 %v4685_v37, %v9533_v27 }
0x25ae   :  { %v8297_v41 = vpop.f32.mrf.mxu1 }
0x25af   :  { %v4686_v42 = vadd.f32 %v7328_v26, %v4676_v39  ;;  %v4693_v14 = vsel %vm234_vm0, %v4687_v40, 0.0 }
0x25b0   :  { %4694 = vadd.xlane.f32.xlu0 %v4693_v14 }
0x25b1   :  { %v4688_v32 = vadd.f32 %v4686_v42, %v9535_v28  ;;  %v8425_v28 = vld [vmem:[%s10383_s10 + $0x18] sm:$0xff]  }
0x25b2   :  { %8299 = vmatpush3.bf16.msra.mxu0 %v8425_v28  ;;  %v8439_v28 = vld [vmem:[#allocation17 + $0x34] ss:$8 sps:$4 sm:$0xff]  }
0x25b3   :  { %v4696_v63 = vsel %vm234_vm0, %v4688_v32, 0.0  ;;  %8300 = vmatprep.subr.bf16.mxu0 %v8947_v15 }
0x25b4   :  { %4697 = vadd.xlane.f32.xlu1 %v4696_v63 }
0x25b6   :  { %8301 = vmatpush3.bf16.msra.mxu0 %v8427_v59  ;;  %v8442_v59 = vld [vmem:[#allocation17 + $0x14] ss:$8 sps:$4 sm:$0xff]  }
0x25b7   :  { %8314 = vmatprep.subr.bf16.mxu0 %v8947_v15  ;;  %5069 = vmatprep.subr.bf16.mxu1 %v8442_v59  ;;  %v8471_v59 = vld [vmem:[#allocation17 + $0x74] ss:$8 sps:$4 sm:$0xff]  }
0x2639   :  { %v4695_v21 = vpop.xlane.xlu0 %4694 }
0x263a   :  { %v4699_v56 = vmul.f32 0.03125, %v4695_v21  ;;  %v7335_v21 = vld [vmem:[#allocation13 + $0x1] ss:$0 sm:$0xff] }
0x263c   :  { %v4701_v25 = vsub.f32 %v4687_v40, %v4699_v56 }
0x263d   :  { %v4698_v50 = vpop.xlane.xlu1 %4697 }
0x263e   :  { %v4700_v1 = vmul.f32 0.03125, %v4698_v50  ;;  %v4703_v6 = vmul.f32 %v4701_v25, %v4701_v25 }
0x2640   :  { %v4702_v43 = vsub.f32 %v4688_v32, %v4700_v1  ;;  %v4705_v35 = vsel %vm234_vm0, %v4703_v6, 0.0 }
0x2641   :  { %4706 = vadd.xlane.f32.xlu0 %v4705_v35 }
0x2642   :  { %v4704_v27 = vmul.f32 %v4702_v43, %v4702_v43 }
0x2644   :  { %v4708_v44 = vsel %vm234_vm0, %v4704_v27, 0.0 }
0x2645   :  { %4709 = vadd.xlane.f32.xlu1 %v4708_v44 }
0x26ca   :  { %v4707_v45 = vpop.xlane.xlu0 %4706 }
0x26cb   :  { %v4711_v46 = vmul.f32 0.03125, %v4707_v45  ;;  %v8443_v45 = vld [vmem:[#allocation17 + $0x20] ss:$8 sps:$4 sm:$0xff]  }
0x26cd   :  { %v4713_v36 = vadd.f32 1e-05, %v4711_v46  ;;  %v8445_v46 = vld [vmem:[#allocation17 + $0x24] ss:$8 sps:$4 sm:$0xff]  }
0x26ce   :  { %v4710_v31 = vpop.xlane.xlu1 %4709 }
0x26cf   :  { %8645 = vrsqrt.f32 %v4713_v36  ;;  %v4712_v47 = vmul.f32 0.03125, %v4710_v31  ;;  %v8446_v36 = vld [vmem:[#allocation17] ss:$8 sps:$4 sm:$0xff]   ;;  %v8448_v31 = vld [vmem:[#allocation17 + $0x4] ss:$8 sps:$4 sm:$0xff]  }
0x26d1   :  { %v4714_v48 = vadd.f32 1e-05, %v4712_v47  ;;  %v8949_v47 = vmov 0  }
0x26d3   :  { %8647 = vrsqrt.f32 %v4714_v48  ;;  %v7363_v48 = vld [vmem:[#allocation16 + $0x1] ss:$0 sm:$0xff] }
0x26dc   :  { %v8646_v49 = vpop.eup %8645 }
0x26dd   :  { %v4717_v51 = vmul.f32 %v8646_v49, %v4701_v25 }
0x26df   :  { %v4725_v54 = vmul.f32 %v7329_v52, %v4717_v51 }
0x26e0   :  { %v8648_v53 = vpop.eup %8647 }
0x26e1   :  { %v4718_v55 = vmul.f32 %v8648_v53, %v4702_v43  ;;  %v9861_v60 = vadd.f32 %v7330_v57, %v4725_v54 }
0x26e3   :  { %v4726_v58 = vmul.f32 %v7329_v52, %v4718_v55 }
0x26e5   :  { %v9863_v61 = vadd.f32 %v7330_v57, %v4726_v58 }
0x26e7   :  { %v4740_v62 = vpack.c.bf16 %v9863_v61, %v9861_v60 }
0x26e9   :  { %8303 = vmatmul.mubr.msk.bf16.vlgmr.msra.gmra.mxu0 %vm234_vm0, %v4740_v62  ;;  %8311 = vmatmul.mubr.msk.bf16.vlgmr.msra.gmra.mxu1 %vm234_vm0, %v4740_v62 }
0x26ea   :  { %8330 = vmatprep.mubr.msk.bf16.mxu0 %vm8948_vm1, %v8947_v15  ;;  %8315 = vmatpush3.bf16.msra.mxu0 %v8429_v0 }
0x26eb   :  { %8316 = vmatprep.subr.bf16.mxu0 %v8947_v15  ;;  %5070 = vmatpush1.bf16.msra.mxu1 %v8440_v8  ;;  %v8474_v8 = vld [vmem:[#allocation17 + $0x54] ss:$8 sps:$4 sm:$0xff]  }
0x26ec   :  { %5071 = vmatprep.subr.bf16.mxu1 %v8448_v31  ;;  %5089 = vmatprep.mubr.bf16.mxu1 %v8949_v47  ;;  %v5238_v31 = vld [vmem:[#allocation19 + $0x2] sm:$0x3] }
0x26ee   :  { %8317 = vmatpush3.bf16.msra.mxu0 %v8430_v2 }
0x26ef   :  { %8318 = vmatprep.subr.bf16.mxu0 %v8947_v15  ;;  %5072 = vmatpush1.bf16.msra.mxu1 %v8446_v36 }
0x26f0   :  { %5192 = vmatprep.subr.bf16.mxu1 %v8949_v47 }
0x26f2   :  { %8319 = vmatpush3.bf16.msra.mxu0 %v8431_v5 }
0x26f3   :  { %8320 = vmatprep.subr.bf16.mxu0 %v8947_v15 }
0x26f6   :  { %8321 = vmatpush3.bf16.msra.mxu0 %v8432_v3 }
0x26f7   :  { %8322 = vmatprep.subr.bf16.mxu0 %v8947_v15 }
0x26fa   :  { %8323 = vmatpush3.bf16.msra.mxu0 %v8433_v7 }
0x26fb   :  { %8324 = vmatprep.subr.bf16.mxu0 %v8947_v15 }
0x26fe   :  { %8325 = vmatpush3.bf16.msra.mxu0 %v8434_v9 }
0x26ff   :  { %8326 = vmatprep.subr.bf16.mxu0 %v8947_v15 }
0x2702   :  { %8327 = vmatpush3.bf16.msra.mxu0 %v8435_v10 }
0x2703   :  { %8328 = vmatprep.subr.bf16.mxu0 %v8947_v15 }
0x2706   :  { %8329 = vmatpush3.bf16.msra.mxu0 %v8436_v4 }
0x2707   :  { %5288 = vmatprep.subr.bf16.mxu0 %v8439_v28  ;;  %v8467_v28 = vld [vmem:[%s10391_s18 + $0x90] sm:$0xff]  }
0x27a9   :  { %v4798_v12 = vpop.f32.mrf.mxu0  ;;  %v4864_v13 = vpop.f32.mrf.mxu1 }
0x27aa   :  { %v4865_v16 = vadd.f32 %v7343_v11, %v4864_v13  ;;  %v4799_v1 = vadd.f32 %v7335_v21, %v4798_v12 }
0x27ab   :  { %v8304_v17 = vpop.f32.mrf.mxu0  ;;  %v8312_v18 = vpop.f32.mrf.mxu1 }
0x27ac   :  { %v4873_v19 = vmul.f32 0.044715, %v4865_v16  ;;  %v4871_v32 = vmul.f32 0.5, %v4865_v16 }
0x27ad   :  { %v4801_v20 = vpop.f32.mrf.mxu0  ;;  %v4867_v22 = vpop.f32.mrf.mxu1 }
0x27ae   :  { %v4875_v23 = vmul.f32 %v4873_v19, %v4865_v16  ;;  %v4868_v24 = vadd.f32 %v7343_v11, %v4867_v22  ;;  %v4802_v6 = vadd.f32 %v7335_v21, %v4801_v20  ;;  %v8457_v21 = vld [vmem:[%s10391_s18 + $0x68] sm:$0xff]  }
0x27af   :  { %v8305_v30 = vpop.f32.mrf.mxu0  ;;  %v8313_v26 = vpop.f32.mrf.mxu1 }
0x27b0   :  { %v4877_v34 = vmul.f32 %v4875_v23, %v4865_v16  ;;  %v4874_v33 = vmul.f32 0.044715, %v4868_v24  ;;  %v4872_v25 = vmul.f32 0.5, %v4868_v24 }
0x27b2   :  { %v4879_v37 = vadd.f32 %v4877_v34, %v4865_v16  ;;  %v4876_v38 = vmul.f32 %v4874_v33, %v4868_v24  ;;  %v8449_v16 = vld [vmem:[%s10391_s18 + $0x88] sm:$0xff]  }
0x27b4   :  { %v4881_v39 = vmul.f32 0.7978846, %v4879_v37  ;;  %v4878_v15 = vmul.f32 %v4876_v38, %v4868_v24  ;;  %v8451_v38 = vld [vmem:[%s10391_s18 + $0x80] sm:$0xff]  }
0x27b6   :  { %8649 = vtanh.f32 %v4881_v39  ;;  %v4880_v40 = vadd.f32 %v4878_v15, %v4868_v24  ;;  %v8450_v24 = vld [vmem:[%s10391_s18 + $0x38] sm:$0xff]  }
0x27b8   :  { %v4882_v41 = vmul.f32 0.7978846, %v4880_v40 }
0x27ba   :  { %8651 = vtanh.f32 %v4882_v41  ;;  %v8452_v41 = vld [vmem:[%s10391_s18 + $0x30] sm:$0xff]  }
0x27c3   :  { %v8650_v42 = vpop.eup %8649 }
0x27c4   :  { %v4885_v14 = vadd.f32 1.0, %v8650_v42  ;;  %v8453_v42 = vld [vmem:[%s10391_s18 + $0x78] sm:$0xff]  }
0x27c6   :  { %v4887_v56 = vmul.f32 %v4885_v14, %v4871_v32  ;;  %v8454_v14 = vld [vmem:[%s10391_s18 + $0x28] sm:$0xff]   ;;  %v8455_v32 = vld [vmem:[%s10391_s18 + $0x70] sm:$0xff]  }
0x27c7   :  { %v8652_v63 = vpop.eup %8651 }
0x27c8   :  { %v4886_v50 = vadd.f32 1.0, %v8652_v63  ;;  %v4889_v35 = vmul.f32 %v4887_v56, %v4799_v1  ;;  %v8456_v63 = vld [vmem:[%s10391_s18 + $0x20] sm:$0xff]   ;;  %v8458_v56 = vld [vmem:[%s10391_s18 + $0x18] sm:$0xff]  }
0x27c9   :  { %v8461_v1 = vld [vmem:[%s10391_s18 + $0x58] sm:$0xff]  }
0x27ca   :  { %v4888_v43 = vmul.f32 %v4886_v50, %v4872_v25  ;;  %v8459_v25 = vld [vmem:[%s10391_s18 + $0x60] sm:$0xff]   ;;  %v8460_v50 = vld [vmem:[%s10391_s18 + $0x10] sm:$0xff]  }
0x27cc   :  { %v4890_v27 = vmul.f32 %v4888_v43, %v4802_v6  ;;  %v8462_v6 = vld [vmem:[%s10391_s18 + $0x8] sm:$0xff]   ;;  %v8463_v43 = vld [vmem:[%s10391_s18 + $0x50] sm:$0xff]  }
0x27ce   :  { %v4908_v44 = vpack.c.bf16 %v4890_v27, %v4889_v35  ;;  %v8464_v35 = vld [vmem:[%s10391_s18] sm:$0xff]   ;;  %v8465_v27 = vld [vmem:[%s10391_s18 + $0x98] sm:$0xff]  }
0x27d0   :  { %8331 = vmatmul.mubr.bf16.vlgmr.msra.gmra.mxu0 %v4908_v44  ;;  %v8466_v44 = vld [vmem:[%s10391_s18 + $0x48] sm:$0xff]  }
0x27d1   :  { %5289 = vmatpush1.bf16.msra.mxu0 %v8437_v29  ;;  %5308 = vmatprep.mubr.bf16.mxu0 %v8949_v47  ;;  %v8468_v29 = vld [vmem:[%s10391_s18 + $0x40] sm:$0xff]  }
0x27d2   :  { %5290 = vmatprep.subr.bf16.mxu0 %v8445_v46 }
0x27d5   :  { %5291 = vmatpush1.bf16.msra.mxu0 %v8443_v45  ;;  %v5016_v45 = vlaneseq }
0x27d6   :  { %5413 = vmatprep.subr.bf16.mxu0 %v8949_v47 }
0x27d7   :  { %v10008_v46 = vshrl.u32 %v5016_v45, 7  ;;  %v8506_v45 = vld [vmem:[#allocation17 + $0x94] ss:$8 sps:$4 sm:$0xff]  }
0x27d9   :  { %v10011_v36 = vsub.s32 0, %v10008_v46 }
0x2890   :  { %v4999_v49 = vpop.f32.mrf.mxu0 }
0x2891   :  { %v5000_v51 = vadd.f32 %v7363_v48, %v4999_v49  ;;  %v5014_v49 = vld [vmem:[#allocation19] sm:$0x3] }
0x2892   :  { %v8332_v52 = vpop.f32.mrf.mxu0 }
0x2893   :  { %v5006_v53 = vadd.f32 %v5000_v51, %v9861_v60  ;;  %v5243_v51 = vrot.slane %v5238_v31, %v10011_v36  ;;  %v5019_v52 = vrot.slane %v5014_v49, %v10011_v36 }
0x2894   :  { %v5002_v54 = vpop.f32.mrf.mxu0 }
0x2895   :  { %v5012_v55 = vpack.c.bf16 %v5006_v53, %v5006_v53  ;;  %v5003_v57 = vadd.f32 %v7363_v48, %v5002_v54  ;;  %v10014_v48 = vsub.s32 1, %v10008_v46 }
0x2896   :  { %v8333_v58 = vpop.f32.mrf.mxu0 }
0x2897   :  { %v5028_v62 = vunpack.c.l.b16 %v5012_v55  ;;  %v5007_v0 = vadd.f32 %v5003_v57, %v9863_v61  ;;  %v5247_v53 = vrot.slane %v5238_v31, %v10014_v48  ;;  %v5023_v57 = vrot.slane %v5014_v49, %v10014_v48 }
0x2898   :  { %v8950_v31 = vmov 1966171168  }
0x2899   :  { %v5013_v2 = vpack.c.bf16 %v5007_v0, %v5007_v0  ;;  %v5250_v3 = vrot.slane %v5028_v62, 1  ;;  %v5693_v7 = vrot.slane %v5028_v62, 3  ;;  %v5471_v9 = vrot.slane %v5028_v62, 2 }
0x289a   :  { %v6137_v10 = vrot.slane %v5028_v62, 5  ;;  %v5915_v4 = vrot.slane %v5028_v62, 4  ;;  %v6581_v11 = vrot.slane %v5028_v62, 7  ;;  %v6359_v12 = vrot.slane %v5028_v62, 6 }
0x289b   :  { %v5029_v5 = vunpack.c.l.b16 %v5013_v2  ;;  %v6787_v49 = vunpack.c.l.s4 %v8950_v31  ;;  %v8512_v31 = vld [vmem:[#allocation17 + $0x84] ss:$8 sps:$4 sm:$0xff]  }
0x289d   :  { %v5251_v13 = vsel %vm5031_vm5, %v5029_v5, %v5250_v3  ;;  %v5030_v60 = vrot.slane %v5029_v5, 7  ;;  %v5694_v17 = vrot.slane %v5029_v5, 2  ;;  %v5472_v18 = vrot.slane %v5029_v5, 1 }
0x289e   :  { %v5252_v61 = vpack.c.b16 %v5251_v13, %v5251_v13  ;;  %v6138_v19 = vrot.slane %v5029_v5, 4  ;;  %v5916_v20 = vrot.slane %v5029_v5, 3  ;;  %v6582_v22 = vrot.slane %v5029_v5, 6 }
0x289f   :  { %v5032_v23 = vsel %vm5031_vm5, %v5030_v60, %v5028_v62  ;;  %v9917_v30 = vsel %vm5031_vm5, %v5694_v17, %v5693_v7  ;;  %v9920_v26 = vsel %vm5031_vm5, %v5472_v18, %v5471_v9  ;;  %v6360_v34 = vrot.slane %v5029_v5, 5 }
0x28a0   :  { %7393 = vmatmul.mubr.msk.bf16.vlgmr.msra.gmra.mxu0 %vm234_vm0, %v5252_v61  ;;  %v5033_v33 = vpack.c.b16 %v5032_v23, %v5032_v23  ;;  %v9924_v37 = vsel %vm5031_vm5, %v6138_v19, %v6137_v10  ;;  %v9930_v39 = vsel %vm5031_vm5, %v5916_v20, %v5915_v4  ;;  %v9933_v15 = vsel %vm5031_vm5, %v6582_v22, %v6581_v11  ;;  %v8477_v61 = vld [vmem:[#allocation17 + $0x64] ss:$8 sps:$4 sm:$0xff]   ;;  %v8472_v20 = vld [vmem:[#allocation17 + $0x50] ss:$8 sps:$4 sm:$0xff]  }
0x28a1   :  { %5414 = vmatpush1.bf16.msra.mxu0 %v8449_v16  ;;  %v9936_v40 = vsel %vm5031_vm5, %v6360_v34, %v6359_v12  ;;  %v8469_v16 = vld [vmem:[#allocation17 + $0x70] ss:$8 sps:$4 sm:$0xff]   ;;  %v8480_v23 = vld [vmem:[#allocation17 + $0x44] ss:$8 sps:$4 sm:$0xff]   ;;  %v8478_v34 = vld [vmem:[#allocation17 + $0x40] ss:$8 sps:$4 sm:$0xff]  }
0x28a2   :  { %7376 = vmatmul.mubr.msk.bf16.vlgmr.msra.gmra.mxu1 %vm234_vm0, %v5033_v33  ;;  %5415 = vmatprep.subr.bf16.mxu0 %v8949_v47  ;;  %v8481_v33 = vld [vmem:[%s10391_s18 + $0x128] sm:$0xff]  }
0x28a3   :  { %5193 = vmatpush1.bf16.msra.mxu1 %v8450_v24  ;;  %v8475_v24 = vld [vmem:[#allocation17 + $0x60] ss:$8 sps:$4 sm:$0xff]  }
0x28a4   :  { %5194 = vmatprep.subr.bf16.mxu1 %v8949_v47 }
0x28a5   :  { %5416 = vmatpush1.bf16.msra.mxu0 %v8451_v38  ;;  %v5696_v38 = vpack.c.b16 %v9917_v30, %v9917_v30  ;;  %v8484_v30 = vld [vmem:[%s10391_s18 + $0xd0] sm:$0xff]  }
0x28a6   :  { %5417 = vmatprep.subr.bf16.mxu0 %v8949_v47 }
0x28a7   :  { %5195 = vmatpush1.bf16.msra.mxu1 %v8452_v41  ;;  %v8482_v41 = vld [vmem:[%s10391_s18 + $0xd8] sm:$0xff]  }
0x28a8   :  { %5196 = vmatprep.subr.bf16.mxu1 %v8949_v47 }
0x28a9   :  { %5418 = vmatpush1.bf16.msra.mxu0 %v8453_v42  ;;  %v5474_v42 = vpack.c.b16 %v9920_v26, %v9920_v26  ;;  %v8485_v26 = vld [vmem:[%s10391_s18 + $0x118] sm:$0xff]  }
0x28aa   :  { %5419 = vmatprep.subr.bf16.mxu0 %v8949_v47 }
0x28ab   :  { %5197 = vmatpush1.bf16.msra.mxu1 %v8454_v14  ;;  %v8483_v14 = vld [vmem:[%s10391_s18 + $0x120] sm:$0xff]  }
0x28ac   :  { %5198 = vmatprep.subr.bf16.mxu1 %v8949_v47 }
0x28ad   :  { %5420 = vmatpush1.bf16.msra.mxu0 %v8455_v32  ;;  %v8486_v32 = vld [vmem:[%s10391_s18 + $0xc8] sm:$0xff]  }
0x28ae   :  { %5421 = vmatprep.subr.bf16.mxu0 %v8949_v47 }
0x28af   :  { %5199 = vmatpush1.bf16.msra.mxu1 %v8456_v63  ;;  %v8487_v63 = vld [vmem:[%s10391_s18 + $0x110] sm:$0xff]  }
0x28b0   :  { %5200 = vmatprep.subr.bf16.mxu1 %v8949_v47 }
0x28b1   :  { %5422 = vmatpush1.bf16.msra.mxu0 %v8457_v21  ;;  %v8488_v21 = vld [vmem:[%s10391_s18 + $0xc0] sm:$0xff]  }
0x28b2   :  { %5423 = vmatprep.subr.bf16.mxu0 %v8949_v47 }
0x28b3   :  { %5201 = vmatpush1.bf16.msra.mxu1 %v8458_v56  ;;  %v8489_v56 = vld [vmem:[%s10391_s18 + $0x108] sm:$0xff]  }
0x28b4   :  { %5202 = vmatprep.subr.bf16.mxu1 %v8949_v47 }
0x28b5   :  { %5424 = vmatpush1.bf16.msra.mxu0 %v8459_v25  ;;  %v8490_v25 = vld [vmem:[%s10391_s18 + $0xb8] sm:$0xff]  }
0x28b6   :  { %5425 = vmatprep.subr.bf16.mxu0 %v8949_v47 }
0x28b7   :  { %5203 = vmatpush1.bf16.msra.mxu1 %v8460_v50  ;;  %v8491_v50 = vld [vmem:[%s10391_s18 + $0x100] sm:$0xff]  }
0x28b8   :  { %5204 = vmatprep.subr.bf16.mxu1 %v8949_v47 }
0x28b9   :  { %5426 = vmatpush1.bf16.msra.mxu0 %v8461_v1  ;;  %v8492_v1 = vld [vmem:[%s10391_s18 + $0xb0] sm:$0xff]  }
0x28ba   :  { %5427 = vmatprep.subr.bf16.mxu0 %v8949_v47 }
0x28bb   :  { %5205 = vmatpush1.bf16.msra.mxu1 %v8462_v6  ;;  %v8493_v6 = vld [vmem:[%s10391_s18 + $0xf8] sm:$0xff]  }
0x28bc   :  { %5206 = vmatprep.subr.bf16.mxu1 %v8949_v47 }
0x28bd   :  { %5428 = vmatpush1.bf16.msra.mxu0 %v8463_v43  ;;  %v8494_v43 = vld [vmem:[%s10391_s18 + $0xa8] sm:$0xff]  }
0x28be   :  { %5441 = vmatprep.subr.bf16.mxu0 %v8949_v47 }
0x28bf   :  { %5207 = vmatpush1.bf16.msra.mxu1 %v8464_v35  ;;  %v8495_v35 = vld [vmem:[%s10391_s18 + $0xf0] sm:$0xff]  }
0x28c0   :  { %5220 = vmatprep.subr.bf16.mxu1 %v8949_v47 }
0x28c1   :  { %5442 = vmatpush2.bf16.msra.mxu0 %v8465_v27  ;;  %v8496_v27 = vld [vmem:[%s10391_s18 + $0xa0] sm:$0xff]  }
0x28c2   :  { %5443 = vmatprep.subr.bf16.mxu0 %v8949_v47 }
0x28c3   :  { %5221 = vmatpush2.bf16.msra.mxu1 %v8466_v44  ;;  %v8497_v44 = vld [vmem:[%s10391_s18 + $0x138] sm:$0xff]  }
0x28c4   :  { %5222 = vmatprep.subr.bf16.mxu1 %v8949_v47 }
0x28c5   :  { %5444 = vmatpush2.bf16.msra.mxu0 %v8467_v28  ;;  %v8498_v28 = vld [vmem:[%s10391_s18 + $0xe8] sm:$0xff]  }
0x28c6   :  { %5732 = vmatprep.subr.bf16.mxu0 %v8471_v59  ;;  %v8500_v59 = vld [vmem:[%s10391_s18 + $0xe0] sm:$0xff]  }
0x28c7   :  { %5223 = vmatpush2.bf16.msra.mxu1 %v8468_v29  ;;  %v8499_v29 = vld [vmem:[%s10391_s18 + $0x130] sm:$0xff]  }
0x28c8   :  { %5510 = vmatprep.subr.bf16.mxu1 %v8474_v8  ;;  %v8503_v8 = vld [vmem:[#allocation17 + $0xb4] ss:$8 sps:$4 sm:$0xff]  }
0x2960   :  { %v5310_v54 = vpop.f32.mrf.mxu0 }
0x2961   :  { %v5311_v55 = vadd.f32 %v5310_v54, %v5243_v51  ;;  %v6788_v51 = vunpack.c.0.s8 %v6787_v49  ;;  %v8507_v49 = vld [vmem:[#allocation17 + $0xa0] ss:$8 sps:$4 sm:$0xff]  }
0x2962   :  { %v5091_v58 = vpop.f32.mrf.mxu1  ;;  %v5312_v62 = vpop.f32.mrf.mxu0 }
0x2963   :  { %v5092_v0 = vadd.f32 %v5091_v58, %v5019_v52  ;;  %v5313_v2 = vadd.f32 %v5312_v62, %v5247_v53  ;;  %v5317_v5 = vmax.f32 %v5311_v55, 0.0  ;;  %v7414_v52 = vld [vmem:[#allocation20 + $0x1] ss:$0 sm:$0xff]  ;;  %v10111_v53 = vsub.s32 %v6788_v51, %v10008_v46  ;;  %v7377_v55 = vld [vmem:[#allocation20] ss:$0 sm:$0xff] }
0x2964   :  { %v5093_v3 = vpop.f32.mrf.mxu1  ;;  %v5314_v7 = vpop.f32.mrf.mxu0  ;;  %v8510_v51 = vld [vmem:[#allocation17 + $0x80] ss:$8 sps:$4 sm:$0xff]  }
0x2965   :  { %v5318_v9 = vmax.f32 %v5313_v2, 0.0  ;;  %v5094_v10 = vadd.f32 %v5093_v3, %v5023_v57  ;;  %v5098_v4 = vmax.f32 %v5092_v0, 0.0  ;;  %v5340_v17 = vpack.c.bf16 %v5317_v5, %v5317_v5  ;;  %v5681_v0 = vld [vmem:[#allocation19 + $0x6] sm:$0x3]  ;;  %v5459_v3 = vld [vmem:[#allocation19 + $0x4] sm:$0x3] }
0x2966   :  { %v5095_v11 = vpop.f32.mrf.mxu1  ;;  %v5315_v12 = vpop.f32.mrf.mxu0  ;;  %v5686_v46 = vrot.slane %v5681_v0, %v10011_v36 }
0x2967   :  { %v5341_v13 = vpack.c.bf16 %v5318_v9, %v5318_v9  ;;  %v5099_v60 = vmax.f32 %v5094_v10, 0.0  ;;  %v5120_v22 = vpack.c.bf16 %v5098_v4, %v5098_v4 }
0x2968   :  { %v5096_v18 = vpop.f32.mrf.mxu1 }
0x2969   :  { %v5121_v19 = vpack.c.bf16 %v5099_v60, %v5099_v60  ;;  %7425 = vmatprep.mubr.msk.bf16.mxu0 %vm234_vm0, %v5341_v13  ;;  %v5464_v60 = vrot.slane %v5459_v3, %v10011_v36 }
0x296a   :  { %5446 = vmatmul.mubr.bf16.vlgmr.msra.gmra.mxu0 %v5340_v17 }
0x296b   :  { %7388 = vmatprep.mubr.msk.bf16.mxu1 %vm234_vm0, %v5121_v19  ;;  %5733 = vmatpush1.bf16.msra.mxu0 %v8469_v16  ;;  %v5690_v16 = vrot.slane %v5681_v0, %v10014_v48  ;;  %v8519_v0 = vld [vmem:[%s10391_s18 + $0x1b0] sm:$0xff]  }
0x296c   :  { %5225 = vmatmul.mubr.bf16.vlgmr.msra.gmra.mxu1 %v5120_v22  ;;  %5734 = vmatprep.subr.bf16.mxu0 %v8477_v61 }
0x296d   :  { %5511 = vmatpush1.bf16.msra.mxu1 %v8472_v20  ;;  %5752 = vmatprep.mubr.bf16.mxu0 %v8949_v47 }
0x296e   :  { %5512 = vmatprep.subr.bf16.mxu1 %v8480_v23  ;;  %5530 = vmatprep.mubr.bf16.mxu1 %v8949_v47  ;;  %v5468_v23 = vrot.slane %v5459_v3, %v10014_v48  ;;  %v8522_v3 = vld [vmem:[%s10391_s18 + $0x158] sm:$0xff]  }
0x296f   :  { %5735 = vmatpush1.bf16.msra.mxu0 %v8475_v24 }
0x2970   :  { %5857 = vmatprep.subr.bf16.mxu0 %v8949_v47 }
0x2971   :  { %5513 = vmatpush1.bf16.msra.mxu1 %v8478_v34 }
0x2972   :  { %7467 = vmatmul.mubr.msk.bf16.vlgmr.msra.gmra.mxu0 %vm234_vm0, %v5696_v38  ;;  %5635 = vmatprep.subr.bf16.mxu1 %v8949_v47 }
0x2973   :  { %5858 = vmatpush1.bf16.msra.mxu0 %v8481_v33 }
0x2974   :  { %7430 = vmatmul.mubr.msk.bf16.vlgmr.msra.gmra.mxu1 %vm234_vm0, %v5474_v42  ;;  %5859 = vmatprep.subr.bf16.mxu0 %v8949_v47 }
0x2975   :  { %5636 = vmatpush1.bf16.msra.mxu1 %v8482_v41 }
0x2976   :  { %5637 = vmatprep.subr.bf16.mxu1 %v8949_v47 }
0x2977   :  { %5860 = vmatpush1.bf16.msra.mxu0 %v8483_v14 }
0x2978   :  { %5861 = vmatprep.subr.bf16.mxu0 %v8949_v47 }
0x2979   :  { %5638 = vmatpush1.bf16.msra.mxu1 %v8484_v30 }
0x297a   :  { %5639 = vmatprep.subr.bf16.mxu1 %v8949_v47 }
0x297b   :  { %5862 = vmatpush1.bf16.msra.mxu0 %v8485_v26 }
0x297c   :  { %5863 = vmatprep.subr.bf16.mxu0 %v8949_v47 }
0x297d   :  { %5640 = vmatpush1.bf16.msra.mxu1 %v8486_v32 }
0x297e   :  { %5641 = vmatprep.subr.bf16.mxu1 %v8949_v47 }
0x297f   :  { %5864 = vmatpush1.bf16.msra.mxu0 %v8487_v63 }
0x2980   :  { %5865 = vmatprep.subr.bf16.mxu0 %v8949_v47 }
0x2981   :  { %5642 = vmatpush1.bf16.msra.mxu1 %v8488_v21 }
0x2982   :  { %5643 = vmatprep.subr.bf16.mxu1 %v8949_v47 }
0x2983   :  { %5866 = vmatpush1.bf16.msra.mxu0 %v8489_v56 }
0x2984   :  { %5867 = vmatprep.subr.bf16.mxu0 %v8949_v47 }
0x2985   :  { %5644 = vmatpush1.bf16.msra.mxu1 %v8490_v25 }
0x2986   :  { %5645 = vmatprep.subr.bf16.mxu1 %v8949_v47 }
0x2987   :  { %5868 = vmatpush1.bf16.msra.mxu0 %v8491_v50 }
0x2988   :  { %5869 = vmatprep.subr.bf16.mxu0 %v8949_v47 }
0x2989   :  { %5646 = vmatpush1.bf16.msra.mxu1 %v8492_v1 }
0x298a   :  { %5647 = vmatprep.subr.bf16.mxu1 %v8949_v47 }
0x298b   :  { %5870 = vmatpush1.bf16.msra.mxu0 %v8493_v6 }
0x298c   :  { %5871 = vmatprep.subr.bf16.mxu0 %v8949_v47 }
0x298d   :  { %5648 = vmatpush1.bf16.msra.mxu1 %v8494_v43 }
0x298e   :  { %5649 = vmatprep.subr.bf16.mxu1 %v8949_v47 }
0x298f   :  { %5872 = vmatpush1.bf16.msra.mxu0 %v8495_v35 }
0x2990   :  { %5885 = vmatprep.subr.bf16.mxu0 %v8949_v47 }
0x2991   :  { %5650 = vmatpush1.bf16.msra.mxu1 %v8496_v27  ;;  %v8501_v27 = vld [vmem:[#allocation17 + $0xb0] ss:$8 sps:$4 sm:$0xff]  }
0x2992   :  { %5663 = vmatprep.subr.bf16.mxu1 %v8949_v47 }
0x2993   :  { %5886 = vmatpush2.bf16.msra.mxu0 %v8497_v44 }
0x2994   :  { %5887 = vmatprep.subr.bf16.mxu0 %v8949_v47 }
0x2995   :  { %5664 = vmatpush2.bf16.msra.mxu1 %v8498_v28 }
0x2996   :  { %5665 = vmatprep.subr.bf16.mxu1 %v8949_v47 }
0x2997   :  { %5888 = vmatpush2.bf16.msra.mxu0 %v8499_v29  ;;  %v8509_v29 = vld [vmem:[#allocation17 + $0xa4] ss:$8 sps:$4 sm:$0xff]  }
0x2998   :  { %6176 = vmatprep.subr.bf16.mxu0 %v8503_v8  ;;  %v8504_v8 = vld [vmem:[#allocation17 + $0x90] ss:$8 sps:$4 sm:$0xff]  }
0x2999   :  { %5666 = vmatpush2.bf16.msra.mxu1 %v8500_v59 }
0x299a   :  { %5954 = vmatprep.subr.bf16.mxu1 %v8506_v45 }
0x2a2a   :  { %v5447_v54 = vpop.f32.mrf.mxu0 }
0x2a2b   :  { %v5448_v57 = vadd.f32 %v7414_v52, %v5447_v54  ;;  %v8513_v52 = vld [vmem:[%s10391_s18 + $0x1c8] sm:$0xff]   ;;  %v6140_v54 = vpack.c.b16 %v9924_v37, %v9924_v37  ;;  %v8516_v37 = vld [vmem:[%s10391_s18 + $0x170] sm:$0xff]  }
0x2a2c   :  { %v5226_v58 = vpop.f32.mrf.mxu1  ;;  %v5449_v62 = vpop.f32.mrf.mxu0 }
0x2a2d   :  { %v6817_v2 = vrot.slane %v5448_v57, %v10111_v53  ;;  %v5227_v5 = vadd.f32 %v7377_v55, %v5226_v58  ;;  %v8514_v55 = vld [vmem:[%s10391_s18 + $0x178] sm:$0xff]   ;;  %v5918_v57 = vpack.c.b16 %v9930_v39, %v9930_v39  ;;  %v8515_v58 = vld [vmem:[%s10391_s18 + $0x1c0] sm:$0xff]   ;;  %v8518_v62 = vld [vmem:[%s10391_s18 + $0x168] sm:$0xff]  }
0x2a2e   :  { %v5228_v7 = vpop.f32.mrf.mxu1  ;;  %v5450_v9 = vpop.f32.mrf.mxu0  ;;  %v8517_v39 = vld [vmem:[%s10391_s18 + $0x1b8] sm:$0xff]  }
0x2a2f   :  { %v6818_v10 = vcombine.high %v6817_v2, %v6817_v2  ;;  %v6825_v4 = vrot.slane %v6817_v2, %v10111_v53  ;;  %v6792_v11 = vrot.slane %v5227_v5, %v10111_v53  ;;  %v8520_v2 = vld [vmem:[%s10391_s18 + $0x160] sm:$0xff]   ;;  %v8521_v5 = vld [vmem:[%s10391_s18 + $0x1a8] sm:$0xff]   ;;  %v8524_v9 = vld [vmem:[%s10391_s18 + $0x150] sm:$0xff]  }
0x2a30   :  { %v5229_v12 = vpop.f32.mrf.mxu1  ;;  %v5451_v13 = vpop.f32.mrf.mxu0  ;;  %v8523_v7 = vld [vmem:[%s10391_s18 + $0x1a0] sm:$0xff]  }
0x2a31   :  { %v6832_v17 = vrot.slane %v6818_v10, %v10111_v53  ;;  %v6974_v18 = vrot.slane %v6825_v4, %v10011_v36  ;;  %v6793_v61 = vcombine.high %v6792_v11, %v6792_v11  ;;  %v6800_v19 = vrot.slane %v6792_v11, %v10111_v53  ;;  %v8525_v10 = vld [vmem:[%s10391_s18 + $0x198] sm:$0xff]   ;;  %v8526_v4 = vld [vmem:[%s10391_s18 + $0x148] sm:$0xff]   ;;  %v8527_v11 = vld [vmem:[%s10391_s18 + $0x190] sm:$0xff]  }
0x2a32   :  { %v5230_v20 = vpop.f32.mrf.mxu1  ;;  %v5754_v22 = vpop.f32.mrf.mxu0  ;;  %v8529_v12 = vld [vmem:[%s10391_s18 + $0x1d8] sm:$0xff]   ;;  %v8530_v13 = vld [vmem:[%s10391_s18 + $0x188] sm:$0xff]  }
0x2a33   :  { %v6978_v24 = vrot.slane %v6832_v17, %v10011_v36  ;;  %v6807_v34 = vrot.slane %v6793_v61, %v10111_v53  ;;  %v10126_v33 = vsel %vm7041_vm6, %v6800_v19, %v6974_v18  ;;  %v5755_v38 = vadd.f32 %v5754_v22, %v5686_v46  ;;  %v8528_v46 = vld [vmem:[%s10391_s18 + $0x140] sm:$0xff]   ;;  %v8535_v17 = vld [vmem:[#allocation17 + $0xf4] ss:$8 sps:$4 sm:$0xff]   ;;  %v7488_v61 = vld [vmem:[#allocation20 + $0x3] ss:$0 sm:$0xff] }
0x2a34   :  { %v5532_v41 = vpop.f32.mrf.mxu1  ;;  %v5756_v42 = vpop.f32.mrf.mxu0  ;;  %v8538_v18 = vld [vmem:[#allocation17 + $0xd4] ss:$8 sps:$4 sm:$0xff]   ;;  %v7451_v20 = vld [vmem:[#allocation20 + $0x2] ss:$0 sm:$0xff] }
0x2a35   :  { %v10129_v14 = vsel %vm7041_vm6, %v6807_v34, %v6978_v24  ;;  %v5533_v30 = vadd.f32 %v5532_v41, %v5464_v60  ;;  %v5757_v26 = vadd.f32 %v5756_v42, %v5690_v16  ;;  %v5761_v32 = vmax.f32 %v5755_v38, 0.0  ;;  %v8531_v60 = vld [vmem:[%s10391_s18 + $0x1d0] sm:$0xff]   ;;  %v8532_v16 = vld [vmem:[%s10391_s18 + $0x180] sm:$0xff]   ;;  %v6125_v34 = vld [vmem:[#allocation19 + $0xa] sm:$0x3] }
0x2a36   :  { %v5534_v63 = vpop.f32.mrf.mxu1  ;;  %v5758_v21 = vpop.f32.mrf.mxu0 }
0x2a37   :  { %v5762_v56 = vmax.f32 %v5757_v26, 0.0  ;;  %v5535_v25 = vadd.f32 %v5534_v63, %v5468_v23  ;;  %v5539_v50 = vmax.f32 %v5533_v30, 0.0  ;;  %v5784_v44 = vpack.c.bf16 %v5761_v32, %v5761_v32  ;;  %v5903_v26 = vld [vmem:[#allocation19 + $0x8] sm:$0x3] }
0x2a38   :  { %v5536_v1 = vpop.f32.mrf.mxu1  ;;  %v5759_v6 = vpop.f32.mrf.mxu0  ;;  %v6130_v21 = vrot.slane %v6125_v34, %v10011_v36 }
0x2a39   :  { %v5785_v43 = vpack.c.bf16 %v5762_v56, %v5762_v56  ;;  %v5540_v35 = vmax.f32 %v5535_v25, 0.0  ;;  %v5562_v45 = vpack.c.bf16 %v5539_v50, %v5539_v50 }
0x2a3a   :  { %v5537_v28 = vpop.f32.mrf.mxu1 }
0x2a3b   :  { %v5563_v59 = vpack.c.bf16 %v5540_v35, %v5540_v35  ;;  %7499 = vmatprep.mubr.msk.bf16.mxu0 %vm234_vm0, %v5785_v43  ;;  %v5908_v43 = vrot.slane %v5903_v26, %v10011_v36  ;;  %v6134_v28 = vrot.slane %v6125_v34, %v10014_v48  ;;  %v8548_v34 = vld [vmem:[%s10391_s18 + $0x210] sm:$0xff]  }
0x2a3c   :  { %5890 = vmatmul.mubr.bf16.vlgmr.msra.gmra.mxu0 %v5784_v44 }
0x2a3d   :  { %7462 = vmatprep.mubr.msk.bf16.mxu1 %vm234_vm0, %v5563_v59  ;;  %6177 = vmatpush1.bf16.msra.mxu0 %v8501_v27 }
0x2a3e   :  { %5668 = vmatmul.mubr.bf16.vlgmr.msra.gmra.mxu1 %v5562_v45  ;;  %6178 = vmatprep.subr.bf16.mxu0 %v8509_v29  ;;  %v5912_v29 = vrot.slane %v5903_v26, %v10014_v48  ;;  %v8554_v26 = vld [vmem:[%s10391_s18 + $0x1f8] sm:$0xff]  }
0x2a3f   :  { %5955 = vmatpush1.bf16.msra.mxu1 %v8504_v8  ;;  %6196 = vmatprep.mubr.bf16.mxu0 %v8949_v47 }
0x2a40   :  { %5956 = vmatprep.subr.bf16.mxu1 %v8512_v31  ;;  %5974 = vmatprep.mubr.bf16.mxu1 %v8949_v47 }
0x2a41   :  { %6179 = vmatpush1.bf16.msra.mxu0 %v8507_v49 }
0x2a42   :  { %6301 = vmatprep.subr.bf16.mxu0 %v8949_v47 }
0x2a43   :  { %5957 = vmatpush1.bf16.msra.mxu1 %v8510_v51 }
0x2a44   :  { %7541 = vmatmul.mubr.msk.bf16.vlgmr.msra.gmra.mxu0 %vm234_vm0, %v6140_v54  ;;  %6079 = vmatprep.subr.bf16.mxu1 %v8949_v47 }
0x2a45   :  { %6302 = vmatpush1.bf16.msra.mxu0 %v8513_v52 }
0x2a46   :  { %7504 = vmatmul.mubr.msk.bf16.vlgmr.msra.gmra.mxu1 %vm234_vm0, %v5918_v57  ;;  %6303 = vmatprep.subr.bf16.mxu0 %v8949_v47 }
0x2a47   :  { %6080 = vmatpush1.bf16.msra.mxu1 %v8514_v55 }
0x2a48   :  { %6081 = vmatprep.subr.bf16.mxu1 %v8949_v47 }
0x2a49   :  { %6304 = vmatpush1.bf16.msra.mxu0 %v8515_v58 }
0x2a4a   :  { %6305 = vmatprep.subr.bf16.mxu0 %v8949_v47 }
0x2a4b   :  { %6082 = vmatpush1.bf16.msra.mxu1 %v8516_v37 }
0x2a4c   :  { %6083 = vmatprep.subr.bf16.mxu1 %v8949_v47 }
0x2a4d   :  { %6306 = vmatpush1.bf16.msra.mxu0 %v8517_v39 }
0x2a4e   :  { %6307 = vmatprep.subr.bf16.mxu0 %v8949_v47 }
0x2a4f   :  { %6084 = vmatpush1.bf16.msra.mxu1 %v8518_v62 }
0x2a50   :  { %6085 = vmatprep.subr.bf16.mxu1 %v8949_v47 }
0x2a51   :  { %6308 = vmatpush1.bf16.msra.mxu0 %v8519_v0 }
0x2a52   :  { %6309 = vmatprep.subr.bf16.mxu0 %v8949_v47 }
0x2a53   :  { %6086 = vmatpush1.bf16.msra.mxu1 %v8520_v2 }
0x2a54   :  { %6087 = vmatprep.subr.bf16.mxu1 %v8949_v47 }
0x2a55   :  { %6310 = vmatpush1.bf16.msra.mxu0 %v8521_v5 }
0x2a56   :  { %6311 = vmatprep.subr.bf16.mxu0 %v8949_v47 }
0x2a57   :  { %6088 = vmatpush1.bf16.msra.mxu1 %v8522_v3 }
0x2a58   :  { %6089 = vmatprep.subr.bf16.mxu1 %v8949_v47 }
0x2a59   :  { %6312 = vmatpush1.bf16.msra.mxu0 %v8523_v7 }
0x2a5a   :  { %6313 = vmatprep.subr.bf16.mxu0 %v8949_v47 }
0x2a5b   :  { %6090 = vmatpush1.bf16.msra.mxu1 %v8524_v9 }
0x2a5c   :  { %6091 = vmatprep.subr.bf16.mxu1 %v8949_v47 }
0x2a5d   :  { %6314 = vmatpush1.bf16.msra.mxu0 %v8525_v10 }
0x2a5e   :  { %6315 = vmatprep.subr.bf16.mxu0 %v8949_v47 }
0x2a5f   :  { %6092 = vmatpush1.bf16.msra.mxu1 %v8526_v4 }
0x2a60   :  { %6093 = vmatprep.subr.bf16.mxu1 %v8949_v47 }
0x2a61   :  { %6316 = vmatpush1.bf16.msra.mxu0 %v8527_v11 }
0x2a62   :  { %6329 = vmatprep.subr.bf16.mxu0 %v8949_v47 }
0x2a63   :  { %6094 = vmatpush1.bf16.msra.mxu1 %v8528_v46 }
0x2a64   :  { %6107 = vmatprep.subr.bf16.mxu1 %v8949_v47 }
0x2a65   :  { %6330 = vmatpush2.bf16.msra.mxu0 %v8529_v12  ;;  %v8533_v12 = vld [vmem:[#allocation17 + $0xf0] ss:$8 sps:$4 sm:$0xff]  }
0x2a66   :  { %6331 = vmatprep.subr.bf16.mxu0 %v8949_v47 }
0x2a67   :  { %6108 = vmatpush2.bf16.msra.mxu1 %v8530_v13 }
0x2a68   :  { %6109 = vmatprep.subr.bf16.mxu1 %v8949_v47 }
0x2a69   :  { %6332 = vmatpush2.bf16.msra.mxu0 %v8531_v60 }
0x2a6a   :  { %6620 = vmatprep.subr.bf16.mxu0 %v8535_v17  ;;  %v8541_v17 = vld [vmem:[#allocation17 + $0xe4] ss:$8 sps:$4 sm:$0xff]  }
0x2a6b   :  { %6110 = vmatpush2.bf16.msra.mxu1 %v8532_v16  ;;  %v8536_v16 = vld [vmem:[#allocation17 + $0xd0] ss:$8 sps:$4 sm:$0xff]  }
0x2a6c   :  { %6398 = vmatprep.subr.bf16.mxu1 %v8538_v18 }
0x2afc   :  { %v5891_v19 = vpop.f32.mrf.mxu0 }
0x2afd   :  { %v5892_v22 = vadd.f32 %v7488_v61, %v5891_v19  ;;  %v8539_v61 = vld [vmem:[#allocation17 + $0xe0] ss:$8 sps:$4 sm:$0xff]  }
0x2afe   :  { %v5669_v23 = vpop.f32.mrf.mxu1  ;;  %v5893_v24 = vpop.f32.mrf.mxu0  ;;  %v8542_v19 = vld [vmem:[#allocation17 + $0xc0] ss:$8 sps:$4 sm:$0xff]  }
0x2aff   :  { %v6863_v38 = vrot.slane %v5892_v22, %v10111_v53  ;;  %v5670_v41 = vadd.f32 %v7451_v20, %v5669_v23  ;;  %v8545_v20 = vld [vmem:[%s10391_s18 + $0x268] sm:$0xff]   ;;  %v6584_v22 = vpack.c.b16 %v9933_v15, %v9933_v15  ;;  %v8546_v23 = vld [vmem:[%s10391_s18 + $0x218] sm:$0xff]   ;;  %v6362_v24 = vpack.c.b16 %v9936_v40, %v9936_v40  ;;  %v8547_v15 = vld [vmem:[%s10391_s18 + $0x260] sm:$0xff]  }
0x2b00   :  { %v5671_v42 = vpop.f32.mrf.mxu1  ;;  %v5894_v30 = vpop.f32.mrf.mxu0  ;;  %v8549_v40 = vld [vmem:[%s10391_s18 + $0x258] sm:$0xff]  }
0x2b01   :  { %v6864_v32 = vcombine.high %v6863_v38, %v6863_v38  ;;  %v6840_v63 = vrot.slane %v5670_v41, %v10111_v53  ;;  %v6871_v56 = vrot.slane %v6863_v38, %v10111_v53  ;;  %v8550_v38 = vld [vmem:[%s10391_s18 + $0x208] sm:$0xff]   ;;  %v8551_v41 = vld [vmem:[%s10391_s18 + $0x250] sm:$0xff]   ;;  %v8552_v42 = vld [vmem:[%s10391_s18 + $0x200] sm:$0xff]  }
0x2b02   :  { %v5672_v25 = vpop.f32.mrf.mxu1  ;;  %v5895_v50 = vpop.f32.mrf.mxu0  ;;  %v8553_v30 = vld [vmem:[%s10391_s18 + $0x248] sm:$0xff]  }
0x2b03   :  { %v6841_v1 = vcombine.high %v6840_v63, %v6840_v63  ;;  %v6848_v6 = vrot.slane %v6840_v63, %v10111_v53  ;;  %v6878_v35 = vrot.slane %v6864_v32, %v10111_v53  ;;  %v6994_v31 = vrot.slane %v6871_v56, %v10011_v36  ;;  %v8555_v32 = vld [vmem:[%s10391_s18 + $0x240] sm:$0xff]   ;;  %v8556_v63 = vld [vmem:[%s10391_s18 + $0x1f0] sm:$0xff]   ;;  %v8558_v56 = vld [vmem:[%s10391_s18 + $0x1e8] sm:$0xff]  }
0x2b04   :  { %v5673_v27 = vpop.f32.mrf.mxu1  ;;  %v6198_v44 = vpop.f32.mrf.mxu0  ;;  %v8559_v25 = vld [vmem:[%s10391_s18 + $0x230] sm:$0xff]   ;;  %v8560_v50 = vld [vmem:[%s10391_s18 + $0x1e0] sm:$0xff]  }
0x2b05   :  { %v6855_v59 = vrot.slane %v6841_v1, %v10111_v53  ;;  %v6984_v8 = vrot.slane %v6848_v6, %v10011_v36  ;;  %v6199_v45 = vadd.f32 %v6198_v44, %v6130_v21  ;;  %v6998_v57 = vrot.slane %v6878_v35, %v10011_v36  ;;  %v8557_v21 = vld [vmem:[%s10391_s18 + $0x238] sm:$0xff]   ;;  %v8562_v6 = vld [vmem:[%s10391_s18 + $0x228] sm:$0xff]   ;;  %v8564_v35 = vld [vmem:[%s10391_s18 + $0x220] sm:$0xff]  }
0x2b06   :  { %v5976_v49 = vpop.f32.mrf.mxu1  ;;  %v6200_v51 = vpop.f32.mrf.mxu0  ;;  %v8561_v1 = vld [vmem:[%s10391_s18 + $0x278] sm:$0xff]   ;;  %v7562_v27 = vld [vmem:[#allocation20 + $0x5] ss:$0 sm:$0xff]  ;;  %v7525_v44 = vld [vmem:[#allocation20 + $0x4] ss:$0 sm:$0xff] }
0x2b07   :  { %v6988_v52 = vrot.slane %v6855_v59, %v10011_v36  ;;  %v7045_v54 = vsel %vm7044_vm7, %v10126_v33, %v6984_v8  ;;  %v5977_v55 = vadd.f32 %v5976_v49, %v5908_v43  ;;  %v6201_v58 = vadd.f32 %v6200_v51, %v6134_v28  ;;  %v8563_v43 = vld [vmem:[%s10391_s18 + $0x270] sm:$0xff]   ;;  %s8951_s18 = smov [#allocation22]  }
0x2b08   :  { %v5978_v37 = vpop.f32.mrf.mxu1  ;;  %v6202_v39 = vpop.f32.mrf.mxu0  ;;  %v10238_v62 = vsel %vm7047_vm8, %v7045_v54, %v6994_v31  ;;  %v6205_v2 = vmax.f32 %v6199_v45, 0.0  ;;  %v6569_v31 = vld [vmem:[#allocation19 + $0xe] sm:$0x3]  ;;  %s7068_s30 = sshll.u32 %s8951_s18, 4  ;;  %s7069_s30 = int_to_ptr.vmem [resolvable:$true] %s7068_s30 }
0x2b09   :  { %v7046_v0 = vsel %vm7044_vm7, %v10129_v14, %v6988_v52  ;;  %v5979_v5 = vadd.f32 %v5978_v37, %v5912_v29  ;;  %v5983_v3 = vmax.f32 %v5977_v55, 0.0  ;;  %v6206_v7 = vmax.f32 %v6201_v58, 0.0  ;;  %v8544_v14 = vld [vmem:[#allocation17 + $0xc4] ss:$8 sps:$4 sm:$0xff]   ;;  %s8893_s11 = scalar_lea.vmem %s7069_s30, 256  ;;  %p8898_p5 = scmp.lt.s32.totalorder %s7069_s30, %s7069_s30 }
0x2b0a   :  { %v5980_v9 = vpop.f32.mrf.mxu1  ;;  %v6203_v10 = vpop.f32.mrf.mxu0  ;;  %v10243_v33 = vsel %vm7047_vm8, %v7046_v0, %v6998_v57  ;;  %v6228_v13 = vpack.c.bf16 %v6205_v2, %v6205_v2  ;;  %v6347_v52 = vld [vmem:[#allocation19 + $0xc] sm:$0x3]  ;;  %v6574_v37 = vrot.slane %v6569_v31, %v10011_v36  ;;  %p8894_p4 = scmp.ne.s32.totalorder %s7069_s30, %s8893_s11  ;;  %p8899_p6 = scmp.lt.s32.totalorder %s8893_s11, %s8893_s11 }
0x2b0b   :  { %v5984_v4 = vmax.f32 %v5979_v5, 0.0  ;;  %v6229_v11 = vpack.c.bf16 %v6206_v7, %v6206_v7  ;;  %v6006_v18 = vpack.c.bf16 %v5983_v3, %v5983_v3  ;;  %v6352_v5 = vrot.slane %v6347_v52, %v10011_v36 }
0x2b0c   :  { %v5981_v46 = vpop.f32.mrf.mxu1  ;;  %v6578_v9 = vrot.slane %v6569_v31, %v10014_v48  ;;  %p8900_p7 = por %p8899_p6, %p8898_p5 }
0x2b0d   :  { %v6007_v60 = vpack.c.bf16 %v5984_v4, %v5984_v4  ;;  %7573 = vmatprep.mubr.msk.bf16.mxu0 %vm234_vm0, %v6229_v11  ;;  %v6356_v46 = vrot.slane %v6347_v52, %v10014_v48 }
0x2b0e   :  { %6334 = vmatmul.mubr.bf16.vlgmr.msra.gmra.mxu0 %v6228_v13  ;;  %p8901_p8 = pnand %p8900_p7, %p8894_p4 }
0x2b0f   :  { %7536 = vmatprep.mubr.msk.bf16.mxu1 %vm234_vm0, %v6007_v60  ;;  %6621 = vmatpush1.bf16.msra.mxu0 %v8533_v12 }
0x2b10   :  { %6112 = vmatmul.mubr.bf16.vlgmr.msra.gmra.mxu1 %v6006_v18  ;;  %6622 = vmatprep.subr.bf16.mxu0 %v8541_v17 }
0x2b11   :  { %6399 = vmatpush1.bf16.msra.mxu1 %v8536_v16  ;;  %6640 = vmatprep.mubr.bf16.mxu0 %v8949_v47 }
0x2b12   :  { %6400 = vmatprep.subr.bf16.mxu1 %v8544_v14  ;;  %6418 = vmatprep.mubr.bf16.mxu1 %v8949_v47 }
0x2b13   :  { %6623 = vmatpush1.bf16.msra.mxu0 %v8539_v61 }
0x2b14   :  { %6745 = vmatprep.subr.bf16.mxu0 %v8949_v47 }
0x2b15   :  { %6401 = vmatpush1.bf16.msra.mxu1 %v8542_v19 }
0x2b16   :  { %6523 = vmatprep.subr.bf16.mxu1 %v8949_v47  ;;  %7615 = vmatmul.mubr.msk.bf16.vlgmr.msra.gmra.mxu0 %vm234_vm0, %v6584_v22 }
0x2b17   :  { %6746 = vmatpush1.bf16.msra.mxu0 %v8545_v20 }
0x2b18   :  { %7578 = vmatmul.mubr.msk.bf16.vlgmr.msra.gmra.mxu1 %vm234_vm0, %v6362_v24  ;;  %6747 = vmatprep.subr.bf16.mxu0 %v8949_v47 }
0x2b19   :  { %6524 = vmatpush1.bf16.msra.mxu1 %v8546_v23 }
0x2b1a   :  { %6525 = vmatprep.subr.bf16.mxu1 %v8949_v47 }
0x2b1b   :  { %6748 = vmatpush1.bf16.msra.mxu0 %v8547_v15 }
0x2b1c   :  { %6749 = vmatprep.subr.bf16.mxu0 %v8949_v47 }
0x2b1d   :  { %6526 = vmatpush1.bf16.msra.mxu1 %v8548_v34 }
0x2b1e   :  { %6527 = vmatprep.subr.bf16.mxu1 %v8949_v47 }
0x2b1f   :  { %6750 = vmatpush1.bf16.msra.mxu0 %v8549_v40 }
0x2b20   :  { %6751 = vmatprep.subr.bf16.mxu0 %v8949_v47 }
0x2b21   :  { %6528 = vmatpush1.bf16.msra.mxu1 %v8550_v38 }
0x2b22   :  { %6529 = vmatprep.subr.bf16.mxu1 %v8949_v47 }
0x2b23   :  { %6752 = vmatpush1.bf16.msra.mxu0 %v8551_v41 }
0x2b24   :  { %6753 = vmatprep.subr.bf16.mxu0 %v8949_v47 }
0x2b25   :  { %6530 = vmatpush1.bf16.msra.mxu1 %v8552_v42 }
0x2b26   :  { %6531 = vmatprep.subr.bf16.mxu1 %v8949_v47 }
0x2b27   :  { %6754 = vmatpush1.bf16.msra.mxu0 %v8553_v30 }
0x2b28   :  { %6755 = vmatprep.subr.bf16.mxu0 %v8949_v47 }
0x2b29   :  { %6532 = vmatpush1.bf16.msra.mxu1 %v8554_v26 }
0x2b2a   :  { %6533 = vmatprep.subr.bf16.mxu1 %v8949_v47 }
0x2b2b   :  { %6756 = vmatpush1.bf16.msra.mxu0 %v8555_v32 }
0x2b2c   :  { %6757 = vmatprep.subr.bf16.mxu0 %v8949_v47 }
0x2b2d   :  { %6534 = vmatpush1.bf16.msra.mxu1 %v8556_v63 }
0x2b2e   :  { %6535 = vmatprep.subr.bf16.mxu1 %v8949_v47 }
0x2b2f   :  { %6758 = vmatpush1.bf16.msra.mxu0 %v8557_v21 }
0x2b30   :  { %6759 = vmatprep.subr.bf16.mxu0 %v8949_v47 }
0x2b31   :  { %6536 = vmatpush1.bf16.msra.mxu1 %v8558_v56  ;;  %v7636_v56 = vld [vmem:[#allocation20 + $0x7] ss:$0 sm:$0xff] }
0x2b32   :  { %6537 = vmatprep.subr.bf16.mxu1 %v8949_v47 }
0x2b33   :  { %6760 = vmatpush1.bf16.msra.mxu0 %v8559_v25 }
0x2b34   :  { %6773 = vmatprep.subr.bf16.mxu0 %v8949_v47 }
0x2b35   :  { %6538 = vmatpush1.bf16.msra.mxu1 %v8560_v50 }
0x2b36   :  { %6551 = vmatprep.subr.bf16.mxu1 %v8949_v47 }
0x2b37   :  { %6774 = vmatpush2.bf16.msra.mxu0 %v8561_v1 }
0x2b38   :  { %6775 = vmatprep.subr.bf16.mxu0 %v8949_v47 }
0x2b39   :  { %6552 = vmatpush2.bf16.msra.mxu1 %v8562_v6 }
0x2b3a   :  { %6553 = vmatprep.subr.bf16.mxu1 %v8949_v47 }
0x2b3b   :  { %6776 = vmatpush2.bf16.msra.mxu0 %v8563_v43 }
0x2b3d   :  { %6554 = vmatpush2.bf16.msra.mxu1 %v8564_v35 }
0x2bce   :  { %v6335_v28 = vpop.f32.mrf.mxu0 }
0x2bcf   :  { %v6336_v29 = vadd.f32 %v7562_v27, %v6335_v28 }
0x2bd0   :  { %v6113_v59 = vpop.f32.mrf.mxu1  ;;  %v6337_v45 = vpop.f32.mrf.mxu0 }
0x2bd1   :  { %v6114_v8 = vadd.f32 %v7525_v44, %v6113_v59  ;;  %v6909_v49 = vrot.slane %v6336_v29, %v10111_v53 }
0x2bd2   :  { %v6115_v51 = vpop.f32.mrf.mxu1  ;;  %v6338_v54 = vpop.f32.mrf.mxu0 }
0x2bd3   :  { %v6886_v47 = vrot.slane %v6114_v8, %v10111_v53  ;;  %v6910_v55 = vcombine.high %v6909_v49, %v6909_v49  ;;  %v6917_v57 = vrot.slane %v6909_v49, %v10111_v53 }
0x2bd4   :  { %v6116_v58 = vpop.f32.mrf.mxu1  ;;  %v6339_v2 = vpop.f32.mrf.mxu0 }
0x2bd5   :  { %v6887_v39 = vcombine.high %v6886_v47, %v6886_v47  ;;  %v6894_v0 = vrot.slane %v6886_v47, %v10111_v53  ;;  %v6924_v3 = vrot.slane %v6910_v55, %v10111_v53  ;;  %v7014_v12 = vrot.slane %v6917_v57, %v10011_v36 }
0x2bd6   :  { %v6117_v7 = vpop.f32.mrf.mxu1  ;;  %v6642_v11 = vpop.f32.mrf.mxu0 }
0x2bd7   :  { %v6901_v10 = vrot.slane %v6887_v39, %v10111_v53  ;;  %v7004_v4 = vrot.slane %v6894_v0, %v10011_v36  ;;  %v6643_v13 = vadd.f32 %v6642_v11, %v6574_v37  ;;  %v7018_v61 = vrot.slane %v6924_v3, %v10011_v36 }
0x2bd8   :  { %v6420_v60 = vpop.f32.mrf.mxu1  ;;  %v6644_v14 = vpop.f32.mrf.mxu0 }
0x2bd9   :  { %v7008_v16 = vrot.slane %v6901_v10, %v10011_v36  ;;  %v7050_v17 = vsel %vm549_vm2, %v10238_v62, %v7004_v4  ;;  %v6421_v18 = vadd.f32 %v6420_v60, %v6352_v5  ;;  %v6645_v19 = vadd.f32 %v6644_v14, %v6578_v9 }
0x2bda   :  { %v6422_v20 = vpop.f32.mrf.mxu1  ;;  %v7053_v22 = vsel %vm7052_vm9, %v7050_v17, %v7014_v12  ;;  %v6649_v23 = vmax.f32 %v6643_v13, 0.0  ;;  %v6646_v24 = vpop.f32.mrf.mxu0 }
0x2bdb   :  { %v6423_v48 = vadd.f32 %v6422_v20, %v6356_v46  ;;  %v7051_v15 = vsel %vm549_vm2, %v10243_v33, %v7008_v16  ;;  %v6427_v34 = vmax.f32 %v6421_v18, 0.0  ;;  %v6650_v40 = vmax.f32 %v6645_v19, 0.0  ;;  %v7599_v33 = vld [vmem:[#allocation20 + $0x6] ss:$0 sm:$0xff] }
0x2bdc   :  { %v6424_v38 = vpop.f32.mrf.mxu1  ;;  %v7054_v41 = vsel %vm7052_vm9, %v7051_v15, %v7018_v61  ;;  %v6647_v42 = vpop.f32.mrf.mxu0  ;;  %v6672_v32 = vpack.c.bf16 %v6649_v23, %v6649_v23 }
0x2bdd   :  { %v6428_v62 = vmax.f32 %v6423_v48, 0.0  ;;  %v6673_v30 = vpack.c.bf16 %v6650_v40, %v6650_v40  ;;  %v6450_v21 = vpack.c.bf16 %v6427_v34, %v6427_v34 }
0x2bde   :  { %v6425_v26 = vpop.f32.mrf.mxu1 }
0x2bdf   :  { %v6451_v63 = vpack.c.bf16 %v6428_v62, %v6428_v62  ;;  %7647 = vmatprep.mubr.msk.bf16.mxu0 %vm234_vm0, %v6673_v30 }
0x2be0   :  { %6778 = vmatmul.mubr.bf16.vlgmr.msra.gmra.mxu0 %v6672_v32 }
0x2be1   :  { %7610 = vmatprep.mubr.msk.bf16.mxu1 %vm234_vm0, %v6451_v63 }
0x2be2   :  { %6556 = vmatmul.mubr.bf16.vlgmr.msra.gmra.mxu1 %v6450_v21 }
0x2ca0   :  { %v6779_v25 = vpop.f32.mrf.mxu0 }
0x2ca1   :  { %v6780_v50 = vadd.f32 %v7636_v56, %v6779_v25 }
0x2ca2   :  { %v6557_v1 = vpop.f32.mrf.mxu1  ;;  %v6781_v43 = vpop.f32.mrf.mxu0 }
0x2ca3   :  { %v6558_v6 = vadd.f32 %v7599_v33, %v6557_v1  ;;  %v6955_v35 = vrot.slane %v6780_v50, %v10111_v53 }
0x2ca4   :  { %v6559_v27 = vpop.f32.mrf.mxu1  ;;  %v6782_v28 = vpop.f32.mrf.mxu0 }
0x2ca5   :  { %v6932_v44 = vrot.slane %v6558_v6, %v10111_v53  ;;  %v6956_v29 = vcombine.high %v6955_v35, %v6955_v35  ;;  %v6963_v59 = vrot.slane %v6955_v35, %v10111_v53 }
0x2ca6   :  { %v6560_v8 = vpop.f32.mrf.mxu1  ;;  %v6783_v49 = vpop.f32.mrf.mxu0 }
0x2ca7   :  { %v6933_v45 = vcombine.high %v6932_v44, %v6932_v44  ;;  %v6940_v31 = vrot.slane %v6932_v44, %v10111_v53  ;;  %v6970_v51 = vrot.slane %v6956_v29, %v10111_v53  ;;  %v7034_v55 = vrot.slane %v6963_v59, %v10011_v36 }
0x2ca8   :  { %v6561_v52 = vpop.f32.mrf.mxu1 }
0x2ca9   :  { %v6947_v47 = vrot.slane %v6933_v45, %v10111_v53  ;;  %v7024_v54 = vrot.slane %v6940_v31, %v10011_v36  ;;  %v7038_v37 = vrot.slane %v6970_v51, %v10011_v36 }
0x2cab   :  { %v7028_v57 = vrot.slane %v6947_v47, %v10011_v36  ;;  %v7056_v58 = vsel %vm7055_vm10, %v7053_v22, %v7024_v54 }
0x2cac   :  { %v7059_v39 = vsel %vm7058_vm11, %v7056_v58, %v7034_v55 }
0x2cad   :  { %v7057_v0 = vsel %vm7055_vm10, %v7054_v41, %v7028_v57  ;;  %7061 = vst [vmem:[#allocation22] sm:$0xff] %v7059_v39 }
0x2cae   :  { %v7060_v2 = vsel %vm7058_vm11, %v7057_v0, %v7038_v37 }
0x2caf   :  { %7062 = vst [vmem:[#allocation22 + $0x8] sm:$0xff] %v7060_v2 }
0x2cb0   :  { %8904 = shalt.err (!%p8901_p8)
}
0x2cb1   :  { %7074 = dma.vmem_to_hbm [thread:$0]  %s7069_s30, 256, %s10393_s20, [#allocation4], %s8937_s0, %s8937_s0, %s8938_s21  }
0x2cb2   :  { %8927 = dma.done.wait [#allocation4], 256  }
0x2cb3   :  { %8928 = vsyncadd [#allocation4], 4294967040 }
0x2cb4   :  { %7078 = vsyncpa [#allocation3], 1 }
0x2cb5   :  { %7079 = vsyncpa [#allocation6], 1 }
0x2cb6   :  { %7080 = vsyncpa [#allocation9], 1 }
0x2cb7   :  { %7081 = vsyncpa [#allocation12], 1 }
0x2cb8   :  { %7082 = vsyncpa [#allocation15], 1 }
0x2cb9   :  { %7083 = vsyncpa [#allocation18], 1 }
0x2cba   :  { %7084 = vsyncpa [#allocation21], 1 }
0x2cbb   :  { %7085 = vsyncpa [#allocation4], 1 }

</bundles_post_ra>
